<compile_context>
chip_gen: v7x
topology: tpu7x:2x2x1
jax: 0.10.0
libtpu: 0.0.40
codegen_flags: <defaults>
</compile_context>

<pallas_src>
import functools

import jax
import jax.numpy as jnp
from jax.experimental import pallas as pl
from jax.experimental.pallas import tpu as pltpu


# ---------------------------------------------------------------------------
# Fused encoder kernel
# ---------------------------------------------------------------------------


def _ln_f32(x, g, b, eps):
    mu = jnp.mean(x, axis=-1, keepdims=True)
    var = jnp.mean(jnp.square(x - mu), axis=-1, keepdims=True)
    return (x - mu) * jax.lax.rsqrt(var + eps) * g + b


def _encoder_kernel(x_ref, mask_ref, eg_ref, eb_ref,
                    wqkv_ref, bqkv_ref, wo_ref, bo_ref, ln1g_ref, ln1b_ref,
                    w1_ref, b1_ref, w2_ref, b2_ref, ln2g_ref, ln2b_ref,
                    o_ref, *, num_layers, num_heads, eps):
    """Whole RoBERTa encoder for one batch tile, fully resident in VMEM."""
    bt, seq, hid = x_ref.shape
    rows = bt * seq
    dh = hid // num_heads

    # Embedding LayerNorm fused in (one fewer pallas_call + HBM round-trip).
    x = _ln_f32(x_ref[...].reshape(rows, hid), eg_ref[...], eb_ref[...], eps)

    mask_all = mask_ref[...]                       # [bt, 1, S] additive bias, f32

    for l in range(num_layers):                    # static loop, weights indexed statically
        # ---------------- attention block ----------------
        # Fused QKV projection over ALL bt*seq rows (single MXU pass), cast to bf16 once.
        qkv = (jnp.dot(x.astype(jnp.bfloat16), wqkv_ref[l],
                       preferred_element_type=jnp.float32) + bqkv_ref[l]
               ).astype(jnp.bfloat16)              # [rows, 3H] bf16

        ctx_rows = []
        for b in range(bt):                        # per-sequence softmax attention
            r0 = b * seq
            q = qkv[r0:r0 + seq, 0 * hid:1 * hid]
            k = qkv[r0:r0 + seq, 1 * hid:2 * hid]
            v = qkv[r0:r0 + seq, 2 * hid:3 * hid]
            # broadcast hoisted out of the head loop (no per-head broadcast_in_dim)
            mask_b = jnp.broadcast_to(mask_all[b], (seq, seq))

            head_ctx = []
            for h in range(num_heads):
                sl = slice(h * dh, (h + 1) * dh)
                # 1/sqrt(dh) is pre-folded into the Q columns of wqkv / Q part of bqkv.
                s = jax.lax.dot_general(q[:, sl], k[:, sl],
                                        (((1,), (1,)), ((), ())),
                                        preferred_element_type=jnp.float32) + mask_b
                s = s - jnp.max(s, axis=-1, keepdims=True)
                p = jnp.exp(s)
                inv = pl.reciprocal(jnp.sum(p, axis=-1, keepdims=True), approx=True)
                head_ctx.append(jnp.dot(p.astype(jnp.bfloat16), v[:, sl],
                                        preferred_element_type=jnp.float32) * inv)
            # lane-concat heads -> [S, H]; cheap XLU work, enables full-depth out-proj.
            ctx_rows.append(jnp.concatenate(head_ctx, axis=-1))
        ctx = ctx_rows[0] if bt == 1 else jnp.concatenate(ctx_rows, axis=0)   # [rows, H]

        # Single [rows,H] x [H,H] output projection (replaces num_heads K=dh matmuls).
        attn = jnp.dot(ctx.astype(jnp.bfloat16), wo_ref[l],
                       preferred_element_type=jnp.float32) + bo_ref[l]
        x = _ln_f32(attn + x, ln1g_ref[l], ln1b_ref[l], eps)

        # ---------------- FFN block ----------------
        h1 = jnp.dot(x.astype(jnp.bfloat16), w1_ref[l],
                     preferred_element_type=jnp.float32) + b1_ref[l]
        # TODO(synk): RoBERTa uses exact erf-GELU; tanh-approximate GELU (f32) used here.
        h1 = jax.nn.gelu(h1, approximate=True)
        ff = jnp.dot(h1.astype(jnp.bfloat16), w2_ref[l],
                     preferred_element_type=jnp.float32) + b2_ref[l]
        x = _ln_f32(ff + x, ln2g_ref[l], ln2b_ref[l], eps)

    o_ref[...] = x.reshape(bt, seq, hid)


def roberta_encoder(emb, mask_bias, p, *, num_heads, num_layers, batch_tile=8, eps=1e-5):
    """One pallas_call for the whole encoder, grid over batch tiles."""
    bsz, seq, hid = emb.shape
    inter = p["w1"].shape[-1]

    # Batch tile: as large as requested, but keep >= 2 grid steps whenever bsz >= 2 so both
    # v7x TensorCores get work under dimension_semantics=("parallel",).
    bt = max(1, min(batch_tile, bsz))
    if bsz >= 2:
        bt = max(1, min(bt, bsz // 2))
    grid = (pl.cdiv(bsz, bt),)

    def rep3(shape):   # replicated (constant-index) 3-D operand, full array per step
        return pl.BlockSpec(shape, lambda i: (0, 0, 0))

    def rep2(shape):
        return pl.BlockSpec(shape, lambda i: (0, 0))

    L = num_layers
    in_specs = [
        pl.BlockSpec((bt, seq, hid), lambda i: (i, 0, 0)),   # embeddings (pre-LN)
        pl.BlockSpec((bt, 1, seq), lambda i: (i, 0, 0)),     # additive attention-mask bias
        rep2((1, hid)), rep2((1, hid)),                      # embedding LN gamma/beta
        rep3((L, hid, 3 * hid)), rep3((L, 1, 3 * hid)),      # wqkv / bqkv
        rep3((L, hid, hid)), rep3((L, 1, hid)),              # wo / bo
        rep3((L, 1, hid)), rep3((L, 1, hid)),                # ln1 gamma/beta
        rep3((L, hid, inter)), rep3((L, 1, inter)),          # w1 / b1
        rep3((L, inter, hid)), rep3((L, 1, hid)),            # w2 / b2
        rep3((L, 1, hid)), rep3((L, 1, hid)),                # ln2 gamma/beta
    ]

    return pl.pallas_call(
        functools.partial(_encoder_kernel, num_layers=num_layers,
                          num_heads=num_heads, eps=eps),
        out_shape=jax.ShapeDtypeStruct((bsz, seq, hid), jnp.float32),
        grid=grid,
        in_specs=in_specs,
        out_specs=pl.BlockSpec((bt, seq, hid), lambda i: (i, 0, 0)),
        compiler_params=pltpu.CompilerParams(
            dimension_semantics=("parallel",),
            vmem_limit_bytes=48 * 1024 * 1024,
        ),
    )(emb, mask_bias, p["emb_ln_g"], p["emb_ln_b"],
      p["wqkv"], p["bqkv"], p["wo"], p["bo"], p["ln1_g"], p["ln1_b"],
      p["w1"], p["b1"], p["w2"], p["b2"], p["ln2_g"], p["ln2_b"])


# ---------------------------------------------------------------------------
# Model (glue in plain JAX: embedding gathers, position ids, tiny CLS head)
# ---------------------------------------------------------------------------

CFG = dict(
    vocab=64,        # len(tokenizer) after adding <SEP> (synthetic)
    hidden=128,      # lane-dense synthetic stand-in for self.hiddenDim
    heads=4,
    layers=2,
    inter=512,       # 4 * hidden, like RoBERTa
    max_pos=40,
    type_vocab=1,
    pad_id=1,        # RoBERTa padding_idx
    num_labels=2,    # W2 = nn.Linear(hiddenDim, 2)
)


def init_params(key, cfg):
    """Weights built directly in kernel-ready layout: per-layer params stacked on a leading
    [L] axis, QKV fused to [H, 3H] with the 1/sqrt(d_head) scale folded into the Q columns
    (and Q bias), matmul weights pre-cast to bf16, biases / LN params pre-reshaped to [1, n].
    """
    hid, inter, L = cfg["hidden"], cfg["inter"], cfg["layers"]
    dh = hid // cfg["heads"]
    scale = 1.0 / float(dh) ** 0.5

    def nrm(k, shape, s=0.02):
        return s * jax.random.normal(k, shape, jnp.float32)

    keys = iter(jax.random.split(key, 4 + 6 * L))
    params = {
        "word_emb": nrm(next(keys), (cfg["vocab"], hid)),
        "pos_emb": nrm(next(keys), (cfg["max_pos"], hid)),
        "type_emb": nrm(next(keys), (cfg["type_vocab"], hid)),
        "emb_ln_g": jnp.ones((1, hid), jnp.float32),
        "emb_ln_b": jnp.zeros((1, hid), jnp.float32),
        "head_w": nrm(next(keys), (hid, cfg["num_labels"])),
        "head_b": jnp.zeros((cfg["num_labels"],), jnp.float32),
    }

    wqkv, bqkv, wo, bo, ln1g, ln1b, w1, b1, w2, b2, ln2g, ln2b = ([] for _ in range(12))
    for _ in range(L):
        wq = nrm(next(keys), (hid, hid))
        wk = nrm(next(keys), (hid, hid))
        wv = nrm(next(keys), (hid, hid))
        bq = jnp.zeros((hid,), jnp.float32)
        bk = jnp.zeros((hid,), jnp.float32)
        bv = jnp.zeros((hid,), jnp.float32)
        # fold softmax scale into the Q projection (weights AND bias, consistently)
        wqkv.append(jnp.concatenate([wq * scale, wk, wv], axis=1))
        bqkv.append(jnp.concatenate([bq * scale, bk, bv])[None, :])
        wo.append(nrm(next(keys), (hid, hid)))
        bo.append(jnp.zeros((1, hid), jnp.float32))
        ln1g.append(jnp.ones((1, hid), jnp.float32))
        ln1b.append(jnp.zeros((1, hid), jnp.float32))
        w1.append(nrm(next(keys), (hid, inter)))
        b1.append(jnp.zeros((1, inter), jnp.float32))
        w2.append(nrm(next(keys), (inter, hid)))
        b2.append(jnp.zeros((1, hid), jnp.float32))
        ln2g.append(jnp.ones((1, hid), jnp.float32))
        ln2b.append(jnp.zeros((1, hid), jnp.float32))

    params.update(
        wqkv=jnp.stack(wqkv).astype(jnp.bfloat16),
        bqkv=jnp.stack(bqkv),
        wo=jnp.stack(wo).astype(jnp.bfloat16),
        bo=jnp.stack(bo),
        ln1_g=jnp.stack(ln1g), ln1_b=jnp.stack(ln1b),
        w1=jnp.stack(w1).astype(jnp.bfloat16), b1=jnp.stack(b1),
        w2=jnp.stack(w2).astype(jnp.bfloat16), b2=jnp.stack(b2),
        ln2_g=jnp.stack(ln2g), ln2_b=jnp.stack(ln2b),
    )
    return params


def fine_model_forward(params, input_ids, attention_mask, cfg=CFG, batch_tile=8):
    bsz, seq = input_ids.shape
    hid = cfg["hidden"]
    pad_id = cfg["pad_id"]

    # --- RoBERTa embeddings (gathers / cumsum are glue; the LN runs inside the kernel) ---
    mask_int = (input_ids != pad_id).astype(jnp.int32)
    pos_ids = jnp.cumsum(mask_int, axis=1) * mask_int + pad_id      # RoBERTa position ids
    emb = (params["word_emb"][input_ids]
           + params["pos_emb"][pos_ids]
           + params["type_emb"][jnp.zeros_like(input_ids)])

    # additive attention-mask bias (f32), shared across heads / query positions
    mask_bias = ((1.0 - attention_mask.astype(jnp.float32)) * jnp.float32(-1e9))[:, None, :]

    # --- whole encoder: one fused pallas_call ---
    hidden = roberta_encoder(emb, mask_bias, params,
                             num_heads=cfg["heads"], num_layers=cfg["layers"],
                             batch_tile=batch_tile)

    # --- CLS token + W2 head (2-wide matmul: plain JAX, a kernel is pure launch overhead) ---
    cls_outputs = hidden[:, 0, :]
    return cls_outputs @ params["head_w"] + params["head_b"]


if __name__ == "__main__":
    B, S = 2, 16
    key = jax.random.PRNGKey(0)
    k_ids, k_params = jax.random.split(key)

    input_ids = jax.random.randint(k_ids, (B, S), minval=4, maxval=CFG["vocab"], dtype=jnp.int32)
    input_ids = input_ids.at[:, 0].set(0)                 # CLS token
    input_ids = input_ids.at[1, -1].set(CFG["pad_id"])    # one padded position
    attention_mask = jnp.ones((B, S), jnp.int32).at[1, -1].set(0)

    params = init_params(k_params, CFG)

    logits = fine_model_forward(params, input_ids, attention_mask)
    jax.block_until_ready(logits)
    assert logits.shape == (B, CFG["num_labels"])
    assert bool(jnp.all(jnp.isfinite(logits)))
    print("KERNEL_OK")
</pallas_src>

<mosaic_0001>
module attributes {stable_mosaic.version = 11 : i64} {
  func.func @_encoder_kernel(%arg0: i32, %arg1: memref<1x16x128xf32, #tpu.memory_space<vmem>>, %arg2: memref<1x1x16xf32, #tpu.memory_space<vmem>>, %arg3: memref<1x128xf32, #tpu.memory_space<vmem>>, %arg4: memref<1x128xf32, #tpu.memory_space<vmem>>, %arg5: memref<2x128x384xbf16, #tpu.memory_space<vmem>>, %arg6: memref<2x1x384xf32, #tpu.memory_space<vmem>>, %arg7: memref<2x128x128xbf16, #tpu.memory_space<vmem>>, %arg8: memref<2x1x128xf32, #tpu.memory_space<vmem>>, %arg9: memref<2x1x128xf32, #tpu.memory_space<vmem>>, %arg10: memref<2x1x128xf32, #tpu.memory_space<vmem>>, %arg11: memref<2x128x512xbf16, #tpu.memory_space<vmem>>, %arg12: memref<2x1x512xf32, #tpu.memory_space<vmem>>, %arg13: memref<2x512x128xbf16, #tpu.memory_space<vmem>>, %arg14: memref<2x1x128xf32, #tpu.memory_space<vmem>>, %arg15: memref<2x1x128xf32, #tpu.memory_space<vmem>>, %arg16: memref<2x1x128xf32, #tpu.memory_space<vmem>>, %arg17: memref<1x16x128xf32, #tpu.memory_space<vmem>>) attributes {dimension_semantics = [#tpu.dimension_semantics<parallel>], iteration_bounds = array<i64: 2>, scalar_prefetch = 0 : i64, scratch_operands = 0 : i64, tpu.core_type = #tpu.core_type<tc>, window_params = [{transform_indices = @transform_0, window_bounds = array<i64: 1, 16, 128>}, {transform_indices = @transform_1, window_bounds = array<i64: 1, 1, 16>}, {pipeline_mode = #tpu.pipeline_mode<synchronous>, transform_indices = @transform_2, window_bounds = array<i64: 1, 128>}, {pipeline_mode = #tpu.pipeline_mode<synchronous>, transform_indices = @transform_3, window_bounds = array<i64: 1, 128>}, {pipeline_mode = #tpu.pipeline_mode<synchronous>, transform_indices = @transform_4, window_bounds = array<i64: 2, 128, 384>}, {pipeline_mode = #tpu.pipeline_mode<synchronous>, transform_indices = @transform_5, window_bounds = array<i64: 2, 1, 384>}, {pipeline_mode = #tpu.pipeline_mode<synchronous>, transform_indices = @transform_6, window_bounds = array<i64: 2, 128, 128>}, {pipeline_mode = #tpu.pipeline_mode<synchronous>, transform_indices = @transform_7, window_bounds = array<i64: 2, 1, 128>}, {pipeline_mode = #tpu.pipeline_mode<synchronous>, transform_indices = @transform_8, window_bounds = array<i64: 2, 1, 128>}, {pipeline_mode = #tpu.pipeline_mode<synchronous>, transform_indices = @transform_9, window_bounds = array<i64: 2, 1, 128>}, {pipeline_mode = #tpu.pipeline_mode<synchronous>, transform_indices = @transform_10, window_bounds = array<i64: 2, 128, 512>}, {pipeline_mode = #tpu.pipeline_mode<synchronous>, transform_indices = @transform_11, window_bounds = array<i64: 2, 1, 512>}, {pipeline_mode = #tpu.pipeline_mode<synchronous>, transform_indices = @transform_12, window_bounds = array<i64: 2, 512, 128>}, {pipeline_mode = #tpu.pipeline_mode<synchronous>, transform_indices = @transform_13, window_bounds = array<i64: 2, 1, 128>}, {pipeline_mode = #tpu.pipeline_mode<synchronous>, transform_indices = @transform_14, window_bounds = array<i64: 2, 1, 128>}, {pipeline_mode = #tpu.pipeline_mode<synchronous>, transform_indices = @transform_15, window_bounds = array<i64: 2, 1, 128>}, {transform_indices = @transform_16, window_bounds = array<i64: 1, 16, 128>}]} {
    %c0 = arith.constant 0 : index
    %c0_0 = arith.constant 0 : index
    %c0_1 = arith.constant 0 : index
    %0 = vector.load %arg1[%c0, %c0_0, %c0_1] : memref<1x16x128xf32, #tpu.memory_space<vmem>>, vector<1x16x128xf32>
    %1 = vector.shape_cast %0 : vector<1x16x128xf32> to vector<16x128xf32>
    %c0_2 = arith.constant 0 : index
    %c0_3 = arith.constant 0 : index
    %2 = vector.load %arg3[%c0_2, %c0_3] : memref<1x128xf32, #tpu.memory_space<vmem>>, vector<1x128xf32>
    %c0_4 = arith.constant 0 : index
    %c0_5 = arith.constant 0 : index
    %3 = vector.load %arg4[%c0_4, %c0_5] : memref<1x128xf32, #tpu.memory_space<vmem>>, vector<1x128xf32>
    %cst = arith.constant dense<0.000000e+00> : vector<16xf32>
    %4 = vector.multi_reduction <add>, %1, %cst [1] : vector<16x128xf32> to vector<16xf32>
    %5 = vector.shape_cast %4 : vector<16xf32> to vector<16x1xf32>
    %cst_6 = arith.constant 1.280000e+02 : f32
    %6 = vector.broadcast %cst_6 : f32 to vector<16x1xf32>
    %7 = arith.divf %5, %6 : vector<16x1xf32>
    %8 = vector.broadcast %7 : vector<16x1xf32> to vector<16x128xf32>
    %9 = arith.subf %1, %8 : vector<16x128xf32>
    %10 = arith.mulf %9, %9 : vector<16x128xf32>
    %cst_7 = arith.constant dense<0.000000e+00> : vector<16xf32>
    %11 = vector.multi_reduction <add>, %10, %cst_7 [1] : vector<16x128xf32> to vector<16xf32>
    %12 = vector.shape_cast %11 : vector<16xf32> to vector<16x1xf32>
    %cst_8 = arith.constant 1.280000e+02 : f32
    %13 = vector.broadcast %cst_8 : f32 to vector<16x1xf32>
    %14 = arith.divf %12, %13 : vector<16x1xf32>
    %15 = vector.broadcast %7 : vector<16x1xf32> to vector<16x128xf32>
    %16 = arith.subf %1, %15 : vector<16x128xf32>
    %cst_9 = arith.constant 9.99999974E-6 : f32
    %17 = vector.broadcast %cst_9 : f32 to vector<16x1xf32>
    %18 = arith.addf %14, %17 : vector<16x1xf32>
    %19 = math.rsqrt %18 : vector<16x1xf32>
    %20 = vector.broadcast %19 : vector<16x1xf32> to vector<16x128xf32>
    %21 = arith.mulf %16, %20 : vector<16x128xf32>
    %22 = vector.broadcast %2 : vector<1x128xf32> to vector<16x128xf32>
    %23 = arith.mulf %21, %22 : vector<16x128xf32>
    %24 = vector.broadcast %3 : vector<1x128xf32> to vector<16x128xf32>
    %25 = arith.addf %23, %24 : vector<16x128xf32>
    %c0_10 = arith.constant 0 : index
    %c0_11 = arith.constant 0 : index
    %c0_12 = arith.constant 0 : index
    %26 = vector.load %arg2[%c0_10, %c0_11, %c0_12] : memref<1x1x16xf32, #tpu.memory_space<vmem>>, vector<1x1x16xf32>
    %27 = arith.truncf %25 : vector<16x128xf32> to vector<16x128xbf16>
    %c0_13 = arith.constant 0 : index
    %c0_14 = arith.constant 0 : index
    %c0_15 = arith.constant 0 : index
    %28 = vector.load %arg5[%c0_13, %c0_14, %c0_15] : memref<2x128x384xbf16, #tpu.memory_space<vmem>>, vector<1x128x384xbf16>
    %29 = vector.shape_cast %28 : vector<1x128x384xbf16> to vector<128x384xbf16>
    %cst_16 = arith.constant dense<0.000000e+00> : vector<16x384xf32>
    %30 = tpu.matmul %27, %29, %cst_16 {dimension_numbers = #tpu.dot_dimension_numbers<[1], [0], [0], [1], [0, 0, 1, 1], [], []>} : vector<16x128xbf16>, vector<128x384xbf16>, vector<16x384xf32> -> vector<16x384xf32>
    %c0_17 = arith.constant 0 : index
    %c0_18 = arith.constant 0 : index
    %c0_19 = arith.constant 0 : index
    %31 = vector.load %arg6[%c0_17, %c0_18, %c0_19] : memref<2x1x384xf32, #tpu.memory_space<vmem>>, vector<1x1x384xf32>
    %32 = vector.shape_cast %31 : vector<1x1x384xf32> to vector<1x384xf32>
    %33 = vector.broadcast %32 : vector<1x384xf32> to vector<16x384xf32>
    %34 = arith.addf %30, %33 : vector<16x384xf32>
    %35 = arith.truncf %34 : vector<16x384xf32> to vector<16x384xbf16>
    %36 = vector.extract_strided_slice %35 {offsets = [0, 0], sizes = [16, 128], strides = [1, 1]} : vector<16x384xbf16> to vector<16x128xbf16>
    %37 = vector.extract_strided_slice %35 {offsets = [0, 128], sizes = [16, 128], strides = [1, 1]} : vector<16x384xbf16> to vector<16x128xbf16>
    %38 = vector.extract_strided_slice %35 {offsets = [0, 256], sizes = [16, 128], strides = [1, 1]} : vector<16x384xbf16> to vector<16x128xbf16>
    %39 = vector.shape_cast %26 : vector<1x1x16xf32> to vector<1x16xf32>
    %40 = vector.shape_cast %39 : vector<1x16xf32> to vector<1x16xf32>
    %41 = vector.broadcast %40 : vector<1x16xf32> to vector<16x16xf32>
    %42 = vector.extract_strided_slice %36 {offsets = [0, 0], sizes = [16, 32], strides = [1, 1]} : vector<16x128xbf16> to vector<16x32xbf16>
    %43 = vector.extract_strided_slice %37 {offsets = [0, 0], sizes = [16, 32], strides = [1, 1]} : vector<16x128xbf16> to vector<16x32xbf16>
    %cst_20 = arith.constant dense<0.000000e+00> : vector<16x16xf32>
    %44 = tpu.matmul %42, %43, %cst_20 {dimension_numbers = #tpu.dot_dimension_numbers<[1], [1], [0], [0], [0, 0, 1, 0], [], []>} : vector<16x32xbf16>, vector<16x32xbf16>, vector<16x16xf32> -> vector<16x16xf32>
    %45 = arith.addf %44, %41 : vector<16x16xf32>
    %cst_21 = arith.constant dense<0xFF800000> : vector<16xf32>
    %46 = vector.multi_reduction <maximumf>, %45, %cst_21 [1] : vector<16x16xf32> to vector<16xf32>
    %47 = vector.shape_cast %46 : vector<16xf32> to vector<16x1xf32>
    %48 = vector.broadcast %47 : vector<16x1xf32> to vector<16x16xf32>
    %49 = arith.subf %45, %48 : vector<16x16xf32>
    %50 = math.exp %49 : vector<16x16xf32>
    %cst_22 = arith.constant dense<0.000000e+00> : vector<16xf32>
    %51 = vector.multi_reduction <add>, %50, %cst_22 [1] : vector<16x16xf32> to vector<16xf32>
    %52 = vector.shape_cast %51 : vector<16xf32> to vector<16x1xf32>
    %53 = tpu.reciprocal %52 {approx = true} : vector<16x1xf32> -> vector<16x1xf32>
    %54 = arith.truncf %50 : vector<16x16xf32> to vector<16x16xbf16>
    %55 = vector.extract_strided_slice %38 {offsets = [0, 0], sizes = [16, 32], strides = [1, 1]} : vector<16x128xbf16> to vector<16x32xbf16>
    %cst_23 = arith.constant dense<0.000000e+00> : vector<16x32xf32>
    %56 = tpu.matmul %54, %55, %cst_23 {dimension_numbers = #tpu.dot_dimension_numbers<[1], [0], [0], [1], [0, 0, 1, 1], [], []>} : vector<16x16xbf16>, vector<16x32xbf16>, vector<16x32xf32> -> vector<16x32xf32>
    %57 = vector.broadcast %53 : vector<16x1xf32> to vector<16x32xf32>
    %58 = arith.mulf %56, %57 : vector<16x32xf32>
    %59 = vector.extract_strided_slice %36 {offsets = [0, 32], sizes = [16, 32], strides = [1, 1]} : vector<16x128xbf16> to vector<16x32xbf16>
    %60 = vector.extract_strided_slice %37 {offsets = [0, 32], sizes = [16, 32], strides = [1, 1]} : vector<16x128xbf16> to vector<16x32xbf16>
    %cst_24 = arith.constant dense<0.000000e+00> : vector<16x16xf32>
    %61 = tpu.matmul %59, %60, %cst_24 {dimension_numbers = #tpu.dot_dimension_numbers<[1], [1], [0], [0], [0, 0, 1, 0], [], []>} : vector<16x32xbf16>, vector<16x32xbf16>, vector<16x16xf32> -> vector<16x16xf32>
    %62 = arith.addf %61, %41 : vector<16x16xf32>
    %cst_25 = arith.constant dense<0xFF800000> : vector<16xf32>
    %63 = vector.multi_reduction <maximumf>, %62, %cst_25 [1] : vector<16x16xf32> to vector<16xf32>
    %64 = vector.shape_cast %63 : vector<16xf32> to vector<16x1xf32>
    %65 = vector.broadcast %64 : vector<16x1xf32> to vector<16x16xf32>
    %66 = arith.subf %62, %65 : vector<16x16xf32>
    %67 = math.exp %66 : vector<16x16xf32>
    %cst_26 = arith.constant dense<0.000000e+00> : vector<16xf32>
    %68 = vector.multi_reduction <add>, %67, %cst_26 [1] : vector<16x16xf32> to vector<16xf32>
    %69 = vector.shape_cast %68 : vector<16xf32> to vector<16x1xf32>
    %70 = tpu.reciprocal %69 {approx = true} : vector<16x1xf32> -> vector<16x1xf32>
    %71 = arith.truncf %67 : vector<16x16xf32> to vector<16x16xbf16>
    %72 = vector.extract_strided_slice %38 {offsets = [0, 32], sizes = [16, 32], strides = [1, 1]} : vector<16x128xbf16> to vector<16x32xbf16>
    %cst_27 = arith.constant dense<0.000000e+00> : vector<16x32xf32>
    %73 = tpu.matmul %71, %72, %cst_27 {dimension_numbers = #tpu.dot_dimension_numbers<[1], [0], [0], [1], [0, 0, 1, 1], [], []>} : vector<16x16xbf16>, vector<16x32xbf16>, vector<16x32xf32> -> vector<16x32xf32>
    %74 = vector.broadcast %70 : vector<16x1xf32> to vector<16x32xf32>
    %75 = arith.mulf %73, %74 : vector<16x32xf32>
    %76 = vector.extract_strided_slice %36 {offsets = [0, 64], sizes = [16, 32], strides = [1, 1]} : vector<16x128xbf16> to vector<16x32xbf16>
    %77 = vector.extract_strided_slice %37 {offsets = [0, 64], sizes = [16, 32], strides = [1, 1]} : vector<16x128xbf16> to vector<16x32xbf16>
    %cst_28 = arith.constant dense<0.000000e+00> : vector<16x16xf32>
    %78 = tpu.matmul %76, %77, %cst_28 {dimension_numbers = #tpu.dot_dimension_numbers<[1], [1], [0], [0], [0, 0, 1, 0], [], []>} : vector<16x32xbf16>, vector<16x32xbf16>, vector<16x16xf32> -> vector<16x16xf32>
    %79 = arith.addf %78, %41 : vector<16x16xf32>
    %cst_29 = arith.constant dense<0xFF800000> : vector<16xf32>
    %80 = vector.multi_reduction <maximumf>, %79, %cst_29 [1] : vector<16x16xf32> to vector<16xf32>
    %81 = vector.shape_cast %80 : vector<16xf32> to vector<16x1xf32>
    %82 = vector.broadcast %81 : vector<16x1xf32> to vector<16x16xf32>
    %83 = arith.subf %79, %82 : vector<16x16xf32>
    %84 = math.exp %83 : vector<16x16xf32>
    %cst_30 = arith.constant dense<0.000000e+00> : vector<16xf32>
    %85 = vector.multi_reduction <add>, %84, %cst_30 [1] : vector<16x16xf32> to vector<16xf32>
    %86 = vector.shape_cast %85 : vector<16xf32> to vector<16x1xf32>
    %87 = tpu.reciprocal %86 {approx = true} : vector<16x1xf32> -> vector<16x1xf32>
    %88 = arith.truncf %84 : vector<16x16xf32> to vector<16x16xbf16>
    %89 = vector.extract_strided_slice %38 {offsets = [0, 64], sizes = [16, 32], strides = [1, 1]} : vector<16x128xbf16> to vector<16x32xbf16>
    %cst_31 = arith.constant dense<0.000000e+00> : vector<16x32xf32>
    %90 = tpu.matmul %88, %89, %cst_31 {dimension_numbers = #tpu.dot_dimension_numbers<[1], [0], [0], [1], [0, 0, 1, 1], [], []>} : vector<16x16xbf16>, vector<16x32xbf16>, vector<16x32xf32> -> vector<16x32xf32>
    %91 = vector.broadcast %87 : vector<16x1xf32> to vector<16x32xf32>
    %92 = arith.mulf %90, %91 : vector<16x32xf32>
    %93 = vector.extract_strided_slice %36 {offsets = [0, 96], sizes = [16, 32], strides = [1, 1]} : vector<16x128xbf16> to vector<16x32xbf16>
    %94 = vector.extract_strided_slice %37 {offsets = [0, 96], sizes = [16, 32], strides = [1, 1]} : vector<16x128xbf16> to vector<16x32xbf16>
    %cst_32 = arith.constant dense<0.000000e+00> : vector<16x16xf32>
    %95 = tpu.matmul %93, %94, %cst_32 {dimension_numbers = #tpu.dot_dimension_numbers<[1], [1], [0], [0], [0, 0, 1, 0], [], []>} : vector<16x32xbf16>, vector<16x32xbf16>, vector<16x16xf32> -> vector<16x16xf32>
    %96 = arith.addf %95, %41 : vector<16x16xf32>
    %cst_33 = arith.constant dense<0xFF800000> : vector<16xf32>
    %97 = vector.multi_reduction <maximumf>, %96, %cst_33 [1] : vector<16x16xf32> to vector<16xf32>
    %98 = vector.shape_cast %97 : vector<16xf32> to vector<16x1xf32>
    %99 = vector.broadcast %98 : vector<16x1xf32> to vector<16x16xf32>
    %100 = arith.subf %96, %99 : vector<16x16xf32>
    %101 = math.exp %100 : vector<16x16xf32>
    %cst_34 = arith.constant dense<0.000000e+00> : vector<16xf32>
    %102 = vector.multi_reduction <add>, %101, %cst_34 [1] : vector<16x16xf32> to vector<16xf32>
    %103 = vector.shape_cast %102 : vector<16xf32> to vector<16x1xf32>
    %104 = tpu.reciprocal %103 {approx = true} : vector<16x1xf32> -> vector<16x1xf32>
    %105 = arith.truncf %101 : vector<16x16xf32> to vector<16x16xbf16>
    %106 = vector.extract_strided_slice %38 {offsets = [0, 96], sizes = [16, 32], strides = [1, 1]} : vector<16x128xbf16> to vector<16x32xbf16>
    %cst_35 = arith.constant dense<0.000000e+00> : vector<16x32xf32>
    %107 = tpu.matmul %105, %106, %cst_35 {dimension_numbers = #tpu.dot_dimension_numbers<[1], [0], [0], [1], [0, 0, 1, 1], [], []>} : vector<16x16xbf16>, vector<16x32xbf16>, vector<16x32xf32> -> vector<16x32xf32>
    %108 = vector.broadcast %104 : vector<16x1xf32> to vector<16x32xf32>
    %109 = arith.mulf %107, %108 : vector<16x32xf32>
    %110 = tpu.concatenate %58, %75, %92, %109 in 1 : vector<16x32xf32>, vector<16x32xf32>, vector<16x32xf32>, vector<16x32xf32> -> vector<16x128xf32>
    %111 = arith.truncf %110 : vector<16x128xf32> to vector<16x128xbf16>
    %c0_36 = arith.constant 0 : index
    %c0_37 = arith.constant 0 : index
    %c0_38 = arith.constant 0 : index
    %112 = vector.load %arg7[%c0_36, %c0_37, %c0_38] : memref<2x128x128xbf16, #tpu.memory_space<vmem>>, vector<1x128x128xbf16>
    %113 = vector.shape_cast %112 : vector<1x128x128xbf16> to vector<128x128xbf16>
    %cst_39 = arith.constant dense<0.000000e+00> : vector<16x128xf32>
    %114 = tpu.matmul %111, %113, %cst_39 {dimension_numbers = #tpu.dot_dimension_numbers<[1], [0], [0], [1], [0, 0, 1, 1], [], []>} : vector<16x128xbf16>, vector<128x128xbf16>, vector<16x128xf32> -> vector<16x128xf32>
    %c0_40 = arith.constant 0 : index
    %c0_41 = arith.constant 0 : index
    %c0_42 = arith.constant 0 : index
    %115 = vector.load %arg8[%c0_40, %c0_41, %c0_42] : memref<2x1x128xf32, #tpu.memory_space<vmem>>, vector<1x1x128xf32>
    %116 = vector.shape_cast %115 : vector<1x1x128xf32> to vector<1x128xf32>
    %117 = vector.broadcast %116 : vector<1x128xf32> to vector<16x128xf32>
    %118 = arith.addf %114, %117 : vector<16x128xf32>
    %119 = arith.addf %118, %25 : vector<16x128xf32>
    %c0_43 = arith.constant 0 : index
    %c0_44 = arith.constant 0 : index
    %c0_45 = arith.constant 0 : index
    %120 = vector.load %arg9[%c0_43, %c0_44, %c0_45] : memref<2x1x128xf32, #tpu.memory_space<vmem>>, vector<1x1x128xf32>
    %121 = vector.shape_cast %120 : vector<1x1x128xf32> to vector<1x128xf32>
    %c0_46 = arith.constant 0 : index
    %c0_47 = arith.constant 0 : index
    %c0_48 = arith.constant 0 : index
    %122 = vector.load %arg10[%c0_46, %c0_47, %c0_48] : memref<2x1x128xf32, #tpu.memory_space<vmem>>, vector<1x1x128xf32>
    %123 = vector.shape_cast %122 : vector<1x1x128xf32> to vector<1x128xf32>
    %cst_49 = arith.constant dense<0.000000e+00> : vector<16xf32>
    %124 = vector.multi_reduction <add>, %119, %cst_49 [1] : vector<16x128xf32> to vector<16xf32>
    %125 = vector.shape_cast %124 : vector<16xf32> to vector<16x1xf32>
    %cst_50 = arith.constant 1.280000e+02 : f32
    %126 = vector.broadcast %cst_50 : f32 to vector<16x1xf32>
    %127 = arith.divf %125, %126 : vector<16x1xf32>
    %128 = vector.broadcast %127 : vector<16x1xf32> to vector<16x128xf32>
    %129 = arith.subf %119, %128 : vector<16x128xf32>
    %130 = arith.mulf %129, %129 : vector<16x128xf32>
    %cst_51 = arith.constant dense<0.000000e+00> : vector<16xf32>
    %131 = vector.multi_reduction <add>, %130, %cst_51 [1] : vector<16x128xf32> to vector<16xf32>
    %132 = vector.shape_cast %131 : vector<16xf32> to vector<16x1xf32>
    %cst_52 = arith.constant 1.280000e+02 : f32
    %133 = vector.broadcast %cst_52 : f32 to vector<16x1xf32>
    %134 = arith.divf %132, %133 : vector<16x1xf32>
    %135 = vector.broadcast %127 : vector<16x1xf32> to vector<16x128xf32>
    %136 = arith.subf %119, %135 : vector<16x128xf32>
    %cst_53 = arith.constant 9.99999974E-6 : f32
    %137 = vector.broadcast %cst_53 : f32 to vector<16x1xf32>
    %138 = arith.addf %134, %137 : vector<16x1xf32>
    %139 = math.rsqrt %138 : vector<16x1xf32>
    %140 = vector.broadcast %139 : vector<16x1xf32> to vector<16x128xf32>
    %141 = arith.mulf %136, %140 : vector<16x128xf32>
    %142 = vector.broadcast %121 : vector<1x128xf32> to vector<16x128xf32>
    %143 = arith.mulf %141, %142 : vector<16x128xf32>
    %144 = vector.broadcast %123 : vector<1x128xf32> to vector<16x128xf32>
    %145 = arith.addf %143, %144 : vector<16x128xf32>
    %146 = arith.truncf %145 : vector<16x128xf32> to vector<16x128xbf16>
    %c0_54 = arith.constant 0 : index
    %c0_55 = arith.constant 0 : index
    %c0_56 = arith.constant 0 : index
    %147 = vector.load %arg11[%c0_54, %c0_55, %c0_56] : memref<2x128x512xbf16, #tpu.memory_space<vmem>>, vector<1x128x512xbf16>
    %148 = vector.shape_cast %147 : vector<1x128x512xbf16> to vector<128x512xbf16>
    %cst_57 = arith.constant dense<0.000000e+00> : vector<16x512xf32>
    %149 = tpu.matmul %146, %148, %cst_57 {dimension_numbers = #tpu.dot_dimension_numbers<[1], [0], [0], [1], [0, 0, 1, 1], [], []>} : vector<16x128xbf16>, vector<128x512xbf16>, vector<16x512xf32> -> vector<16x512xf32>
    %c0_58 = arith.constant 0 : index
    %c0_59 = arith.constant 0 : index
    %c0_60 = arith.constant 0 : index
    %150 = vector.load %arg12[%c0_58, %c0_59, %c0_60] : memref<2x1x512xf32, #tpu.memory_space<vmem>>, vector<1x1x512xf32>
    %151 = vector.shape_cast %150 : vector<1x1x512xf32> to vector<1x512xf32>
    %152 = vector.broadcast %151 : vector<1x512xf32> to vector<16x512xf32>
    %153 = arith.addf %149, %152 : vector<16x512xf32>
    %154 = arith.mulf %153, %153 : vector<16x512xf32>
    %155 = arith.mulf %153, %154 : vector<16x512xf32>
    %cst_61 = arith.constant 4.471500e-02 : f32
    %156 = vector.broadcast %cst_61 : f32 to vector<16x512xf32>
    %157 = arith.mulf %156, %155 : vector<16x512xf32>
    %158 = arith.addf %153, %157 : vector<16x512xf32>
    %cst_62 = arith.constant 0.797884583 : f32
    %159 = vector.broadcast %cst_62 : f32 to vector<16x512xf32>
    %160 = arith.mulf %159, %158 : vector<16x512xf32>
    %161 = math.tanh %160 : vector<16x512xf32>
    %cst_63 = arith.constant 1.000000e+00 : f32
    %162 = vector.broadcast %cst_63 : f32 to vector<16x512xf32>
    %163 = arith.addf %162, %161 : vector<16x512xf32>
    %cst_64 = arith.constant 5.000000e-01 : f32
    %164 = vector.broadcast %cst_64 : f32 to vector<16x512xf32>
    %165 = arith.mulf %164, %163 : vector<16x512xf32>
    %166 = arith.mulf %153, %165 : vector<16x512xf32>
    %167 = arith.truncf %166 : vector<16x512xf32> to vector<16x512xbf16>
    %c0_65 = arith.constant 0 : index
    %c0_66 = arith.constant 0 : index
    %c0_67 = arith.constant 0 : index
    %168 = vector.load %arg13[%c0_65, %c0_66, %c0_67] : memref<2x512x128xbf16, #tpu.memory_space<vmem>>, vector<1x512x128xbf16>
    %169 = vector.shape_cast %168 : vector<1x512x128xbf16> to vector<512x128xbf16>
    %cst_68 = arith.constant dense<0.000000e+00> : vector<16x128xf32>
    %170 = tpu.matmul %167, %169, %cst_68 {dimension_numbers = #tpu.dot_dimension_numbers<[1], [0], [0], [1], [0, 0, 1, 1], [], []>} : vector<16x512xbf16>, vector<512x128xbf16>, vector<16x128xf32> -> vector<16x128xf32>
    %c0_69 = arith.constant 0 : index
    %c0_70 = arith.constant 0 : index
    %c0_71 = arith.constant 0 : index
    %171 = vector.load %arg14[%c0_69, %c0_70, %c0_71] : memref<2x1x128xf32, #tpu.memory_space<vmem>>, vector<1x1x128xf32>
    %172 = vector.shape_cast %171 : vector<1x1x128xf32> to vector<1x128xf32>
    %173 = vector.broadcast %172 : vector<1x128xf32> to vector<16x128xf32>
    %174 = arith.addf %170, %173 : vector<16x128xf32>
    %175 = arith.addf %174, %145 : vector<16x128xf32>
    %c0_72 = arith.constant 0 : index
    %c0_73 = arith.constant 0 : index
    %c0_74 = arith.constant 0 : index
    %176 = vector.load %arg15[%c0_72, %c0_73, %c0_74] : memref<2x1x128xf32, #tpu.memory_space<vmem>>, vector<1x1x128xf32>
    %177 = vector.shape_cast %176 : vector<1x1x128xf32> to vector<1x128xf32>
    %c0_75 = arith.constant 0 : index
    %c0_76 = arith.constant 0 : index
    %c0_77 = arith.constant 0 : index
    %178 = vector.load %arg16[%c0_75, %c0_76, %c0_77] : memref<2x1x128xf32, #tpu.memory_space<vmem>>, vector<1x1x128xf32>
    %179 = vector.shape_cast %178 : vector<1x1x128xf32> to vector<1x128xf32>
    %cst_78 = arith.constant dense<0.000000e+00> : vector<16xf32>
    %180 = vector.multi_reduction <add>, %175, %cst_78 [1] : vector<16x128xf32> to vector<16xf32>
    %181 = vector.shape_cast %180 : vector<16xf32> to vector<16x1xf32>
    %cst_79 = arith.constant 1.280000e+02 : f32
    %182 = vector.broadcast %cst_79 : f32 to vector<16x1xf32>
    %183 = arith.divf %181, %182 : vector<16x1xf32>
    %184 = vector.broadcast %183 : vector<16x1xf32> to vector<16x128xf32>
    %185 = arith.subf %175, %184 : vector<16x128xf32>
    %186 = arith.mulf %185, %185 : vector<16x128xf32>
    %cst_80 = arith.constant dense<0.000000e+00> : vector<16xf32>
    %187 = vector.multi_reduction <add>, %186, %cst_80 [1] : vector<16x128xf32> to vector<16xf32>
    %188 = vector.shape_cast %187 : vector<16xf32> to vector<16x1xf32>
    %cst_81 = arith.constant 1.280000e+02 : f32
    %189 = vector.broadcast %cst_81 : f32 to vector<16x1xf32>
    %190 = arith.divf %188, %189 : vector<16x1xf32>
    %191 = vector.broadcast %183 : vector<16x1xf32> to vector<16x128xf32>
    %192 = arith.subf %175, %191 : vector<16x128xf32>
    %cst_82 = arith.constant 9.99999974E-6 : f32
    %193 = vector.broadcast %cst_82 : f32 to vector<16x1xf32>
    %194 = arith.addf %190, %193 : vector<16x1xf32>
    %195 = math.rsqrt %194 : vector<16x1xf32>
    %196 = vector.broadcast %195 : vector<16x1xf32> to vector<16x128xf32>
    %197 = arith.mulf %192, %196 : vector<16x128xf32>
    %198 = vector.broadcast %177 : vector<1x128xf32> to vector<16x128xf32>
    %199 = arith.mulf %197, %198 : vector<16x128xf32>
    %200 = vector.broadcast %179 : vector<1x128xf32> to vector<16x128xf32>
    %201 = arith.addf %199, %200 : vector<16x128xf32>
    %202 = arith.truncf %201 : vector<16x128xf32> to vector<16x128xbf16>
    %c1 = arith.constant 1 : index
    %c0_83 = arith.constant 0 : index
    %c0_84 = arith.constant 0 : index
    %203 = vector.load %arg5[%c1, %c0_83, %c0_84] : memref<2x128x384xbf16, #tpu.memory_space<vmem>>, vector<1x128x384xbf16>
    %204 = vector.shape_cast %203 : vector<1x128x384xbf16> to vector<128x384xbf16>
    %cst_85 = arith.constant dense<0.000000e+00> : vector<16x384xf32>
    %205 = tpu.matmul %202, %204, %cst_85 {dimension_numbers = #tpu.dot_dimension_numbers<[1], [0], [0], [1], [0, 0, 1, 1], [], []>} : vector<16x128xbf16>, vector<128x384xbf16>, vector<16x384xf32> -> vector<16x384xf32>
    %c1_86 = arith.constant 1 : index
    %c0_87 = arith.constant 0 : index
    %c0_88 = arith.constant 0 : index
    %206 = vector.load %arg6[%c1_86, %c0_87, %c0_88] : memref<2x1x384xf32, #tpu.memory_space<vmem>>, vector<1x1x384xf32>
    %207 = vector.shape_cast %206 : vector<1x1x384xf32> to vector<1x384xf32>
    %208 = vector.broadcast %207 : vector<1x384xf32> to vector<16x384xf32>
    %209 = arith.addf %205, %208 : vector<16x384xf32>
    %210 = arith.truncf %209 : vector<16x384xf32> to vector<16x384xbf16>
    %211 = vector.extract_strided_slice %210 {offsets = [0, 0], sizes = [16, 128], strides = [1, 1]} : vector<16x384xbf16> to vector<16x128xbf16>
    %212 = vector.extract_strided_slice %210 {offsets = [0, 128], sizes = [16, 128], strides = [1, 1]} : vector<16x384xbf16> to vector<16x128xbf16>
    %213 = vector.extract_strided_slice %210 {offsets = [0, 256], sizes = [16, 128], strides = [1, 1]} : vector<16x384xbf16> to vector<16x128xbf16>
    %214 = vector.shape_cast %26 : vector<1x1x16xf32> to vector<1x16xf32>
    %215 = vector.shape_cast %214 : vector<1x16xf32> to vector<1x16xf32>
    %216 = vector.broadcast %215 : vector<1x16xf32> to vector<16x16xf32>
    %217 = vector.extract_strided_slice %211 {offsets = [0, 0], sizes = [16, 32], strides = [1, 1]} : vector<16x128xbf16> to vector<16x32xbf16>
    %218 = vector.extract_strided_slice %212 {offsets = [0, 0], sizes = [16, 32], strides = [1, 1]} : vector<16x128xbf16> to vector<16x32xbf16>
    %cst_89 = arith.constant dense<0.000000e+00> : vector<16x16xf32>
    %219 = tpu.matmul %217, %218, %cst_89 {dimension_numbers = #tpu.dot_dimension_numbers<[1], [1], [0], [0], [0, 0, 1, 0], [], []>} : vector<16x32xbf16>, vector<16x32xbf16>, vector<16x16xf32> -> vector<16x16xf32>
    %220 = arith.addf %219, %216 : vector<16x16xf32>
    %cst_90 = arith.constant dense<0xFF800000> : vector<16xf32>
    %221 = vector.multi_reduction <maximumf>, %220, %cst_90 [1] : vector<16x16xf32> to vector<16xf32>
    %222 = vector.shape_cast %221 : vector<16xf32> to vector<16x1xf32>
    %223 = vector.broadcast %222 : vector<16x1xf32> to vector<16x16xf32>
    %224 = arith.subf %220, %223 : vector<16x16xf32>
    %225 = math.exp %224 : vector<16x16xf32>
    %cst_91 = arith.constant dense<0.000000e+00> : vector<16xf32>
    %226 = vector.multi_reduction <add>, %225, %cst_91 [1] : vector<16x16xf32> to vector<16xf32>
    %227 = vector.shape_cast %226 : vector<16xf32> to vector<16x1xf32>
    %228 = tpu.reciprocal %227 {approx = true} : vector<16x1xf32> -> vector<16x1xf32>
    %229 = arith.truncf %225 : vector<16x16xf32> to vector<16x16xbf16>
    %230 = vector.extract_strided_slice %213 {offsets = [0, 0], sizes = [16, 32], strides = [1, 1]} : vector<16x128xbf16> to vector<16x32xbf16>
    %cst_92 = arith.constant dense<0.000000e+00> : vector<16x32xf32>
    %231 = tpu.matmul %229, %230, %cst_92 {dimension_numbers = #tpu.dot_dimension_numbers<[1], [0], [0], [1], [0, 0, 1, 1], [], []>} : vector<16x16xbf16>, vector<16x32xbf16>, vector<16x32xf32> -> vector<16x32xf32>
    %232 = vector.broadcast %228 : vector<16x1xf32> to vector<16x32xf32>
    %233 = arith.mulf %231, %232 : vector<16x32xf32>
    %234 = vector.extract_strided_slice %211 {offsets = [0, 32], sizes = [16, 32], strides = [1, 1]} : vector<16x128xbf16> to vector<16x32xbf16>
    %235 = vector.extract_strided_slice %212 {offsets = [0, 32], sizes = [16, 32], strides = [1, 1]} : vector<16x128xbf16> to vector<16x32xbf16>
    %cst_93 = arith.constant dense<0.000000e+00> : vector<16x16xf32>
    %236 = tpu.matmul %234, %235, %cst_93 {dimension_numbers = #tpu.dot_dimension_numbers<[1], [1], [0], [0], [0, 0, 1, 0], [], []>} : vector<16x32xbf16>, vector<16x32xbf16>, vector<16x16xf32> -> vector<16x16xf32>
    %237 = arith.addf %236, %216 : vector<16x16xf32>
    %cst_94 = arith.constant dense<0xFF800000> : vector<16xf32>
    %238 = vector.multi_reduction <maximumf>, %237, %cst_94 [1] : vector<16x16xf32> to vector<16xf32>
    %239 = vector.shape_cast %238 : vector<16xf32> to vector<16x1xf32>
    %240 = vector.broadcast %239 : vector<16x1xf32> to vector<16x16xf32>
    %241 = arith.subf %237, %240 : vector<16x16xf32>
    %242 = math.exp %241 : vector<16x16xf32>
    %cst_95 = arith.constant dense<0.000000e+00> : vector<16xf32>
    %243 = vector.multi_reduction <add>, %242, %cst_95 [1] : vector<16x16xf32> to vector<16xf32>
    %244 = vector.shape_cast %243 : vector<16xf32> to vector<16x1xf32>
    %245 = tpu.reciprocal %244 {approx = true} : vector<16x1xf32> -> vector<16x1xf32>
    %246 = arith.truncf %242 : vector<16x16xf32> to vector<16x16xbf16>
    %247 = vector.extract_strided_slice %213 {offsets = [0, 32], sizes = [16, 32], strides = [1, 1]} : vector<16x128xbf16> to vector<16x32xbf16>
    %cst_96 = arith.constant dense<0.000000e+00> : vector<16x32xf32>
    %248 = tpu.matmul %246, %247, %cst_96 {dimension_numbers = #tpu.dot_dimension_numbers<[1], [0], [0], [1], [0, 0, 1, 1], [], []>} : vector<16x16xbf16>, vector<16x32xbf16>, vector<16x32xf32> -> vector<16x32xf32>
    %249 = vector.broadcast %245 : vector<16x1xf32> to vector<16x32xf32>
    %250 = arith.mulf %248, %249 : vector<16x32xf32>
    %251 = vector.extract_strided_slice %211 {offsets = [0, 64], sizes = [16, 32], strides = [1, 1]} : vector<16x128xbf16> to vector<16x32xbf16>
    %252 = vector.extract_strided_slice %212 {offsets = [0, 64], sizes = [16, 32], strides = [1, 1]} : vector<16x128xbf16> to vector<16x32xbf16>
    %cst_97 = arith.constant dense<0.000000e+00> : vector<16x16xf32>
    %253 = tpu.matmul %251, %252, %cst_97 {dimension_numbers = #tpu.dot_dimension_numbers<[1], [1], [0], [0], [0, 0, 1, 0], [], []>} : vector<16x32xbf16>, vector<16x32xbf16>, vector<16x16xf32> -> vector<16x16xf32>
    %254 = arith.addf %253, %216 : vector<16x16xf32>
    %cst_98 = arith.constant dense<0xFF800000> : vector<16xf32>
    %255 = vector.multi_reduction <maximumf>, %254, %cst_98 [1] : vector<16x16xf32> to vector<16xf32>
    %256 = vector.shape_cast %255 : vector<16xf32> to vector<16x1xf32>
    %257 = vector.broadcast %256 : vector<16x1xf32> to vector<16x16xf32>
    %258 = arith.subf %254, %257 : vector<16x16xf32>
    %259 = math.exp %258 : vector<16x16xf32>
    %cst_99 = arith.constant dense<0.000000e+00> : vector<16xf32>
    %260 = vector.multi_reduction <add>, %259, %cst_99 [1] : vector<16x16xf32> to vector<16xf32>
    %261 = vector.shape_cast %260 : vector<16xf32> to vector<16x1xf32>
    %262 = tpu.reciprocal %261 {approx = true} : vector<16x1xf32> -> vector<16x1xf32>
    %263 = arith.truncf %259 : vector<16x16xf32> to vector<16x16xbf16>
    %264 = vector.extract_strided_slice %213 {offsets = [0, 64], sizes = [16, 32], strides = [1, 1]} : vector<16x128xbf16> to vector<16x32xbf16>
    %cst_100 = arith.constant dense<0.000000e+00> : vector<16x32xf32>
    %265 = tpu.matmul %263, %264, %cst_100 {dimension_numbers = #tpu.dot_dimension_numbers<[1], [0], [0], [1], [0, 0, 1, 1], [], []>} : vector<16x16xbf16>, vector<16x32xbf16>, vector<16x32xf32> -> vector<16x32xf32>
    %266 = vector.broadcast %262 : vector<16x1xf32> to vector<16x32xf32>
    %267 = arith.mulf %265, %266 : vector<16x32xf32>
    %268 = vector.extract_strided_slice %211 {offsets = [0, 96], sizes = [16, 32], strides = [1, 1]} : vector<16x128xbf16> to vector<16x32xbf16>
    %269 = vector.extract_strided_slice %212 {offsets = [0, 96], sizes = [16, 32], strides = [1, 1]} : vector<16x128xbf16> to vector<16x32xbf16>
    %cst_101 = arith.constant dense<0.000000e+00> : vector<16x16xf32>
    %270 = tpu.matmul %268, %269, %cst_101 {dimension_numbers = #tpu.dot_dimension_numbers<[1], [1], [0], [0], [0, 0, 1, 0], [], []>} : vector<16x32xbf16>, vector<16x32xbf16>, vector<16x16xf32> -> vector<16x16xf32>
    %271 = arith.addf %270, %216 : vector<16x16xf32>
    %cst_102 = arith.constant dense<0xFF800000> : vector<16xf32>
    %272 = vector.multi_reduction <maximumf>, %271, %cst_102 [1] : vector<16x16xf32> to vector<16xf32>
    %273 = vector.shape_cast %272 : vector<16xf32> to vector<16x1xf32>
    %274 = vector.broadcast %273 : vector<16x1xf32> to vector<16x16xf32>
    %275 = arith.subf %271, %274 : vector<16x16xf32>
    %276 = math.exp %275 : vector<16x16xf32>
    %cst_103 = arith.constant dense<0.000000e+00> : vector<16xf32>
    %277 = vector.multi_reduction <add>, %276, %cst_103 [1] : vector<16x16xf32> to vector<16xf32>
    %278 = vector.shape_cast %277 : vector<16xf32> to vector<16x1xf32>
    %279 = tpu.reciprocal %278 {approx = true} : vector<16x1xf32> -> vector<16x1xf32>
    %280 = arith.truncf %276 : vector<16x16xf32> to vector<16x16xbf16>
    %281 = vector.extract_strided_slice %213 {offsets = [0, 96], sizes = [16, 32], strides = [1, 1]} : vector<16x128xbf16> to vector<16x32xbf16>
    %cst_104 = arith.constant dense<0.000000e+00> : vector<16x32xf32>
    %282 = tpu.matmul %280, %281, %cst_104 {dimension_numbers = #tpu.dot_dimension_numbers<[1], [0], [0], [1], [0, 0, 1, 1], [], []>} : vector<16x16xbf16>, vector<16x32xbf16>, vector<16x32xf32> -> vector<16x32xf32>
    %283 = vector.broadcast %279 : vector<16x1xf32> to vector<16x32xf32>
    %284 = arith.mulf %282, %283 : vector<16x32xf32>
    %285 = tpu.concatenate %233, %250, %267, %284 in 1 : vector<16x32xf32>, vector<16x32xf32>, vector<16x32xf32>, vector<16x32xf32> -> vector<16x128xf32>
    %286 = arith.truncf %285 : vector<16x128xf32> to vector<16x128xbf16>
    %c1_105 = arith.constant 1 : index
    %c0_106 = arith.constant 0 : index
    %c0_107 = arith.constant 0 : index
    %287 = vector.load %arg7[%c1_105, %c0_106, %c0_107] : memref<2x128x128xbf16, #tpu.memory_space<vmem>>, vector<1x128x128xbf16>
    %288 = vector.shape_cast %287 : vector<1x128x128xbf16> to vector<128x128xbf16>
    %cst_108 = arith.constant dense<0.000000e+00> : vector<16x128xf32>
    %289 = tpu.matmul %286, %288, %cst_108 {dimension_numbers = #tpu.dot_dimension_numbers<[1], [0], [0], [1], [0, 0, 1, 1], [], []>} : vector<16x128xbf16>, vector<128x128xbf16>, vector<16x128xf32> -> vector<16x128xf32>
    %c1_109 = arith.constant 1 : index
    %c0_110 = arith.constant 0 : index
    %c0_111 = arith.constant 0 : index
    %290 = vector.load %arg8[%c1_109, %c0_110, %c0_111] : memref<2x1x128xf32, #tpu.memory_space<vmem>>, vector<1x1x128xf32>
    %291 = vector.shape_cast %290 : vector<1x1x128xf32> to vector<1x128xf32>
    %292 = vector.broadcast %291 : vector<1x128xf32> to vector<16x128xf32>
    %293 = arith.addf %289, %292 : vector<16x128xf32>
    %294 = arith.addf %293, %201 : vector<16x128xf32>
    %c1_112 = arith.constant 1 : index
    %c0_113 = arith.constant 0 : index
    %c0_114 = arith.constant 0 : index
    %295 = vector.load %arg9[%c1_112, %c0_113, %c0_114] : memref<2x1x128xf32, #tpu.memory_space<vmem>>, vector<1x1x128xf32>
    %296 = vector.shape_cast %295 : vector<1x1x128xf32> to vector<1x128xf32>
    %c1_115 = arith.constant 1 : index
    %c0_116 = arith.constant 0 : index
    %c0_117 = arith.constant 0 : index
    %297 = vector.load %arg10[%c1_115, %c0_116, %c0_117] : memref<2x1x128xf32, #tpu.memory_space<vmem>>, vector<1x1x128xf32>
    %298 = vector.shape_cast %297 : vector<1x1x128xf32> to vector<1x128xf32>
    %cst_118 = arith.constant dense<0.000000e+00> : vector<16xf32>
    %299 = vector.multi_reduction <add>, %294, %cst_118 [1] : vector<16x128xf32> to vector<16xf32>
    %300 = vector.shape_cast %299 : vector<16xf32> to vector<16x1xf32>
    %cst_119 = arith.constant 1.280000e+02 : f32
    %301 = vector.broadcast %cst_119 : f32 to vector<16x1xf32>
    %302 = arith.divf %300, %301 : vector<16x1xf32>
    %303 = vector.broadcast %302 : vector<16x1xf32> to vector<16x128xf32>
    %304 = arith.subf %294, %303 : vector<16x128xf32>
    %305 = arith.mulf %304, %304 : vector<16x128xf32>
    %cst_120 = arith.constant dense<0.000000e+00> : vector<16xf32>
    %306 = vector.multi_reduction <add>, %305, %cst_120 [1] : vector<16x128xf32> to vector<16xf32>
    %307 = vector.shape_cast %306 : vector<16xf32> to vector<16x1xf32>
    %cst_121 = arith.constant 1.280000e+02 : f32
    %308 = vector.broadcast %cst_121 : f32 to vector<16x1xf32>
    %309 = arith.divf %307, %308 : vector<16x1xf32>
    %310 = vector.broadcast %302 : vector<16x1xf32> to vector<16x128xf32>
    %311 = arith.subf %294, %310 : vector<16x128xf32>
    %cst_122 = arith.constant 9.99999974E-6 : f32
    %312 = vector.broadcast %cst_122 : f32 to vector<16x1xf32>
    %313 = arith.addf %309, %312 : vector<16x1xf32>
    %314 = math.rsqrt %313 : vector<16x1xf32>
    %315 = vector.broadcast %314 : vector<16x1xf32> to vector<16x128xf32>
    %316 = arith.mulf %311, %315 : vector<16x128xf32>
    %317 = vector.broadcast %296 : vector<1x128xf32> to vector<16x128xf32>
    %318 = arith.mulf %316, %317 : vector<16x128xf32>
    %319 = vector.broadcast %298 : vector<1x128xf32> to vector<16x128xf32>
    %320 = arith.addf %318, %319 : vector<16x128xf32>
    %321 = arith.truncf %320 : vector<16x128xf32> to vector<16x128xbf16>
    %c1_123 = arith.constant 1 : index
    %c0_124 = arith.constant 0 : index
    %c0_125 = arith.constant 0 : index
    %322 = vector.load %arg11[%c1_123, %c0_124, %c0_125] : memref<2x128x512xbf16, #tpu.memory_space<vmem>>, vector<1x128x512xbf16>
    %323 = vector.shape_cast %322 : vector<1x128x512xbf16> to vector<128x512xbf16>
    %cst_126 = arith.constant dense<0.000000e+00> : vector<16x512xf32>
    %324 = tpu.matmul %321, %323, %cst_126 {dimension_numbers = #tpu.dot_dimension_numbers<[1], [0], [0], [1], [0, 0, 1, 1], [], []>} : vector<16x128xbf16>, vector<128x512xbf16>, vector<16x512xf32> -> vector<16x512xf32>
    %c1_127 = arith.constant 1 : index
    %c0_128 = arith.constant 0 : index
    %c0_129 = arith.constant 0 : index
    %325 = vector.load %arg12[%c1_127, %c0_128, %c0_129] : memref<2x1x512xf32, #tpu.memory_space<vmem>>, vector<1x1x512xf32>
    %326 = vector.shape_cast %325 : vector<1x1x512xf32> to vector<1x512xf32>
    %327 = vector.broadcast %326 : vector<1x512xf32> to vector<16x512xf32>
    %328 = arith.addf %324, %327 : vector<16x512xf32>
    %329 = arith.mulf %328, %328 : vector<16x512xf32>
    %330 = arith.mulf %328, %329 : vector<16x512xf32>
    %cst_130 = arith.constant 4.471500e-02 : f32
    %331 = vector.broadcast %cst_130 : f32 to vector<16x512xf32>
    %332 = arith.mulf %331, %330 : vector<16x512xf32>
    %333 = arith.addf %328, %332 : vector<16x512xf32>
    %cst_131 = arith.constant 0.797884583 : f32
    %334 = vector.broadcast %cst_131 : f32 to vector<16x512xf32>
    %335 = arith.mulf %334, %333 : vector<16x512xf32>
    %336 = math.tanh %335 : vector<16x512xf32>
    %cst_132 = arith.constant 1.000000e+00 : f32
    %337 = vector.broadcast %cst_132 : f32 to vector<16x512xf32>
    %338 = arith.addf %337, %336 : vector<16x512xf32>
    %cst_133 = arith.constant 5.000000e-01 : f32
    %339 = vector.broadcast %cst_133 : f32 to vector<16x512xf32>
    %340 = arith.mulf %339, %338 : vector<16x512xf32>
    %341 = arith.mulf %328, %340 : vector<16x512xf32>
    %342 = arith.truncf %341 : vector<16x512xf32> to vector<16x512xbf16>
    %c1_134 = arith.constant 1 : index
    %c0_135 = arith.constant 0 : index
    %c0_136 = arith.constant 0 : index
    %343 = vector.load %arg13[%c1_134, %c0_135, %c0_136] : memref<2x512x128xbf16, #tpu.memory_space<vmem>>, vector<1x512x128xbf16>
    %344 = vector.shape_cast %343 : vector<1x512x128xbf16> to vector<512x128xbf16>
    %cst_137 = arith.constant dense<0.000000e+00> : vector<16x128xf32>
    %345 = tpu.matmul %342, %344, %cst_137 {dimension_numbers = #tpu.dot_dimension_numbers<[1], [0], [0], [1], [0, 0, 1, 1], [], []>} : vector<16x512xbf16>, vector<512x128xbf16>, vector<16x128xf32> -> vector<16x128xf32>
    %c1_138 = arith.constant 1 : index
    %c0_139 = arith.constant 0 : index
    %c0_140 = arith.constant 0 : index
    %346 = vector.load %arg14[%c1_138, %c0_139, %c0_140] : memref<2x1x128xf32, #tpu.memory_space<vmem>>, vector<1x1x128xf32>
    %347 = vector.shape_cast %346 : vector<1x1x128xf32> to vector<1x128xf32>
    %348 = vector.broadcast %347 : vector<1x128xf32> to vector<16x128xf32>
    %349 = arith.addf %345, %348 : vector<16x128xf32>
    %350 = arith.addf %349, %320 : vector<16x128xf32>
    %c1_141 = arith.constant 1 : index
    %c0_142 = arith.constant 0 : index
    %c0_143 = arith.constant 0 : index
    %351 = vector.load %arg15[%c1_141, %c0_142, %c0_143] : memref<2x1x128xf32, #tpu.memory_space<vmem>>, vector<1x1x128xf32>
    %352 = vector.shape_cast %351 : vector<1x1x128xf32> to vector<1x128xf32>
    %c1_144 = arith.constant 1 : index
    %c0_145 = arith.constant 0 : index
    %c0_146 = arith.constant 0 : index
    %353 = vector.load %arg16[%c1_144, %c0_145, %c0_146] : memref<2x1x128xf32, #tpu.memory_space<vmem>>, vector<1x1x128xf32>
    %354 = vector.shape_cast %353 : vector<1x1x128xf32> to vector<1x128xf32>
    %cst_147 = arith.constant dense<0.000000e+00> : vector<16xf32>
    %355 = vector.multi_reduction <add>, %350, %cst_147 [1] : vector<16x128xf32> to vector<16xf32>
    %356 = vector.shape_cast %355 : vector<16xf32> to vector<16x1xf32>
    %cst_148 = arith.constant 1.280000e+02 : f32
    %357 = vector.broadcast %cst_148 : f32 to vector<16x1xf32>
    %358 = arith.divf %356, %357 : vector<16x1xf32>
    %359 = vector.broadcast %358 : vector<16x1xf32> to vector<16x128xf32>
    %360 = arith.subf %350, %359 : vector<16x128xf32>
    %361 = arith.mulf %360, %360 : vector<16x128xf32>
    %cst_149 = arith.constant dense<0.000000e+00> : vector<16xf32>
    %362 = vector.multi_reduction <add>, %361, %cst_149 [1] : vector<16x128xf32> to vector<16xf32>
    %363 = vector.shape_cast %362 : vector<16xf32> to vector<16x1xf32>
    %cst_150 = arith.constant 1.280000e+02 : f32
    %364 = vector.broadcast %cst_150 : f32 to vector<16x1xf32>
    %365 = arith.divf %363, %364 : vector<16x1xf32>
    %366 = vector.broadcast %358 : vector<16x1xf32> to vector<16x128xf32>
    %367 = arith.subf %350, %366 : vector<16x128xf32>
    %cst_151 = arith.constant 9.99999974E-6 : f32
    %368 = vector.broadcast %cst_151 : f32 to vector<16x1xf32>
    %369 = arith.addf %365, %368 : vector<16x1xf32>
    %370 = math.rsqrt %369 : vector<16x1xf32>
    %371 = vector.broadcast %370 : vector<16x1xf32> to vector<16x128xf32>
    %372 = arith.mulf %367, %371 : vector<16x128xf32>
    %373 = vector.broadcast %352 : vector<1x128xf32> to vector<16x128xf32>
    %374 = arith.mulf %372, %373 : vector<16x128xf32>
    %375 = vector.broadcast %354 : vector<1x128xf32> to vector<16x128xf32>
    %376 = arith.addf %374, %375 : vector<16x128xf32>
    %377 = vector.shape_cast %376 : vector<16x128xf32> to vector<1x16x128xf32>
    %c0_152 = arith.constant 0 : index
    %c0_153 = arith.constant 0 : index
    %c0_154 = arith.constant 0 : index
    %378 = vector.load %arg17[%c0_152, %c0_153, %c0_154] : memref<1x16x128xf32, #tpu.memory_space<vmem>>, vector<1x16x128xf32>
    tpu.vector_store %arg17[%c0_152, %c0_153, %c0_154], %377 {strides = array<i32>} : memref<1x16x128xf32, #tpu.memory_space<vmem>>, vector<1x16x128xf32>,
    return
  }
  func.func @transform_0(%arg0: i32) -> (i32, i32, i32) {
    %c0_i32 = arith.constant 0 : i32
    %c0_i32_0 = arith.constant 0 : i32
    %c0_i32_1 = arith.constant 0 : i32
    return %arg0, %c0_i32, %c0_i32_0 : i32, i32, i32
  }
  func.func @transform_1(%arg0: i32) -> (i32, i32, i32) {
    %c0_i32 = arith.constant 0 : i32
    %c0_i32_0 = arith.constant 0 : i32
    %c0_i32_1 = arith.constant 0 : i32
    return %arg0, %c0_i32, %c0_i32_0 : i32, i32, i32
  }
  func.func @transform_2(%arg0: i32) -> (i32, i32) {
    %c0_i32 = arith.constant 0 : i32
    %c0_i32_0 = arith.constant 0 : i32
    %c0_i32_1 = arith.constant 0 : i32
    return %c0_i32, %c0_i32_0 : i32, i32
  }
  func.func @transform_3(%arg0: i32) -> (i32, i32) {
    %c0_i32 = arith.constant 0 : i32
    %c0_i32_0 = arith.constant 0 : i32
    %c0_i32_1 = arith.constant 0 : i32
    return %c0_i32, %c0_i32_0 : i32, i32
  }
  func.func @transform_4(%arg0: i32) -> (i32, i32, i32) {
    %c0_i32 = arith.constant 0 : i32
    %c0_i32_0 = arith.constant 0 : i32
    %c0_i32_1 = arith.constant 0 : i32
    %c0_i32_2 = arith.constant 0 : i32
    return %c0_i32, %c0_i32_0, %c0_i32_1 : i32, i32, i32
  }
  func.func @transform_5(%arg0: i32) -> (i32, i32, i32) {
    %c0_i32 = arith.constant 0 : i32
    %c0_i32_0 = arith.constant 0 : i32
    %c0_i32_1 = arith.constant 0 : i32
    %c0_i32_2 = arith.constant 0 : i32
    return %c0_i32, %c0_i32_0, %c0_i32_1 : i32, i32, i32
  }
  func.func @transform_6(%arg0: i32) -> (i32, i32, i32) {
    %c0_i32 = arith.constant 0 : i32
    %c0_i32_0 = arith.constant 0 : i32
    %c0_i32_1 = arith.constant 0 : i32
    %c0_i32_2 = arith.constant 0 : i32
    return %c0_i32, %c0_i32_0, %c0_i32_1 : i32, i32, i32
  }
  func.func @transform_7(%arg0: i32) -> (i32, i32, i32) {
    %c0_i32 = arith.constant 0 : i32
    %c0_i32_0 = arith.constant 0 : i32
    %c0_i32_1 = arith.constant 0 : i32
    %c0_i32_2 = arith.constant 0 : i32
    return %c0_i32, %c0_i32_0, %c0_i32_1 : i32, i32, i32
  }
  func.func @transform_8(%arg0: i32) -> (i32, i32, i32) {
    %c0_i32 = arith.constant 0 : i32
    %c0_i32_0 = arith.constant 0 : i32
    %c0_i32_1 = arith.constant 0 : i32
    %c0_i32_2 = arith.constant 0 : i32
    return %c0_i32, %c0_i32_0, %c0_i32_1 : i32, i32, i32
  }
  func.func @transform_9(%arg0: i32) -> (i32, i32, i32) {
    %c0_i32 = arith.constant 0 : i32
    %c0_i32_0 = arith.constant 0 : i32
    %c0_i32_1 = arith.constant 0 : i32
    %c0_i32_2 = arith.constant 0 : i32
    return %c0_i32, %c0_i32_0, %c0_i32_1 : i32, i32, i32
  }
  func.func @transform_10(%arg0: i32) -> (i32, i32, i32) {
    %c0_i32 = arith.constant 0 : i32
    %c0_i32_0 = arith.constant 0 : i32
    %c0_i32_1 = arith.constant 0 : i32
    %c0_i32_2 = arith.constant 0 : i32
    return %c0_i32, %c0_i32_0, %c0_i32_1 : i32, i32, i32
  }
  func.func @transform_11(%arg0: i32) -> (i32, i32, i32) {
    %c0_i32 = arith.constant 0 : i32
    %c0_i32_0 = arith.constant 0 : i32
    %c0_i32_1 = arith.constant 0 : i32
    %c0_i32_2 = arith.constant 0 : i32
    return %c0_i32, %c0_i32_0, %c0_i32_1 : i32, i32, i32
  }
  func.func @transform_12(%arg0: i32) -> (i32, i32, i32) {
    %c0_i32 = arith.constant 0 : i32
    %c0_i32_0 = arith.constant 0 : i32
    %c0_i32_1 = arith.constant 0 : i32
    %c0_i32_2 = arith.constant 0 : i32
    return %c0_i32, %c0_i32_0, %c0_i32_1 : i32, i32, i32
  }
  func.func @transform_13(%arg0: i32) -> (i32, i32, i32) {
    %c0_i32 = arith.constant 0 : i32
    %c0_i32_0 = arith.constant 0 : i32
    %c0_i32_1 = arith.constant 0 : i32
    %c0_i32_2 = arith.constant 0 : i32
    return %c0_i32, %c0_i32_0, %c0_i32_1 : i32, i32, i32
  }
  func.func @transform_14(%arg0: i32) -> (i32, i32, i32) {
    %c0_i32 = arith.constant 0 : i32
    %c0_i32_0 = arith.constant 0 : i32
    %c0_i32_1 = arith.constant 0 : i32
    %c0_i32_2 = arith.constant 0 : i32
    return %c0_i32, %c0_i32_0, %c0_i32_1 : i32, i32, i32
  }
  func.func @transform_15(%arg0: i32) -> (i32, i32, i32) {
    %c0_i32 = arith.constant 0 : i32
    %c0_i32_0 = arith.constant 0 : i32
    %c0_i32_1 = arith.constant 0 : i32
    %c0_i32_2 = arith.constant 0 : i32
    return %c0_i32, %c0_i32_0, %c0_i32_1 : i32, i32, i32
  }
  func.func @transform_16(%arg0: i32) -> (i32, i32, i32) {
    %c0_i32 = arith.constant 0 : i32
    %c0_i32_0 = arith.constant 0 : i32
    %c0_i32_1 = arith.constant 0 : i32
    return %arg0, %c0_i32, %c0_i32_0 : i32, i32, i32
  }
}

</mosaic_0001>

<bundles_post_ra>
// kernel: tpu_custom_call.1
= control target key start
LH: loop header
LB: loop body
LE: loop exit
PB: predicated region body
PF: predicated region fallthrough
CT: control target
= control target key end

     0   :  { %s6690_s0 = inlined_call_operand.hbm [shape: f32[2,16,128], index: 0, kind: input, shape index: {}]   ;;  %s6691_s1 = inlined_call_operand.hbm [shape: f32[2,1,16], index: 1, kind: input, shape index: {}]   ;;  %s6692_s2 = inlined_call_operand.hbm [shape: f32[1,128], index: 2, kind: input, shape index: {}]   ;;  %s6693_s3 = inlined_call_operand.hbm [shape: f32[1,128], index: 3, kind: input, shape index: {}]   ;;  %s6694_s4 = inlined_call_operand.hbm [shape: bf16[2,128,384], index: 4, kind: input, shape index: {}]   ;;  %s6695_s5 = inlined_call_operand.vmem [shape: f32[2,1,384], index: 5, kind: input, shape index: {}]   ;;  %s6696_s6 = inlined_call_operand.hbm [shape: bf16[2,128,128], index: 6, kind: input, shape index: {}]   ;;  %s6697_s7 = inlined_call_operand.vmem [shape: f32[2,1,128], index: 7, kind: input, shape index: {}]   ;;  %s6698_s8 = inlined_call_operand.vmem [shape: f32[2,1,128], index: 8, kind: input, shape index: {}]   ;;  %s6699_s9 = inlined_call_operand.vmem [shape: f32[2,1,128], index: 9, kind: input, shape index: {}]   ;;  %s6700_s10 = inlined_call_operand.hbm [shape: bf16[2,128,512], index: 10, kind: input, shape index: {}]   ;;  %s6701_s11 = inlined_call_operand.vmem [shape: f32[2,1,512], index: 11, kind: input, shape index: {}]   ;;  %s6702_s12 = inlined_call_operand.hbm [shape: bf16[2,512,128], index: 12, kind: input, shape index: {}]   ;;  %s6703_s13 = inlined_call_operand.vmem [shape: f32[2,1,128], index: 13, kind: input, shape index: {}]   ;;  %s6704_s14 = inlined_call_operand.vmem [shape: f32[2,1,128], index: 14, kind: input, shape index: {}]   ;;  %s6705_s15 = inlined_call_operand.vmem [shape: f32[2,1,128], index: 15, kind: input, shape index: {}]   ;;  %s6706_s16 = inlined_call_operand.hbm [shape: f32[2,16,128], index: 16, kind: output, shape index: {}]  }
   0x1   :  { %6720 = sst [smem:[#allocation25_spill]] %s6690_s0 }
   0x2   :  { %6721 = sst [smem:[#allocation26_spill]] %s6692_s2 }
   0x3   :  { %6722 = sst [smem:[#allocation27_spill]] %s6693_s3 }
   0x4   :  { %6723 = sst [smem:[#allocation28_spill]] %s6694_s4 }
   0x5   :  { %6724 = sst [smem:[#allocation29_spill]] %s6696_s6 }
   0x6   :  { %6725 = sst [smem:[#allocation30_spill]] %s6700_s10 }
   0x7   :  { %6726 = sst [smem:[#allocation31_spill]] %s6701_s11 }
   0x8   :  { %6727 = sst [smem:[#allocation32_spill]] %s6702_s12 }
   0x9   :  { %6728 = sst [smem:[#allocation33_spill]] %s6703_s13 }
   0xa   :  { %6729 = sst [smem:[#allocation34_spill]] %s6704_s14 }
   0xb   :  { %6730 = sst [smem:[#allocation35_spill]] %s6705_s15 }
   0xc   :  { %6731 = sst [smem:[#allocation36_spill]] %s6706_s16 }
   0xd   :  { %21 = vsyncpa [#allocation3], 0 }
   0xe   :  { %23 = vsyncpa [#allocation3 + $0x1], 0 }
   0xf   :  { %24 = vsyncpa [#allocation6], 0 }
  0x10   :  { %26 = vsyncpa [#allocation6 + $0x1], 0 }
  0x11   :  { %27 = vsyncpa [#allocation9], 0 }
  0x12   :  { %28 = vsyncpa [#allocation12], 0 }
  0x13   :  { %29 = vsyncpa [#allocation15], 0 }
  0x14   :  { %30 = vsyncpa [#allocation4], 0 }
  0x15   :  { %32 = vsyncpa [#allocation4 + $0x1], 0  ;;  %s5811_s21 = smov 0   ;;  %s5813_s22 = smov 0  }
  0x16   :  { %s5815_s23 = smov 0   ;;  %s5817_s24 = smov 0  }
  0x17 LB: > { %s5701_s25 = smov [#allocation7]   ;;  %s5832_s27 = sadd.s32 4294967295, %s5699_s24   ;;  %s5699_s24 = sphi %s5817_s24, %s6774_s24   ;;  %s5695_s23 = sphi %s5815_s23, %s6773_s23   ;;  %s5691_s22 = sphi %s5813_s22, %s6772_s22   ;;  %s5687_s21 = sphi %s5811_s21, %s6771_s21  }
  0x18   : > { %s428_s26 = sshll.u32 %s5701_s25, 4  ;;  %p4279_p0 = scmp.ge.s32.totalorder %s5699_s24, 1  ;;  %s5837_s26 = int_to_ptr.vmem [resolvable:$true] %s428_s26 }
  0x19   : > { %p6713_p1 = scmp.eq.s32.totalorder %s5832_s27, 0  ;;  %p415_p2 = scmp.lt.s32.totalorder %s5699_s24, 3 }
  0x1a   : > { %s5702_s29 = smov [#allocation8]   ;;  %s5703_s0 = smov [#allocation11]  }
  0x1b   : > { %p5839_p3 = pnand %p4279_p0, %p415_p2  ;;  %s439_s30 = sshll.u32 %s5702_s29, 4  ;;  %s5846_s30 = int_to_ptr.vmem [resolvable:$true] %s439_s30 }
  0x1c   : > { %s465_s17 = sshll.u32 %s5703_s0, 4  ;;  %s6734_s2 = sld [smem:[#allocation26_spill]]  ;;  %s5854_s17 = int_to_ptr.vmem [resolvable:$true] %s465_s17 }
  0x1d   : > { %s6732_s28 = scalar_select %p5839_p3, 1, 0 }
  0x1e   : > { %p4900_p5 = pneg %p5839_p3 }
  0x20   : > { %p5850_p6 = pnand %p4900_p5, %p6713_p1 }
  0x22   : > { %s5385_s25 = scalar_lea.hbm %s6734_s2, 16  ;;  %p5864_p8 = pneg %p5850_p6 }
  0x23   : > { %p5386_p7 = scmp.ne.s32.totalorder %s6734_s2, %s5385_s25  ;;  %p5392_p11 = scmp.lt.u32.totalorder %s5385_s25, %s6734_s2 }
  0x25   : > { %p5388_p9 = pnand %p5864_p8, %p5386_p7 }
  0x27   : > { %p5389_p10 = pneg %p5388_p9 }
  0x29   : > { %p5394_p12 = pnand %p5392_p11, %p5389_p10 }
  0x2b   : > { %5397 = shalt.err (!%p5394_p12)
}
  0x2c   : > { %s5398_s15 = scalar_lea.vmem %s5837_s26, 16  ;;  %s5405_s16 = scalar_lea.vmem %s5837_s26, 32 }
  0x2d   : > { %p5399_p13 = scmp.ne.s32.totalorder %s5837_s26, %s5398_s15  ;;  %p5406_p5 = scmp.lt.s32.totalorder %s5837_s26, %s5837_s26 }
  0x2e   : > { %p5407_p7 = scmp.lt.s32.totalorder %s5405_s16, %s5398_s15 }
  0x2f   : > { %p5401_p0 = pnand %p5399_p13, %p5864_p8 }
  0x30   : > { %p5408_p9 = por %p5407_p7, %p5406_p5 }
  0x31   : > { %p5402_p2 = pneg %p5401_p0 }
  0x33   : > { %p5409_p4 = pnand %p5408_p9, %p5402_p2 }
  0x35   : > { %5412 = shalt.err (!%p5409_p4)
}
  0x36   : > { %4903 = dma.hbm_to_vmem [thread:$0]  (!%p5850_p6), %s6734_s2, 16, %s5837_s26, [#allocation6]  }
  0x37   : > { %s6736_s3 = sld [smem:[#allocation27_spill]] }
  0x3d   : > { %s5413_s0 = scalar_lea.hbm %s6736_s3, 16 }
  0x3e   : > { %p5414_p10 = scmp.ne.s32.totalorder %s6736_s3, %s5413_s0  ;;  %p5420_p4 = scmp.lt.u32.totalorder %s5413_s0, %s6736_s3 }
  0x40   : > { %p5416_p11 = pnand %p5414_p10, %p5864_p8 }
  0x42   : > { %p5417_p12 = pneg %p5416_p11 }
  0x44   : > { %p5422_p13 = pnand %p5420_p4, %p5417_p12 }
  0x46   : > { %5425 = shalt.err (!%p5422_p13)
}
  0x47   : > { %s5426_s26 = scalar_lea.vmem %s5846_s30, 16  ;;  %s5433_s11 = scalar_lea.vmem %s5846_s30, 32 }
  0x48   : > { %p5427_p0 = scmp.ne.s32.totalorder %s5846_s30, %s5426_s26  ;;  %p5434_p7 = scmp.lt.s32.totalorder %s5846_s30, %s5846_s30 }
  0x49   : > { %p5435_p9 = scmp.lt.s32.totalorder %s5433_s11, %s5426_s26 }
  0x4a   : > { %p5429_p2 = pnand %p5427_p0, %p5864_p8 }
  0x4b   : > { %p5436_p10 = por %p5435_p9, %p5434_p7 }
  0x4c   : > { %p5430_p5 = pneg %p5429_p2 }
  0x4e   : > { %p5437_p11 = pnand %p5436_p10, %p5430_p5 }
  0x50   : > { %5440 = shalt.err (!%p5437_p11)
}
  0x51   : > { %4906 = dma.hbm_to_vmem [thread:$0]  (!%p5850_p6), %s6736_s3, 16, %s5846_s30, [#allocation9]  }
  0x52   : > { %s6737_s6 = sld [smem:[#allocation29_spill]] }
  0x58   : > { %s5441_s25 = scalar_lea.hbm %s6737_s6, 2048 }
  0x59   : > { %p5442_p12 = scmp.ne.s32.totalorder %s6737_s6, %s5441_s25  ;;  %p5448_p0 = scmp.lt.u32.totalorder %s5441_s25, %s6737_s6 }
  0x5b   : > { %p5444_p4 = pnand %p5442_p12, %p5864_p8 }
  0x5d   : > { %p5445_p13 = pneg %p5444_p4 }
  0x5f   : > { %p5450_p2 = pnand %p5448_p0, %p5445_p13 }
  0x61   : > { %5453 = shalt.err (!%p5450_p2)
}
  0x62   : > { %s5454_s30 = scalar_lea.vmem %s5854_s17, 2048  ;;  %p5462_p10 = scmp.lt.s32.totalorder %s5854_s17, %s5854_s17 }
  0x63   : > { %p5455_p5 = scmp.ne.s32.totalorder %s5854_s17, %s5454_s30  ;;  %p5463_p11 = scmp.lt.s32.totalorder %s5454_s30, %s5454_s30 }
  0x65   : > { %p5457_p7 = pnand %p5455_p5, %p5864_p8  ;;  %p5464_p12 = por %p5463_p11, %p5462_p10 }
  0x67   : > { %p5458_p9 = pneg %p5457_p7 }
  0x69   : > { %p5465_p4 = pnand %p5464_p12, %p5458_p9 }
  0x6b   : > { %5468 = shalt.err (!%p5465_p4)
}
  0x6c   : > { %s6715_s11 = smov 64   ;;  %s6716_s13 = smov 4  }
  0x6d   : > { %4912 = dma.hbm_to_vmem [thread:$0]  (!%p5850_p6), %s6737_s6, 2048, %s5854_s17, [#allocation12], %s6715_s11, %s6715_s11, %s6716_s13  }
  0x6e   : > { %s5706_s20 = smov [#allocation10]   ;;  %s6738_s4 = sld [smem:[#allocation28_spill]] }
  0x6f   : > { %s449_s25 = sshll.u32 %s5706_s20, 4  ;;  %s450_s25 = int_to_ptr.vmem [resolvable:$true] %s449_s25 }
  0x74   : > { %s5469_s16 = scalar_lea.hbm %s6738_s4, 6144 }
  0x75   : > { %p5470_p13 = scmp.ne.s32.totalorder %s6738_s4, %s5469_s16  ;;  %p5476_p5 = scmp.lt.u32.totalorder %s5469_s16, %s6738_s4 }
  0x77   : > { %p5472_p0 = pnand %p5470_p13, %p5864_p8 }
  0x79   : > { %p5473_p2 = pneg %p5472_p0 }
  0x7b   : > { %p5478_p7 = pnand %p5476_p5, %p5473_p2 }
  0x7d   : > { %5481 = shalt.err (!%p5478_p7)
}
  0x7e   : > { %s5482_s17 = scalar_lea.vmem %s450_s25, 6144  ;;  %p5490_p12 = scmp.lt.s32.totalorder %s450_s25, %s450_s25 }
  0x7f   : > { %p5483_p9 = scmp.ne.s32.totalorder %s450_s25, %s5482_s17  ;;  %p5491_p4 = scmp.lt.s32.totalorder %s5482_s17, %s5482_s17 }
  0x81   : > { %p5485_p10 = pnand %p5483_p9, %p5864_p8  ;;  %p5492_p1 = por %p5491_p4, %p5490_p12 }
  0x83   : > { %p5486_p11 = pneg %p5485_p10 }
  0x85   : > { %p5493_p3 = pnand %p5492_p1, %p5486_p11 }
  0x87   : > { %5496 = shalt.err (!%p5493_p3)
}
  0x88   : > { %s5707_s14 = smov 192   ;;  %s5708_s19 = smov 12  }
  0x89   : > { %4909 = dma.hbm_to_vmem [thread:$0]  (!%p5850_p6), %s6738_s4, 6144, %s450_s25, [#allocation9], %s5707_s14, %s5707_s14, %s5708_s19  }
  0x8a   : > { %s5709_s20 = smov [#allocation13]   ;;  %s6739_s10 = sld [smem:[#allocation30_spill]] }
  0x8b   : > { %s487_s0 = sshll.u32 %s5709_s20, 4  ;;  %s488_s0 = int_to_ptr.vmem [resolvable:$true] %s487_s0 }
  0x90   : > { %s5497_s26 = scalar_lea.hbm %s6739_s10, 8192 }
  0x91   : > { %p5498_p1 = scmp.ne.s32.totalorder %s6739_s10, %s5497_s26  ;;  %p5504_p0 = scmp.lt.u32.totalorder %s5497_s26, %s6739_s10 }
  0x93   : > { %p5500_p3 = pnand %p5498_p1, %p5864_p8 }
  0x95   : > { %p5501_p13 = pneg %p5500_p3 }
  0x97   : > { %p5506_p2 = pnand %p5504_p0, %p5501_p13 }
  0x99   : > { %5509 = shalt.err (!%p5506_p2)
}
  0x9a   : > { %s5510_s25 = scalar_lea.vmem %s488_s0, 8192  ;;  %p5518_p10 = scmp.lt.s32.totalorder %s488_s0, %s488_s0 }
  0x9b   : > { %p5511_p5 = scmp.ne.s32.totalorder %s488_s0, %s5510_s25  ;;  %p5519_p11 = scmp.lt.s32.totalorder %s5510_s25, %s5510_s25 }
  0x9d   : > { %p5513_p7 = pnand %p5511_p5, %p5864_p8  ;;  %p5520_p12 = por %p5519_p11, %p5518_p10 }
  0x9f   : > { %p5514_p9 = pneg %p5513_p7 }
  0xa1   : > { %p5521_p4 = pnand %p5520_p12, %p5514_p9 }
  0xa3   : > { %5524 = shalt.err (!%p5521_p4)
}
  0xa4   : > { %s5710_s14 = smov 256   ;;  %s5711_s19 = smov 16  }
  0xa5   : > { %4915 = dma.hbm_to_vmem [thread:$0]  (!%p5850_p6), %s6739_s10, 8192, %s488_s0, [#allocation12], %s5710_s14, %s5710_s14, %s5711_s19  }
  0xa6   : > { %s5712_s2 = smov [#allocation14]   ;;  %s6740_s12 = sld [smem:[#allocation32_spill]] }
  0xa7   : > { %s503_s3 = sshll.u32 %s5712_s2, 4  ;;  %s504_s3 = int_to_ptr.vmem [resolvable:$true] %s503_s3 }
  0xac   : > { %s5525_s16 = scalar_lea.hbm %s6740_s12, 8192 }
  0xad   : > { %p5526_p1 = scmp.ne.s32.totalorder %s6740_s12, %s5525_s16  ;;  %p5532_p0 = scmp.lt.u32.totalorder %s5525_s16, %s6740_s12 }
  0xaf   : > { %p5528_p3 = pnand %p5526_p1, %p5864_p8 }
  0xb1   : > { %p5529_p13 = pneg %p5528_p3 }
  0xb3   : > { %p5534_p2 = pnand %p5532_p0, %p5529_p13 }
  0xb5   : > { %5537 = shalt.err (!%p5534_p2)
}
  0xb6   : > { %s5538_s0 = scalar_lea.vmem %s504_s3, 8192  ;;  %p5546_p10 = scmp.lt.s32.totalorder %s504_s3, %s504_s3 }
  0xb7   : > { %p5539_p5 = scmp.ne.s32.totalorder %s504_s3, %s5538_s0  ;;  %p5547_p11 = scmp.lt.s32.totalorder %s5538_s0, %s5538_s0 }
  0xb9   : > { %p5541_p7 = pnand %p5539_p5, %p5864_p8  ;;  %p5548_p12 = por %p5547_p11, %p5546_p10 }
  0xbb   : > { %p5542_p9 = pneg %p5541_p7 }
  0xbd   : > { %p5549_p4 = pnand %p5548_p12, %p5542_p9 }
  0xbf   : > { %5552 = shalt.err (!%p5549_p4)
}
  0xc0   : > { %s6741_s14 = smov 4   ;;  %s6742_s19 = smov 64  }
  0xc1   : > { %4918 = dma.hbm_to_vmem [thread:$0]  (!%p5850_p6), %s6740_s12, 8192, %s504_s3, [#allocation15], %s6742_s19, %s6742_s19, %s6741_s14  }
  0xc2   : > { %s4278_s18 = sadd.s32 4294967294, %s5699_s24   ;;  %s5995_s29 = sadd.s32 1, %s5699_s24  }
  0xc3   : > { %s42_s2 = ssub.s32 %s5699_s24, %s5995_s29  ;;  %s45_s20 = sadd.s32 1, %s5695_s23 }
  0xc4   : > { %p43_p8 = scmp.eq.s32.totalorder %s42_s2, 0  ;;  %p52_p1 = scmp.ne.s32.totalorder %s5695_s23, %s5691_s22 }
  0xc5   : > { %p53_p3 = scmp.eq.s32.totalorder %s5699_s24, 0  ;;  %p58_p13 = scmp.ne.s32.totalorder %s5691_s22, %s5687_s21 }
  0xc6   : > { %s6006_s15 = scalar_select %p43_p8, %s5695_s23, %s45_s20  }
  0xc7   : > { %p6008_p0 = por %p53_p3, %p52_p1  ;;  %p6745_p2 = scmp.eq.s32.totalorder %s5832_s27, 0 }
  0xc8   : > { %6743 = sst [smem:[#allocation24_spill]] %s6006_s15  ;;  %p402_p5 = scmp.eq.s32.totalorder %s5832_s27, 1 }
  0xc9   : > { %p6014_p6 = por %p6745_p2, %p58_p13  ;;  %p408_p7 = scmp.eq.s32.totalorder %s4278_s18, 1 }
  0xca   : > { %p4936_p9 = scmp.lt.s32.totalorder %s5699_s24, 2  ;;  %s6021_s26 = sand.u32 1, %s5695_s23  }
  0xcb   : > { %s6746_s3 = scalar_select %p6014_p6, 1, 0 }
  0xcc   : > { %p6023_p10 = por %p402_p5, %p52_p1  ;;  %p6027_p11 = por %p408_p7, %p58_p13 }
  0xcd   : > { %s4287_s25 = sshll.u32 %s6021_s26, 4  ;;  %s4536_s0 = sshll.u32 %s5699_s24, 8 }
  0xce   : > { %s6747_s30 = scalar_select %p6023_p10, 1, 0 }
  0xcf   : > { %s6748_s17 = scalar_select %p6027_p11, 1, 0 }
  0xd0   : > { %s6749_s11 = sld [smem:[#allocation25_spill]]  ;;  %s530_s18 = scalar_lea.vmem [#allocation2], %s4287_s25 }
  0xd1   : > { %s537_s2 = sshll.u32 %s530_s18, 4  ;;  %p6042_p12 = pnand %p4936_p9, %p6008_p0  ;;  %s6038_s2 = int_to_ptr.vmem [resolvable:$true] %s537_s2 }
  0xd2   : > { %s527_s6 = scalar_lea.sflag [#allocation3], %s6021_s26 }
  0xd3   : > { %p5555_p8 = pneg %p6042_p12 }
  0xd6   : > { %s6036_s13 = scalar_lea.hbm %s6749_s11, %s4536_s0  ;;  %s5558_s16 = scalar_lea.hbm %s6749_s11, 512 }
  0xd7   : > { %s5553_s14 = scalar_lea.hbm %s6036_s13, 256  ;;  %p5559_p13 = scmp.lt.u32.totalorder %s6036_s13, %s6749_s11 }
  0xd8   : > { %p5554_p4 = scmp.ne.s32.totalorder %s6036_s13, %s5553_s14  ;;  %p5560_p0 = scmp.lt.u32.totalorder %s5558_s16, %s5553_s14 }
  0xd9   : > { %p5562_p5 = scmp.lt.u32.totalorder %s5553_s14, %s6036_s13 }
  0xda   : > { %p5556_p1 = pnand %p5555_p8, %p5554_p4  ;;  %p5561_p2 = por %p5560_p0, %p5559_p13 }
  0xdc   : > { %p5557_p3 = pneg %p5556_p1  ;;  %p5563_p7 = por %p5562_p5, %p5561_p2 }
  0xde   : > { %p5564_p9 = pnand %p5563_p7, %p5557_p3 }
  0xe0   : > { %5567 = shalt.err (!%p5564_p9)
}
  0xe1   : > { %s5568_s4 = scalar_lea.vmem %s6038_s2, 256  ;;  %s5713_s25 = smov [#allocation2]  }
  0xe2   : > { %p5569_p4 = scmp.ne.s32.totalorder %s6038_s2, %s5568_s4  ;;  %s5573_s0 = sshll.u32 %s5713_s25, 4  ;;  %s5574_s0 = int_to_ptr.vmem [resolvable:$false] %s5573_s0 }
  0xe3   : > { %s5575_s19 = scalar_lea.vmem %s5574_s0, 512  ;;  %p5576_p10 = scmp.lt.s32.totalorder %s6038_s2, %s5574_s0 }
  0xe4   : > { %p5571_p1 = pnand %p5569_p4, %p5555_p8  ;;  %p5577_p13 = scmp.lt.s32.totalorder %s5575_s19, %s5568_s4 }
  0xe6   : > { %p5572_p11 = pneg %p5571_p1  ;;  %p5578_p0 = por %p5577_p13, %p5576_p10 }
  0xe8   : > { %p5579_p2 = pnand %p5578_p0, %p5572_p11 }
  0xea   : > { %5582 = shalt.err (!%p5579_p2)
}
  0xeb   : > { %s5714_s14 = smov 128   ;;  %s5715_s16 = smov 8  }
  0xec   : > { %4922 = dma.hbm_to_vmem [thread:$0]  (!%p6042_p12), %s6036_s13, 256, %s6038_s2, %s527_s6, %s5714_s14, %s5714_s14, %s5715_s16  }
  0xed   : > { %s4290_s18 = sshll.u32 %s5699_s24, 4  ;;  %s550_s25 = scalar_lea.vmem [#allocation5], %s6021_s26 }
  0xee   : > { %s557_s0 = sshll.u32 %s550_s25, 4  ;;  %s6080_s10 = scalar_lea.hbm %s6691_s1, %s4290_s18  ;;  %s558_s0 = int_to_ptr.vmem [resolvable:$true] %s557_s0 }
  0xef   : > { %s6751_s11 = sand.u32 1, %s5699_s24   ;;  %s5583_s15 = scalar_lea.hbm %s6080_s10, 16 }
  0xf0   : > { %s548_s12 = scalar_lea.sflag [#allocation6], %s6751_s11  ;;  %p5584_p10 = scmp.ne.s32.totalorder %s6080_s10, %s5583_s15 }
  0xf1   : > { %s5588_s13 = scalar_lea.hbm %s6691_s1, 32  ;;  %p5589_p5 = scmp.lt.u32.totalorder %s6080_s10, %s6691_s1 }
  0xf2   : > { %p5586_p11 = pnand %p5584_p10, %p5555_p8  ;;  %p5590_p7 = scmp.lt.u32.totalorder %s5588_s13, %s5583_s15 }
  0xf3   : > { %p5592_p4 = scmp.lt.u32.totalorder %s5583_s15, %s6080_s10 }
  0xf4   : > { %p5587_p3 = pneg %p5586_p11  ;;  %p5591_p9 = por %p5590_p7, %p5589_p5 }
  0xf6   : > { %p5593_p1 = por %p5592_p4, %p5591_p9 }
  0xf8   : > { %p5594_p13 = pnand %p5593_p1, %p5587_p3 }
  0xfa   : > { %5597 = shalt.err (!%p5594_p13)
}
  0xfb   : > { %s5598_s11 = scalar_lea.vmem %s558_s0, 16  ;;  %s5716_s16 = smov [#allocation5]  }
  0xfc   : > { %p5599_p0 = scmp.ne.s32.totalorder %s558_s0, %s5598_s11  ;;  %s5603_s18 = sshll.u32 %s5716_s16, 4  ;;  %s5604_s18 = int_to_ptr.vmem [resolvable:$false] %s5603_s18 }
  0xfd   : > { %s5605_s25 = scalar_lea.vmem %s5604_s18, 32  ;;  %p5606_p11 = scmp.lt.s32.totalorder %s558_s0, %s5604_s18 }
  0xfe   : > { %p5601_p2 = pnand %p5599_p0, %p5555_p8  ;;  %p5607_p6 = scmp.lt.s32.totalorder %s5605_s25, %s5598_s11 }
 0x100   : > { %p5602_p10 = pneg %p5601_p2  ;;  %p5608_p5 = por %p5607_p6, %p5606_p11 }
 0x102   : > { %p5609_p7 = pnand %p5608_p5, %p5602_p10 }
 0x104   : > { %5612 = shalt.err (!%p5609_p7)
}
 0x105   : > { %4925 = dma.hbm_to_vmem [thread:$0]  (!%p6042_p12), %s6080_s10, 16, %s558_s0, %s548_s12  }
 0x106   : > { %p6752_p3 = scmp.ne.s32.totalorder %s6732_s28, 0 }
 0x107   : > { %s6106_s15 = sand.u32 (!%p6752_p3), 1, %s5691_s22   ;;  %p6753_p6 = scmp.ne.s32.totalorder (!%p6752_p3), %s6746_s3, 0 }
 0x108   : > { %566 = sbr.rel (%p6752_p3) target bundleno = 5941 (0x1735), region = 84  ;;  %s4292_s4 = sshll.u32 (!%p6752_p3), %s6106_s15, 4 }
 0x109   : > { %s569_s19 = scalar_lea.sflag (!%p6752_p3), [#allocation3], %s6106_s15  ;;  %s572_s6 = scalar_lea.vmem (!%p6752_p3), [#allocation2], %s4292_s4 }
 0x10f   : > { %5658 = dma.done.wait (%p6753_p6), %s569_s19, 256  }
 0x110   : > { %5660 = vsyncadd (%p6753_p6), %s569_s19, 4294967040  ;;  %s577_s10 = sand.u32 1, %s5832_s27   ;;  %s580_s28 = scalar_lea.vmem [#allocation5], %s6106_s15 }
 0x111   : > { %s578_s12 = scalar_lea.sflag [#allocation6], %s577_s10 }
 0x112   : > { %5662 = dma.done.wait (%p6753_p6), %s578_s12, 16  }
 0x113   : > { %5664 = vsyncadd (%p6753_p6), %s578_s12, 4294967280  ;;  %p6754_p12 = scmp.eq.s32.totalorder %s5832_s27, 0 }
 0x115   : > { %5666 = dma.done.wait (%p6754_p12), [#allocation6], 16   ;;  %p6755_p8 = pmov %p6754_p12 }
 0x117   : > { %5668 = vsyncadd (%p6755_p8), [#allocation6], 4294967280  ;;  %p6756_p9 = pmov %p6755_p8 }
 0x118   : > { %p6757_p4 = pmov %p6755_p8 }
 0x119   : > { %5670 = dma.done.wait (%p6756_p9), [#allocation9], 6160  }
 0x11a   : > { %5672 = vsyncadd (%p6757_p4), [#allocation9], 4294961136  ;;  %p6758_p1 = pmov %p6757_p4 }
 0x11c   : > { %5674 = dma.done.wait (%p6758_p1), [#allocation12], 10240   ;;  %p6759_p13 = pmov %p6758_p1 }
 0x11d   : > { %p6760_p0 = pmov %p6758_p1 }
 0x11e   : > { %5676 = vsyncadd (%p6759_p13), [#allocation12], 4294957056 }
 0x11f   : > { %5678 = dma.done.wait (%p6760_p0), [#allocation15], 8192   ;;  %p6761_p2 = pmov %p6760_p0 }
 0x120   : > { %v658_v0 = vld [vmem:[%s572_s6] sm:$0xff]  ;;  %v659_v1 = vld [vmem:[%s572_s6 + $0x8] sm:$0xff]  ;;  %v5717_v4 = vmov 0.0   ;;  %v5718_v30 = vmov 0   ;;  %vm5719_vm0 = vmmov 0   ;;  %v737_v53 = vlaneseq  ;;  %s5720_s0 = smov 96  }
 0x121   : > { %5680 = vsyncadd (%p6761_p2), [#allocation15], 4294959104  ;;  %662 = vadd.xlane.f32.xlu0 %v658_v0  ;;  %v5028_v2 = vld [vmem:[#allocation10 + $0x4] ss:$12 sps:$4 sm:$0xff]   ;;  %v5030_v3 = vld [vmem:[#allocation10] ss:$12 sps:$4 sm:$0xff]   ;;  %4694 = vmatprep.subr.bf16.mxu1 %v5717_v4 }
 0x122   : > { %v5031_v5 = vld [vmem:[#allocation10 + $0x8] ss:$12 sps:$4 sm:$0xff]   ;;  %880 = vmatprep.subr.bf16.mxu0 %v5028_v2  ;;  %v5034_v15 = vld [vmem:[#allocation10 + $0x18] ss:$12 sps:$4 sm:$0xff]   ;;  %v5035_v16 = vld [vmem:[#allocation10 + $0x20] ss:$12 sps:$4 sm:$0xff]   ;;  %912 = vmatprep.mubr.bf16.mxu0 %v5718_v30 }
 0x123   : > { %v5032_v6 = vld [vmem:[#allocation10 + $0x1c] ss:$12 sps:$4 sm:$0xff]   ;;  %881 = vmatpush1.bf16.msra.mxu0 %v5030_v3  ;;  %4695 = vmatpush3.bf16.msra.mxu1 %v5031_v5  ;;  %v5036_v17 = vld [vmem:[#allocation10 + $0x34] ss:$12 sps:$4 sm:$0xff]   ;;  %v5039_v19 = vld [vmem:[#allocation10 + $0x38] ss:$12 sps:$4 sm:$0xff]  }
 0x124   : > { %882 = vmatprep.subr.bf16.mxu0 %v5032_v6  ;;  %4696 = vmatprep.subr.bf16.mxu1 %v5717_v4  ;;  %v5038_v18 = vld [vmem:[#allocation10 + $0x30] ss:$12 sps:$4 sm:$0xff]   ;;  %v5040_v20 = vld [vmem:[#allocation10 + $0x4c] ss:$12 sps:$4 sm:$0xff]   ;;  %v5042_v21 = vld [vmem:[#allocation10 + $0x48] ss:$12 sps:$4 sm:$0xff]  }
 0x125   : > { %664 = vadd.xlane.f32.xlu0 %v659_v1  ;;  %v5043_v22 = vld [vmem:[#allocation10 + $0x50] ss:$12 sps:$4 sm:$0xff]   ;;  %v5046_v24 = vld [vmem:[#allocation10 + $0x60] ss:$12 sps:$4 sm:$0xff]   ;;  %v5047_v25 = vld [vmem:[#allocation10 + $0x68] ss:$12 sps:$4 sm:$0xff]   ;;  %4710 = vmatprep.mubr.msk.bf16.mxu1 %vm5719_vm0, %v5717_v4 }
 0x126   : > { %v5044_v23 = vld [vmem:[#allocation10 + $0x64] ss:$12 sps:$4 sm:$0xff]   ;;  %v5048_v26 = vld [vmem:[#allocation10 + $0x7c] ss:$12 sps:$4 sm:$0xff]   ;;  %v5051_v28 = vld [vmem:[#allocation10 + $0x80] ss:$12 sps:$4 sm:$0xff]  }
 0x127   : > { %883 = vmatpush1.bf16.msra.mxu0 %v5034_v15  ;;  %4697 = vmatpush3.bf16.msra.mxu1 %v5035_v16  ;;  %v5050_v27 = vld [vmem:[#allocation10 + $0x78] ss:$12 sps:$4 sm:$0xff]   ;;  %v5052_v29 = vld [vmem:[#allocation10 + $0x94] ss:$12 sps:$4 sm:$0xff]   ;;  %v5054_v31 = vld [vmem:[#allocation10 + $0x90] ss:$12 sps:$4 sm:$0xff]  }
 0x128   : > { %4698 = vmatprep.subr.bf16.mxu1 %v5717_v4  ;;  %884 = vmatprep.subr.bf16.mxu0 %v5036_v17  ;;  %v5055_v32 = vld [vmem:[#allocation10 + $0x98] ss:$12 sps:$4 sm:$0xff]   ;;  %v5058_v34 = vld [vmem:[#allocation10 + $0xa8] ss:$12 sps:$4 sm:$0xff]   ;;  %v5059_v35 = vld [vmem:[#allocation10 + $0xb0] ss:$12 sps:$4 sm:$0xff]  }
 0x129   : > { %v5056_v33 = vld [vmem:[#allocation10 + $0xac] ss:$12 sps:$4 sm:$0xff]   ;;  %v4300_v44 = vld [vmem:[#allocation7] ss:$0 sm:$0xff]  ;;  %v4301_v48 = vld [vmem:[#allocation8] ss:$0 sm:$0xff] }
 0x12a   : > { %v6171_v54 = vshrl.u32 %v737_v53, 7  ;;  %v735_v57 = vld [vmem:[%s6695_s5] sm:$0x7]  ;;  %vm973_vm1 = vcmask 261120   ;;  %vm1021_vm2 = vcmask 130048   ;;  %s5721_s26 = smov 64  }
 0x12b   : > { %885 = vmatpush1.bf16.msra.mxu0 %v5038_v18  ;;  %4699 = vmatpush3.bf16.msra.mxu1 %v5039_v19  ;;  %v6199_v17 = vld [vmem:[%s580_s28] ss:$0 sm:$0xff]  ;;  %s5722_s13 = smov 32   ;;  %vm1481_vm3 = vcmask 523264   ;;  %vm1484_vm4 = vcmask 785408   ;;  %s6762_s10 = sld [smem:[#allocation31_spill]] }
 0x12c   : > { %4700 = vmatprep.subr.bf16.mxu1 %v5717_v4  ;;  %886 = vmatprep.subr.bf16.mxu0 %v5040_v20  ;;  %v6174_v55 = vsub.s32 0, %v6171_v54  ;;  %v6177_v56 = vsub.s32 2, %v6171_v54  ;;  %v6183_v58 = vsub.s32 1, %v6171_v54  ;;  %s6763_s20 = sld [smem:[#allocation33_spill]]  ;;  %s6764_s11 = sld [smem:[#allocation34_spill]] }
 0x12d   : > { %s6765_s25 = sld [smem:[#allocation35_spill]]  ;;  %s6766_s14 = sld [smem:[#allocation36_spill]] }
 0x12e   : > { %v740_v59 = vrot.slane %v735_v57, %v6174_v55  ;;  %v748_v60 = vrot.slane %v735_v57, %v6177_v56  ;;  %v744_v63 = vrot.slane %v735_v57, %v6183_v58  ;;  %s4115_s18 = scalar_lea.sflag [#allocation4], %s6106_s15  ;;  %p6767_p11 = scmp.ne.s32.totalorder %s6747_s30, 0 }
 0x12f   : > { %887 = vmatpush1.bf16.msra.mxu0 %v5042_v21  ;;  %4701 = vmatpush3.bf16.msra.mxu1 %v5043_v22 }
 0x130   : > { %4702 = vmatprep.subr.bf16.mxu1 %v5717_v4  ;;  %888 = vmatprep.subr.bf16.mxu0 %v5044_v23 }
 0x133   : > { %889 = vmatpush1.bf16.msra.mxu0 %v5046_v24  ;;  %4703 = vmatpush3.bf16.msra.mxu1 %v5047_v25 }
 0x134   : > { %890 = vmatprep.subr.bf16.mxu0 %v5048_v26  ;;  %4704 = vmatprep.subr.bf16.mxu1 %v5717_v4 }
 0x137   : > { %891 = vmatpush1.bf16.msra.mxu0 %v5050_v27  ;;  %4705 = vmatpush3.bf16.msra.mxu1 %v5051_v28 }
 0x138   : > { %892 = vmatprep.subr.bf16.mxu0 %v5052_v29  ;;  %4706 = vmatprep.subr.bf16.mxu1 %v5717_v4 }
 0x13b   : > { %893 = vmatpush1.bf16.msra.mxu0 %v5054_v31  ;;  %4707 = vmatpush3.bf16.msra.mxu1 %v5055_v32 }
 0x13c   : > { %894 = vmatprep.subr.bf16.mxu0 %v5056_v33  ;;  %4708 = vmatprep.subr.bf16.mxu1 %v5717_v4 }
 0x13f   : > { %895 = vmatpush1.bf16.msra.mxu0 %v5058_v34  ;;  %4709 = vmatpush3.bf16.msra.mxu1 %v5059_v35 }
 0x140   : > { %4714 = vmatprep.subr.bf16.mxu1 %v5717_v4  ;;  %4738 = vmatprep.subr.bf16.mxu0 %v5717_v4 }
 0x1ae   : > { %v663_v7 = vpop.xlane.xlu0 %662 }
 0x1af   : > { %v667_v8 = vmul.f32 0.0078125, %v663_v7 }
 0x1b1   : > { %v6140_v9 = vsub.f32 %v658_v0, %v667_v8 }
 0x1b2   : > { %v665_v10 = vpop.xlane.xlu0 %664 }
 0x1b3   : > { %v668_v11 = vmul.f32 0.0078125, %v665_v10  ;;  %v671_v12 = vmul.f32 %v6140_v9, %v6140_v9 }
 0x1b5   : > { %v6144_v13 = vsub.f32 %v659_v1, %v668_v11  ;;  %673 = vadd.xlane.f32.xlu1 %v671_v12 }
 0x1b7   : > { %v672_v14 = vmul.f32 %v6144_v13, %v6144_v13 }
 0x1b9   : > { %675 = vadd.xlane.f32.xlu1 %v672_v14 }
 0x242   : > { %v674_v36 = vpop.xlane.xlu1 %673 }
 0x243   : > { %v677_v37 = vmul.f32 0.0078125, %v674_v36 }
 0x245   : > { %v679_v38 = vadd.f32 1e-05, %v677_v37 }
 0x246   : > { %v676_v39 = vpop.xlane.xlu1 %675 }
 0x247   : > { %5268 = vrsqrt.f32 %v679_v38  ;;  %v678_v40 = vmul.f32 0.0078125, %v676_v39 }
 0x249   : > { %v680_v41 = vadd.f32 1e-05, %v678_v40 }
 0x24b   : > { %5270 = vrsqrt.f32 %v680_v41 }
 0x251   : > { %v5269_v42 = vpop.eup %5268 }
 0x252   : > { %v683_v43 = vmul.f32 %v5269_v42, %v6140_v9 }
 0x254   : > { %v691_v47 = vmul.f32 %v4300_v44, %v683_v43 }
 0x255   : > { %v5271_v45 = vpop.eup %5270 }
 0x256   : > { %v684_v46 = vmul.f32 %v5271_v45, %v6144_v13  ;;  %v6161_v50 = vadd.f32 %v4301_v48, %v691_v47 }
 0x258   : > { %v692_v49 = vmul.f32 %v4300_v44, %v684_v46 }
 0x25a   : > { %v6163_v51 = vadd.f32 %v4301_v48, %v692_v49 }
 0x25c   : > { %v702_v52 = vpack.c.bf16 %v6163_v51, %v6161_v50 }
 0x25e   : > { %913 = vmatmul.mubr.bf16.vlgmr.msra.gmra.mrb[0].mxu0 %v702_v52  ;;  %4711 = vmatmul.mubr.bf16.vlgmr.msra.gmra.mrb[0].mxu1 %v702_v52 }
 0x25f   : > { %4716 = vmatprep.mubr.msk.bf16.mxu1 %vm5719_vm0, %v5717_v4  ;;  %4740 = vmatprep.mubr.msk.bf16.mxu0 %vm5719_vm0, %v5717_v4 }
 0x331   : > { %v914_v61 = vpop.f32.mrb[0].mxu0  ;;  %v957_v62 = vpop.f32.mrb[0].mxu1 }
 0x332   : > { %v916_v0 = vpop.f32.mrb[1].mxu0  ;;  %v4712_v1 = vpop.f32.mrb[1].mxu1  ;;  %v915_v5 = vadd.f32 %v914_v61, %v740_v59  ;;  %v958_v6 = vadd.f32 %v957_v62, %v748_v60 }
 0x333   : > { %v918_v2 = vpop.f32.mrb[2].mxu0  ;;  %v960_v3 = vpop.f32.mrb[2].mxu1  ;;  %v917_v11 = vadd.f32 %v916_v0, %v744_v63 }
 0x334   : > { %v919_v7 = vadd.f32 %v918_v2, %v740_v59  ;;  %v961_v8 = vadd.f32 %v960_v3, %v748_v60  ;;  %v920_v9 = vpop.f32.mrb[3].mxu0  ;;  %v4713_v10 = vpop.f32.mrb[3].mxu1 }
 0x335   : > { %v921_v12 = vadd.f32 %v920_v9, %v744_v63 }
 0x336   : > { %v964_v13 = vpack.c.bf16 %v919_v7, %v915_v5  ;;  %v6188_v14 = vpack.c.bf16 %v961_v8, %v958_v6 }
 0x337   : > { %v965_v15 = vpack.c.bf16 %v921_v12, %v917_v11 }
 0x339   : > { %v978_v16 = vsel %vm973_vm1, %v965_v15, 0 }
 0x33a   : > { %4715 = vmatpush3.bf16.xpose.msra.mxu1 %v978_v16 }
 0x33b   : > { %4720 = vmatprep.subr.bf16.mxu1 %v5717_v4 }
 0x341   : > { %4717 = vmatmul.mubr.msk.bf16.vlgmr.msra.gmra.mrb[4].mxu1 %vm973_vm1, %v964_v13 }
 0x342   : > { %4721 = vmatpush3.bf16.msra.mxu1 %v6188_v14  ;;  %4722 = vmatprep.mubr.msk.bf16.mxu1 %vm5719_vm0, %v5717_v4 }
 0x343   : > { %4726 = vmatprep.subr.bf16.mxu1 %v5717_v4 }
 0x414   : > { %v1014_v18 = vpop.f32.mrb[4].mxu1 }
 0x415   : > { %v1015_v19 = vadd.f32 %v6199_v17, %v1014_v18  ;;  %v4718_v20 = vpop.f32.mrb[5].mxu1 }
 0x416   : > { %v1017_v21 = vpop.f32.mrb[6].mxu1 }
 0x417   : > { %v1018_v22 = vadd.f32 %v6199_v17, %v1017_v21  ;;  %v4719_v23 = vpop.f32.mrb[7].mxu1  ;;  %v1022_v24 = vsel %vm1021_vm2, %v1015_v19, -inf }
 0x418   : > { %1023 = vmax.xlane.f32.xlu0 %v1022_v24 }
 0x419   : > { %v1025_v25 = vsel %vm1021_vm2, %v1018_v22, -inf }
 0x41a   : > { %1026 = vmax.xlane.f32.xlu1 %v1025_v25 }
 0x42b   : > { %1090 = vrot.lane.b32.xlu1 %v964_v13, %s5720_s0 }
 0x42e   : > { %1093 = vrot.lane.b32.xlu0 %v965_v15, %s5720_s0 }
 0x42f   : > { %1215 = vrot.lane.b32.xlu1 %v965_v15, %s5721_s26 }
 0x432   : > { %1336 = vrot.lane.b32.xlu0 %v965_v15, %s5722_s13 }
 0x433   : > { %1213 = vrot.lane.b32.xlu1 %v964_v13, %s5721_s26 }
 0x437   : > { %1334 = vrot.lane.b32.xlu1 %v964_v13, %s5722_s13 }
 0x4a5   : > { %v1024_v26 = vpop.xlane.xlu0 %1023 }
 0x4a6   : > { %v1028_v27 = vsub.f32 %v1015_v19, %v1024_v26 }
 0x4a7   : > { %v1027_v28 = vpop.xlane.xlu1 %1026 }
 0x4a8   : > { %v1030_v29 = vmul.f32 1.442695, %v1028_v27  ;;  %v1029_v31 = vsub.f32 %v1018_v22, %v1027_v28 }
 0x4a9   : > { %v1094_v34 = vpop.permute.xlu0 %1093 }
 0x4aa   : > { %v1032_v32 = vmul.f32 1.442695, %v1029_v31  ;;  %5272 = vpow2.f32 %v1030_v29  ;;  %v1099_v43 = vsel %vm973_vm1, %v1094_v34, 0 }
 0x4ab   : > { %v1091_v33 = vpop.permute.xlu1 %1090 }
 0x4ac   : > { %5274 = vpow2.f32 %v1032_v32 }
 0x4ad   : > { %v1337_v38 = vpop.permute.xlu0 %1336 }
 0x4ae   : > { %v1342_v42 = vsel %vm973_vm1, %v1337_v38, 0 }
 0x4af   : > { %v1216_v35 = vpop.permute.xlu1 %1215 }
 0x4b0   : > { %v1221_v36 = vsel %vm973_vm1, %v1216_v35, 0 }
 0x4b1   : > { %4739 = vmatpush3.bf16.xpose.msra.mxu0 %v1221_v36 }
 0x4b2   : > { %4750 = vmatprep.subr.bf16.mxu0 %v5717_v4 }
 0x4b3   : > { %v1214_v40 = vpop.permute.xlu1 %1213 }
 0x4b4   : > { %v6213_v37 = vpop.eup %5272 }
 0x4b6   : > { %v6215_v39 = vpop.eup %5274 }
 0x4b7   : > { %v1042_v41 = vpack.c.bf16 %v6215_v39, %v6213_v37  ;;  %v1335_v44 = vpop.permute.xlu1 %1334 }
 0x4b8   : > { %4741 = vmatmul.mubr.msk.bf16.vlgmr.msra.gmra.mrb[4].mxu0 %vm973_vm1, %v1214_v40 }
 0x4b9   : > { %4723 = vmatmul.mubr.msk.bf16.vlgmr.msra.gmra.mrb[8].mxu1 %vm1021_vm2, %v1042_v41  ;;  %4751 = vmatpush3.bf16.xpose.msra.mxu0 %v1342_v42 }
 0x4ba   : > { %4727 = vmatpush3.bf16.xpose.msra.mxu1 %v1099_v43  ;;  %4752 = vmatprep.mubr.msk.bf16.mxu0 %vm5719_vm0, %v5717_v4 }
 0x4bb   : > { %4728 = vmatprep.mubr.msk.bf16.mxu1 %vm5719_vm0, %v5717_v4  ;;  %4732 = vmatprep.subr.bf16.mxu1 %v5717_v4 }
 0x4bc   : > { %4762 = vmatprep.subr.bf16.mxu0 %v5717_v4 }
 0x4c0   : > { %4753 = vmatmul.mubr.msk.bf16.vlgmr.msra.gmra.mrb[8].mxu0 %vm973_vm1, %v1335_v44 }
 0x4c1   : > { %4729 = vmatmul.mubr.msk.bf16.vlgmr.msra.gmra.mrb[12].mxu1 %vm973_vm1, %v1091_v33  ;;  %4778 = vmatprep.mubr.msk.bf16.mxu0 %vm5719_vm0, %v5717_v4 }
 0x4c2   : > { %4734 = vmatprep.mubr.msk.bf16.mxu1 %vm5719_vm0, %v5717_v4 }
 0x58b   : > { %v1257_v45 = vpop.f32.mrb[4].mxu0 }
 0x58c   : > { %v1258_v46 = vadd.f32 %v6199_v17, %v1257_v45  ;;  %v6236_v47 = vpop.f32.mrb[8].mxu1  ;;  %v4742_v48 = vpop.f32.mrb[5].mxu0 }
 0x58d   : > { %v4724_v49 = vpop.f32.mrb[9].mxu1  ;;  %v1260_v52 = vpop.f32.mrb[6].mxu0 }
 0x58e   : > { %v1261_v53 = vadd.f32 %v6199_v17, %v1260_v52  ;;  %v6239_v57 = vpop.f32.mrb[10].mxu1  ;;  %v4743_v59 = vpop.f32.mrb[7].mxu0  ;;  %v1264_v60 = vsel %vm1021_vm2, %v1258_v46, -inf }
 0x58f   : > { %1265 = vmax.xlane.f32.xlu0 %v1264_v60  ;;  %v4725_v61 = vpop.f32.mrb[11].mxu1  ;;  %v1034_v60 = vsel %vm1021_vm2, %v6213_v37, 0.0  ;;  %v5061_v37 = vld [vmem:[#allocation11 + $0x8] sm:$0xff]  }
 0x590   : > { %v1267_v62 = vsel %vm1021_vm2, %v1261_v53, -inf  ;;  %v1037_v61 = vsel %vm1021_vm2, %v6215_v39, 0.0  ;;  %v5062_v39 = vld [vmem:[#allocation11 + $0x10] sm:$0xff]  }
 0x593   : > { %1268 = vmax.xlane.f32.xlu0 %v1267_v62  ;;  %v1378_v63 = vpop.f32.mrb[8].mxu0 }
 0x594   : > { %v1379_v0 = vadd.f32 %v6199_v17, %v1378_v63  ;;  %v1135_v1 = vpop.f32.mrb[12].mxu1  ;;  %v4754_v2 = vpop.f32.mrb[9].mxu0 }
 0x595   : > { %v4730_v3 = vpop.f32.mrb[13].mxu1  ;;  %v1381_v5 = vpop.f32.mrb[10].mxu0  ;;  %v1136_v6 = vadd.f32 %v6199_v17, %v1135_v1  ;;  %v5060_v1 = vld [vmem:[#allocation11] sm:$0xff]  }
 0x596   : > { %v1382_v7 = vadd.f32 %v6199_v17, %v1381_v5  ;;  %v1138_v8 = vpop.f32.mrb[14].mxu1  ;;  %v4755_v9 = vpop.f32.mrb[11].mxu0  ;;  %v1385_v10 = vsel %vm1021_vm2, %v1379_v0, -inf  ;;  %4763 = vmatpush3.bf16.msra.mxu0 %v5060_v1 }
 0x597   : > { %1386 = vmax.xlane.f32.xlu0 %v1385_v10  ;;  %v4731_v11 = vpop.f32.mrb[15].mxu1  ;;  %v1139_v12 = vadd.f32 %v6199_v17, %v1138_v8  ;;  %v1142_v15 = vsel %vm1021_vm2, %v1136_v6, -inf  ;;  %4764 = vmatprep.subr.bf16.mxu0 %v5717_v4  ;;  %v5064_v8 = vld [vmem:[#allocation11 + $0x20] sm:$0xff]  }
 0x598   : > { %v1388_v13 = vsel %vm1021_vm2, %v1382_v7, -inf }
 0x599   : > { %1389 = vmax.xlane.f32.xlu1 %v1388_v13  ;;  %v1145_v16 = vsel %vm1021_vm2, %v1139_v12, -inf }
 0x59a   : > { %4765 = vmatpush3.bf16.msra.mxu0 %v5061_v37 }
 0x59b   : > { %1143 = vmax.xlane.f32.xlu0 %v1142_v15  ;;  %4766 = vmatprep.subr.bf16.mxu0 %v5717_v4 }
 0x59d   : > { %1146 = vmax.xlane.f32.xlu1 %v1145_v16 }
 0x59e   : > { %4767 = vmatpush3.bf16.msra.mxu0 %v5062_v39 }
 0x59f   : > { %4768 = vmatprep.subr.bf16.mxu0 %v5717_v4 }
 0x5ae   : > { %1285 = vrot.lane.b32.xlu1 %v6188_v14, %s5721_s26 }
 0x5b1   : > { %1164 = vrot.lane.b32.xlu0 %v6188_v14, %s5720_s0 }
 0x5b2   : > { %1406 = vrot.lane.b32.xlu1 %v6188_v14, %s5722_s13 }
 0x61c   : > { %v1266_v18 = vpop.xlane.xlu0 %1265 }
 0x61d   : > { %v1270_v17 = vsub.f32 %v1258_v46, %v1266_v18 }
 0x61f   : > { %v1272_v19 = vmul.f32 1.442695, %v1270_v17  ;;  %v5065_v17 = vld [vmem:[#allocation11 + $0x28] sm:$0xff]  }
 0x620   : > { %v1269_v20 = vpop.xlane.xlu0 %1268 }
 0x621   : > { %5276 = vpow2.f32 %v1272_v19  ;;  %v1271_v21 = vsub.f32 %v1261_v53, %v1269_v20 }
 0x623   : > { %v1274_v22 = vmul.f32 1.442695, %v1271_v21 }
 0x624   : > { %v1387_v23 = vpop.xlane.xlu0 %1386 }
 0x625   : > { %5278 = vpow2.f32 %v1274_v22  ;;  %v1391_v24 = vsub.f32 %v1379_v0, %v1387_v23  ;;  %v5066_v22 = vld [vmem:[#allocation11 + $0x30] sm:$0xff]  }
 0x626   : > { %v1390_v25 = vpop.xlane.xlu1 %1389 }
 0x627   : > { %v1392_v27 = vsub.f32 %v1382_v7, %v1390_v25  ;;  %v1393_v29 = vmul.f32 1.442695, %v1391_v24  ;;  %v5063_v7 = vld [vmem:[#allocation11 + $0x18] sm:$0xff]  }
 0x628   : > { %v1144_v26 = vpop.xlane.xlu0 %1143  ;;  %4769 = vmatpush3.bf16.msra.mxu0 %v5063_v7 }
 0x629   : > { %v1148_v28 = vsub.f32 %v1136_v6, %v1144_v26  ;;  %v1395_v36 = vmul.f32 1.442695, %v1392_v27  ;;  %4770 = vmatprep.subr.bf16.mxu0 %v5717_v4 }
 0x62a   : > { %v1147_v31 = vpop.xlane.xlu1 %1146 }
 0x62b   : > { %v5277_v32 = vpop.eup %5276  ;;  %v1150_v33 = vmul.f32 1.442695, %v1148_v28  ;;  %v1149_v34 = vsub.f32 %v1139_v12, %v1147_v31 }
 0x62c   : > { %v1165_v14 = vpop.permute.xlu0 %1164  ;;  %v1276_v35 = vsel %vm1021_vm2, %v5277_v32, 0.0  ;;  %4771 = vmatpush3.bf16.msra.mxu0 %v5064_v8 }
 0x62d   : > { %5280 = vpow2.f32 %v1150_v33  ;;  %v1152_v38 = vmul.f32 1.442695, %v1149_v34  ;;  %1277 = vadd.xlane.f32.xlu0 %v1276_v35  ;;  %4733 = vmatpush3.bf16.msra.mxu1 %v1165_v14 }
 0x62e   : > { %5282 = vpow2.f32 %v1393_v29  ;;  %4744 = vmatprep.subr.bf16.mxu1 %v5717_v4  ;;  %v1286_v52 = vpop.permute.xlu1 %1285  ;;  %4772 = vmatprep.subr.bf16.mxu0 %v5717_v4 }
 0x62f   : > { %v5279_v40 = vpop.eup %5278  ;;  %5284 = vpow2.f32 %v1152_v38 }
 0x630   : > { %v1279_v41 = vsel %vm1021_vm2, %v5279_v40, 0.0  ;;  %5286 = vpow2.f32 %v1395_v36  ;;  %v1284_v62 = vpack.c.bf16 %v5279_v40, %v5277_v32  ;;  %4773 = vmatpush3.bf16.msra.mxu0 %v5065_v17  ;;  %v5067_v32 = vld [vmem:[#allocation11 + $0x38] sm:$0xff]   ;;  %v5070_v17 = vld [vmem:[#allocation13 + $0x4] ss:$16 sps:$4 sm:$0xff]  }
 0x631   : > { %1280 = vadd.xlane.f32.xlu0 %v1279_v41  ;;  %4774 = vmatprep.subr.bf16.mxu0 %v5717_v4 }
 0x632   : > { %v1407_v63 = vpop.permute.xlu1 %1406 }
 0x634   : > { %4775 = vmatpush3.bf16.msra.mxu0 %v5066_v22  ;;  %v5079_v22 = vld [vmem:[#allocation13 + $0x2c] ss:$16 sps:$4 sm:$0xff]  }
 0x635   : > { %4776 = vmatprep.subr.bf16.mxu0 %v5717_v4 }
 0x637   : > { %v5281_v42 = vpop.eup %5280 }
 0x638   : > { %v5283_v43 = vpop.eup %5282  ;;  %v1154_v44 = vsel %vm1021_vm2, %v5281_v42, 0.0  ;;  %4777 = vmatpush3.bf16.msra.mxu0 %v5067_v32  ;;  %v5082_v32 = vld [vmem:[#allocation13 + $0x44] ss:$16 sps:$4 sm:$0xff]  }
 0x639   : > { %v5285_v45 = vpop.eup %5284  ;;  %1155 = vadd.xlane.f32.xlu1 %v1154_v44  ;;  %v1397_v53 = vsel %vm1021_vm2, %v5283_v43, 0.0 }
 0x63a   : > { %v1157_v46 = vsel %vm1021_vm2, %v5285_v45, 0.0  ;;  %v1162_v48 = vpack.c.bf16 %v5285_v45, %v5281_v42  ;;  %v5287_v49 = vpop.eup %5286 }
 0x63b   : > { %1158 = vadd.xlane.f32.xlu0 %v1157_v46  ;;  %v1400_v59 = vsel %vm1021_vm2, %v5287_v49, 0.0  ;;  %v1405_v0 = vpack.c.bf16 %v5287_v49, %v5283_v43 }
 0x63c   : > { %4735 = vmatmul.mubr.msk.bf16.vlgmr.msra.gmra.mrb[16].mxu1 %vm1021_vm2, %v1162_v48 }
 0x63d   : > { %4745 = vmatpush3.bf16.msra.mxu1 %v1286_v52  ;;  %1398 = vadd.xlane.f32.xlu1 %v1397_v53 }
 0x63e   : > { %4746 = vmatprep.mubr.msk.bf16.mxu1 %vm5719_vm0, %v5717_v4  ;;  %4756 = vmatprep.subr.bf16.mxu1 %v5717_v4 }
 0x63f   : > { %1401 = vadd.xlane.f32.xlu0 %v1400_v59 }
 0x641   : > { %1035 = vadd.xlane.f32.xlu1 %v1034_v60 }
 0x643   : > { %1038 = vadd.xlane.f32.xlu0 %v1037_v61 }
 0x644   : > { %4747 = vmatmul.mubr.msk.bf16.vlgmr.msra.gmra.mrb[20].mxu1 %vm1021_vm2, %v1284_v62 }
 0x645   : > { %4757 = vmatpush3.bf16.msra.mxu1 %v1407_v63  ;;  %4758 = vmatprep.mubr.msk.bf16.mxu1 %vm5719_vm0, %v5717_v4 }
 0x646   : > { %1857 = vmatprep.subr.bf16.mxu1 %v5070_v17  ;;  %v5118_v17 = vld [vmem:[#allocation14] sm:$0xff]  }
 0x64c   : > { %4759 = vmatmul.mubr.msk.bf16.vlgmr.msra.gmra.mrb[24].mxu1 %vm1021_vm2, %v1405_v0 }
 0x64d   : > { %1889 = vmatprep.mubr.bf16.mxu1 %v5718_v30 }
 0x6ba   : > { %v1278_v2 = vpop.xlane.xlu0 %1277 }
 0x6be   : > { %v1281_v3 = vpop.xlane.xlu0 %1280 }
 0x6c6   : > { %v1156_v5 = vpop.xlane.xlu1 %1155 }
 0x6c7   : > { %5288 = vrcp.f32 %v1156_v5 }
 0x6c8   : > { %v1159_v6 = vpop.xlane.xlu0 %1158 }
 0x6c9   : > { %5290 = vrcp.f32 %v1159_v6 }
 0x6ca   : > { %5292 = vrcp.f32 %v1278_v2  ;;  %v1399_v19 = vpop.xlane.xlu1 %1398 }
 0x6cb   : > { %5294 = vrcp.f32 %v1281_v3 }
 0x6cc   : > { %v1402_v20 = vpop.xlane.xlu0 %1401  ;;  %5296 = vrcp.f32 %v1399_v19  ;;  %v5071_v19 = vld [vmem:[#allocation13 + $0x8] ss:$16 sps:$4 sm:$0xff]  }
 0x6cd   : > { %5298 = vrcp.f32 %v1402_v20  ;;  %v5073_v20 = vld [vmem:[#allocation13 + $0xc] ss:$16 sps:$4 sm:$0xff]  }
 0x6ce   : > { %v1036_v44 = vpop.xlane.xlu1 %1035  ;;  %1900 = vmatprep.subr.bf16.mxu0 %v5073_v20  ;;  %v5120_v20 = vld [vmem:[#allocation14 + $0x48] sm:$0xff]  }
 0x6cf   : > { %5300 = vrcp.f32 %v1036_v44  ;;  %v5095_v44 = vld [vmem:[#allocation13 + $0x88] ss:$16 sps:$4 sm:$0xff]  }
 0x6d0   : > { %v1039_v45 = vpop.xlane.xlu0 %1038 }
 0x6d1   : > { %v5289_v10 = vpop.eup %5288  ;;  %5302 = vrcp.f32 %v1039_v45  ;;  %v5100_v45 = vld [vmem:[#allocation13 + $0xa4] ss:$16 sps:$4 sm:$0xff]  }
 0x6d3   : > { %v5291_v12 = vpop.eup %5290 }
 0x6d4   : > { %v5293_v24 = vpop.eup %5292 }
 0x6d5   : > { %v5295_v26 = vpop.eup %5294 }
 0x6d6   : > { %v5297_v14 = vpop.eup %5296 }
 0x6d7   : > { %v5299_v36 = vpop.eup %5298 }
 0x6d9   : > { %v5301_v48 = vpop.eup %5300 }
 0x6da   : > { %v1087_v62 = vmul.f32 %v5301_v48, %v6236_v47  ;;  %v5098_v48 = vld [vmem:[#allocation13 + $0xa0] ss:$16 sps:$4 sm:$0xff]  }
 0x6db   : > { %v5303_v52 = vpop.eup %5302 }
 0x6dc   : > { %v1088_v63 = vmul.f32 %v5303_v52, %v6239_v57  ;;  %v4335_v57 = vld [vmem:[%s6697_s7] ss:$0 sm:$0xff]  ;;  %v5106_v52 = vld [vmem:[#allocation13 + $0xc4] ss:$16 sps:$4 sm:$0xff]  }
 0x70f   : > { %v1204_v9 = vpop.f32.mrb[16].mxu1 }
 0x710   : > { %v4736_v11 = vpop.f32.mrb[17].mxu1  ;;  %v1211_v15 = vmul.f32 %v5289_v10, %v1204_v9 }
 0x711   : > { %v1207_v13 = vpop.f32.mrb[18].mxu1 }
 0x712   : > { %v1212_v16 = vmul.f32 %v5291_v12, %v1207_v13  ;;  %v4737_v18 = vpop.f32.mrb[19].mxu1 }
 0x713   : > { %v5068_v18 = vld [vmem:[#allocation13] ss:$16 sps:$4 sm:$0xff]  }
 0x714   : > { %v4998_v21 = vpack.i.bf16 %v1212_v16, %v1211_v15  ;;  %1858 = vmatpush1.bf16.msra.mxu1 %v5068_v18  ;;  %v5117_v18 = vld [vmem:[#allocation14 + $0xc0] sm:$0xff]  }
 0x716   : > { %4999 = vrot.lane.b32.xlu1 %v4998_v21, %s5722_s13  ;;  %v5076_v21 = vld [vmem:[#allocation13 + $0x24] ss:$16 sps:$4 sm:$0xff]  }
 0x717   : > { %v1325_v23 = vpop.f32.mrb[20].mxu1  ;;  %1859 = vmatprep.subr.bf16.mxu1 %v5076_v21  ;;  %v5121_v21 = vld [vmem:[#allocation14 + $0xc8] sm:$0xff]  }
 0x718   : > { %v4748_v25 = vpop.f32.mrb[21].mxu1  ;;  %v1332_v28 = vmul.f32 %v5293_v24, %v1325_v23  ;;  %v5074_v23 = vld [vmem:[#allocation13 + $0x20] ss:$16 sps:$4 sm:$0xff]   ;;  %v5077_v24 = vld [vmem:[#allocation13 + $0x28] ss:$16 sps:$4 sm:$0xff]  }
 0x719   : > { %v1328_v27 = vpop.f32.mrb[22].mxu1  ;;  %1860 = vmatpush1.bf16.msra.mxu1 %v5074_v23  ;;  %v5123_v23 = vld [vmem:[#allocation14 + $0x88] sm:$0xff]  }
 0x71a   : > { %v1333_v29 = vmul.f32 %v5295_v26, %v1328_v27  ;;  %v4749_v31 = vpop.f32.mrb[23].mxu1  ;;  %1861 = vmatprep.subr.bf16.mxu1 %v5082_v32  ;;  %v5133_v32 = vld [vmem:[#allocation14 + $0xe0] sm:$0xff]  }
 0x71c   : > { %v5003_v33 = vpack.i.bf16 %v1333_v29, %v1332_v28 }
 0x71e   : > { %5004 = vrot.lane.b32.xlu0 %v5003_v33, %s5721_s26  ;;  %v5085_v33 = vld [vmem:[#allocation13 + $0x4c] ss:$16 sps:$4 sm:$0xff]  }
 0x71f   : > { %v1446_v34 = vpop.f32.mrb[24].mxu1 }
 0x720   : > { %v4760_v35 = vpop.f32.mrb[25].mxu1  ;;  %v1453_v40 = vmul.f32 %v5297_v14, %v1446_v34  ;;  %v5080_v34 = vld [vmem:[#allocation13 + $0x40] ss:$16 sps:$4 sm:$0xff]   ;;  %v5083_v14 = vld [vmem:[#allocation13 + $0x48] ss:$16 sps:$4 sm:$0xff]  }
 0x721   : > { %v1449_v38 = vpop.f32.mrb[26].mxu1  ;;  %1862 = vmatpush1.bf16.msra.mxu1 %v5080_v34  ;;  %v5088_v35 = vld [vmem:[#allocation13 + $0x64] ss:$16 sps:$4 sm:$0xff]  }
 0x722   : > { %v1454_v41 = vmul.f32 %v5299_v36, %v1449_v38  ;;  %v4761_v42 = vpop.f32.mrb[27].mxu1  ;;  %v5091_v36 = vld [vmem:[#allocation13 + $0x6c] ss:$16 sps:$4 sm:$0xff]   ;;  %v5086_v38 = vld [vmem:[#allocation13 + $0x60] ss:$16 sps:$4 sm:$0xff]   ;;  %1863 = vmatprep.subr.bf16.mxu1 %v5088_v35 }
 0x723   : > { %v5097_v42 = vld [vmem:[#allocation13 + $0x8c] ss:$16 sps:$4 sm:$0xff]   ;;  %v5135_v34 = vld [vmem:[#allocation14 + $0xa0] sm:$0xff]  }
 0x724   : > { %v5008_v43 = vpack.i.bf16 %v1454_v41, %v1453_v40  ;;  %v5089_v40 = vld [vmem:[#allocation13 + $0x68] ss:$16 sps:$4 sm:$0xff]   ;;  %v5094_v41 = vld [vmem:[#allocation13 + $0x84] ss:$16 sps:$4 sm:$0xff]  }
 0x725   : > { %1864 = vmatpush1.bf16.msra.mxu1 %v5086_v38  ;;  %v5137_v35 = vld [vmem:[#allocation14 + $0xe8] sm:$0xff]  }
 0x726   : > { %5009 = vrot.lane.b32.xlu1 %v5008_v43, %s5720_s0  ;;  %v5092_v43 = vld [vmem:[#allocation13 + $0x80] ss:$16 sps:$4 sm:$0xff]   ;;  %1865 = vmatprep.subr.bf16.mxu1 %v5094_v41  ;;  %v5139_v38 = vld [vmem:[#allocation14 + $0xa8] sm:$0xff]  }
 0x727   : > { %v5141_v41 = vld [vmem:[#allocation14 + $0xf0] sm:$0xff]  }
 0x729   : > { %1866 = vmatpush1.bf16.msra.mxu1 %v5092_v43  ;;  %v5143_v43 = vld [vmem:[#allocation14 + $0xb0] sm:$0xff]  }
 0x72a   : > { %1867 = vmatprep.subr.bf16.mxu1 %v5100_v45  ;;  %v5145_v45 = vld [vmem:[#allocation14 + $0xf8] sm:$0xff]  }
 0x72d   : > { %1868 = vmatpush1.bf16.msra.mxu1 %v5098_v48  ;;  %v5147_v48 = vld [vmem:[#allocation14 + $0xb8] sm:$0xff]  }
 0x72e   : > { %1869 = vmatprep.subr.bf16.mxu1 %v5106_v52  ;;  %v1691_v52 = vsub.s32 3, %v6171_v54 }
 0x788   : > { %v5000_v46 = vpop.permute.xlu1 %4999 }
 0x789   : > { %v5002_v53 = vunpack.i.h.bf16 %v5000_v46  ;;  %v5001_v59 = vunpack.i.l.bf16 %v5000_v46  ;;  %v5103_v46 = vld [vmem:[#allocation13 + $0xac] ss:$16 sps:$4 sm:$0xff]  }
 0x78b   : > { %v1480_v1 = vsel %vm973_vm1, %v1088_v63, %v5002_v53  ;;  %v1479_v37 = vsel %vm973_vm1, %v1087_v62, %v5001_v59  ;;  %v5109_v53 = vld [vmem:[#allocation13 + $0xcc] ss:$16 sps:$4 sm:$0xff]   ;;  %v5104_v59 = vld [vmem:[#allocation13 + $0xc0] ss:$16 sps:$4 sm:$0xff]  }
 0x78c   : > { %v5115_v62 = vld [vmem:[#allocation13 + $0xec] ss:$16 sps:$4 sm:$0xff]   ;;  %1870 = vmatpush1.bf16.msra.mxu1 %v5104_v59  ;;  %v5110_v63 = vld [vmem:[#allocation13 + $0xe0] ss:$16 sps:$4 sm:$0xff]  }
 0x790   : > { %v5005_v49 = vpop.permute.xlu0 %5004 }
 0x791   : > { %v5007_v60 = vunpack.i.h.bf16 %v5005_v49  ;;  %v5006_v61 = vunpack.i.l.bf16 %v5005_v49  ;;  %v5101_v49 = vld [vmem:[#allocation13 + $0xa8] ss:$16 sps:$4 sm:$0xff]  }
 0x793   : > { %v1483_v3 = vsel %vm1481_vm3, %v1480_v1, %v5007_v60  ;;  %v1482_v5 = vsel %vm1481_vm3, %v1479_v37, %v5006_v61  ;;  %v5107_v60 = vld [vmem:[#allocation13 + $0xc8] ss:$16 sps:$4 sm:$0xff]   ;;  %v5112_v61 = vld [vmem:[#allocation13 + $0xe4] ss:$16 sps:$4 sm:$0xff]  }
 0x794   : > { %1871 = vmatprep.subr.bf16.mxu1 %v5112_v61 }
 0x795   : > { %1872 = vmatpush1.bf16.msra.mxu1 %v5110_v63 }
 0x798   : > { %v5010_v0 = vpop.permute.xlu1 %5009 }
 0x799   : > { %v5012_v39 = vunpack.i.h.bf16 %v5010_v0  ;;  %v5011_v2 = vunpack.i.l.bf16 %v5010_v0  ;;  %v5113_v0 = vld [vmem:[#allocation13 + $0xe8] ss:$16 sps:$4 sm:$0xff]  }
 0x79b   : > { %v1486_v6 = vsel %vm1484_vm4, %v1483_v3, %v5012_v39  ;;  %v1485_v7 = vsel %vm1484_vm4, %v1482_v5, %v5011_v2 }
 0x79c   : > { %v1487_v47 = vpack.c.bf16 %v1486_v6, %v1485_v7  ;;  %v4344_v7 = vld [vmem:[%s6698_s8] ss:$0 sm:$0xff] }
 0x79e   : > { %4779 = vmatmul.mubr.bf16.vlgmr.msra.gmra.mrb[12].mxu0 %v1487_v47 }
 0x79f   : > { %1932 = vmatprep.mubr.bf16.mxu0 %v5718_v30  ;;  %1901 = vmatpush1.bf16.msra.mxu0 %v5071_v19  ;;  %v5119_v19 = vld [vmem:[#allocation14 + $0x80] sm:$0xff]  }
 0x7a0   : > { %1902 = vmatprep.subr.bf16.mxu0 %v5079_v22  ;;  %v5122_v22 = vld [vmem:[#allocation14 + $0x8] sm:$0xff]  }
 0x7a3   : > { %1903 = vmatpush1.bf16.msra.mxu0 %v5077_v24  ;;  %v5124_v24 = vld [vmem:[#allocation14 + $0x50] sm:$0xff]  }
 0x7a4   : > { %1904 = vmatprep.subr.bf16.mxu0 %v5085_v33  ;;  %v5134_v33 = vld [vmem:[#allocation14 + $0x20] sm:$0xff]  }
 0x7a7   : > { %1905 = vmatpush1.bf16.msra.mxu0 %v5083_v14  ;;  %v5136_v14 = vld [vmem:[#allocation14 + $0x68] sm:$0xff]  }
 0x7a8   : > { %1906 = vmatprep.subr.bf16.mxu0 %v5091_v36  ;;  %v5138_v36 = vld [vmem:[#allocation14 + $0x28] sm:$0xff]  }
 0x7ab   : > { %1907 = vmatpush1.bf16.msra.mxu0 %v5089_v40  ;;  %v5140_v40 = vld [vmem:[#allocation14 + $0x70] sm:$0xff]  }
 0x7ac   : > { %1908 = vmatprep.subr.bf16.mxu0 %v5097_v42  ;;  %v5142_v42 = vld [vmem:[#allocation14 + $0x30] sm:$0xff]  }
 0x7af   : > { %1909 = vmatpush1.bf16.msra.mxu0 %v5095_v44  ;;  %v5144_v44 = vld [vmem:[#allocation14 + $0x78] sm:$0xff]  }
 0x7b0   : > { %1910 = vmatprep.subr.bf16.mxu0 %v5103_v46  ;;  %v5146_v46 = vld [vmem:[#allocation14 + $0x38] sm:$0xff]  }
 0x7b3   : > { %1911 = vmatpush1.bf16.msra.mxu0 %v5101_v49  ;;  %v1675_v49 = vld [vmem:[%s6762_s10] sm:$0xf] }
 0x7b4   : > { %1912 = vmatprep.subr.bf16.mxu0 %v5109_v53  ;;  %v1680_v53 = vrot.slane %v1675_v49, %v6174_v55  ;;  %v1688_v59 = vrot.slane %v1675_v49, %v6177_v56  ;;  %v1692_v61 = vrot.slane %v1675_v49, %v1691_v52 }
 0x7b7   : > { %1913 = vmatpush1.bf16.msra.mxu0 %v5107_v60  ;;  %v1684_v60 = vrot.slane %v1675_v49, %v6183_v58 }
 0x7b8   : > { %1914 = vmatprep.subr.bf16.mxu0 %v5115_v62 }
 0x7bb   : > { %1915 = vmatpush1.bf16.msra.mxu0 %v5113_v0 }
 0x7bc   : > { %4594 = vmatprep.subr.bf16.mxu0 %v5117_v18 }
 0x871   : > { %v1593_v8 = vpop.f32.mrb[12].mxu0 }
 0x872   : > { %v1594_v9 = vadd.f32 %v4335_v57, %v1593_v8  ;;  %v4780_v10 = vpop.f32.mrb[13].mxu0 }
 0x873   : > { %v1596_v11 = vpop.f32.mrb[14].mxu0  ;;  %v4345_v10 = vld [vmem:[%s6699_s9] ss:$0 sm:$0xff] }
 0x874   : > { %v1597_v12 = vadd.f32 %v4335_v57, %v1596_v11  ;;  %v4781_v13 = vpop.f32.mrb[15].mxu0  ;;  %v1600_v15 = vadd.f32 %v1594_v9, %v6161_v50 }
 0x876   : > { %1604 = vadd.xlane.f32.xlu1 %v1600_v15  ;;  %v1601_v16 = vadd.f32 %v1597_v12, %v6163_v51 }
 0x878   : > { %1606 = vadd.xlane.f32.xlu0 %v1601_v16 }
 0x903   : > { %v1605_v50 = vpop.xlane.xlu1 %1604 }
 0x904   : > { %v1608_v25 = vmul.f32 0.0078125, %v1605_v50  ;;  %v5125_v50 = vld [vmem:[#allocation14 + $0xd0] sm:$0xff]  }
 0x905   : > { %v1607_v51 = vpop.xlane.xlu0 %1606 }
 0x906   : > { %v6301_v26 = vsub.f32 %v1600_v15, %v1608_v25  ;;  %v1609_v27 = vmul.f32 0.0078125, %v1607_v51  ;;  %v5126_v25 = vld [vmem:[#allocation14 + $0x10] sm:$0xff]  }
 0x907   : > { %v5127_v51 = vld [vmem:[#allocation14 + $0x90] sm:$0xff]  }
 0x908   : > { %v6303_v28 = vsub.f32 %v1601_v16, %v1609_v27  ;;  %v1612_v29 = vmul.f32 %v6301_v26, %v6301_v26  ;;  %v5116_v16 = vld [vmem:[#allocation14 + $0x40] sm:$0xff]   ;;  %v5129_v27 = vld [vmem:[#allocation14 + $0xd8] sm:$0xff]  }
 0x909   : > { %4572 = vmatprep.subr.bf16.mxu1 %v5116_v16 }
 0x90a   : > { %1614 = vadd.xlane.f32.xlu0 %v1612_v29  ;;  %v1613_v31 = vmul.f32 %v6303_v28, %v6303_v28  ;;  %v5131_v29 = vld [vmem:[#allocation14 + $0x98] sm:$0xff]  }
 0x90c   : > { %1616 = vadd.xlane.f32.xlu1 %v1613_v31  ;;  %v5132_v31 = vld [vmem:[#allocation14 + $0x60] sm:$0xff]  }
 0x997   : > { %v1615_v1 = vpop.xlane.xlu0 %1614 }
 0x998   : > { %v1618_v37 = vmul.f32 0.0078125, %v1615_v1 }
 0x999   : > { %v1617_v39 = vpop.xlane.xlu1 %1616 }
 0x99a   : > { %v1620_v2 = vadd.f32 1e-05, %v1618_v37  ;;  %v1619_v3 = vmul.f32 0.0078125, %v1617_v39 }
 0x99c   : > { %5304 = vrsqrt.f32 %v1620_v2  ;;  %v1621_v5 = vadd.f32 1e-05, %v1619_v3 }
 0x99e   : > { %5306 = vrsqrt.f32 %v1621_v5 }
 0x9a6   : > { %v5305_v6 = vpop.eup %5304 }
 0x9a7   : > { %v1624_v47 = vmul.f32 %v5305_v6, %v6301_v26  ;;  %v5128_v26 = vld [vmem:[#allocation14 + $0x58] sm:$0xff]  }
 0x9a8   : > { %v5307_v57 = vpop.eup %5306 }
 0x9a9   : > { %v1625_v8 = vmul.f32 %v5307_v57, %v6303_v28  ;;  %v1632_v9 = vmul.f32 %v4344_v7, %v1624_v47  ;;  %v5130_v28 = vld [vmem:[#allocation14 + $0x18] sm:$0xff]  }
 0x9ab   : > { %v1633_v11 = vmul.f32 %v4344_v7, %v1625_v8  ;;  %v6317_v12 = vadd.f32 %v4345_v10, %v1632_v9 }
 0x9ad   : > { %v6319_v13 = vadd.f32 %v4345_v10, %v1633_v11 }
 0x9af   : > { %v1642_v15 = vpack.c.bf16 %v6319_v13, %v6317_v12 }
 0x9b1   : > { %1890 = vmatmul.mubr.bf16.vlgmr.msra.gmra.mrb[28].mxu1 %v1642_v15  ;;  %1933 = vmatmul.mubr.bf16.vlgmr.msra.gmra.mrb[16].mxu0 %v1642_v15 }
 0x9b2   : > { %4573 = vmatpush3.bf16.msra.mxu1 %v5118_v17  ;;  %4595 = vmatpush3.bf16.msra.mxu0 %v5119_v19 }
 0x9b3   : > { %4574 = vmatprep.subr.bf16.mxu1 %v5120_v20  ;;  %4596 = vmatprep.subr.bf16.mxu0 %v5121_v21 }
 0x9b6   : > { %4575 = vmatpush3.bf16.msra.mxu1 %v5122_v22  ;;  %4597 = vmatpush3.bf16.msra.mxu0 %v5123_v23 }
 0x9b7   : > { %4576 = vmatprep.subr.bf16.mxu1 %v5124_v24  ;;  %4598 = vmatprep.subr.bf16.mxu0 %v5125_v50 }
 0x9ba   : > { %4577 = vmatpush3.bf16.msra.mxu1 %v5126_v25  ;;  %4599 = vmatpush3.bf16.msra.mxu0 %v5127_v51 }
 0x9bb   : > { %4578 = vmatprep.subr.bf16.mxu1 %v5128_v26  ;;  %4600 = vmatprep.subr.bf16.mxu0 %v5129_v27 }
 0x9be   : > { %4579 = vmatpush3.bf16.msra.mxu1 %v5130_v28  ;;  %4601 = vmatpush3.bf16.msra.mxu0 %v5131_v29 }
 0x9bf   : > { %4580 = vmatprep.subr.bf16.mxu1 %v5132_v31  ;;  %4602 = vmatprep.subr.bf16.mxu0 %v5133_v32 }
 0x9c2   : > { %4581 = vmatpush3.bf16.msra.mxu1 %v5134_v33  ;;  %4603 = vmatpush3.bf16.msra.mxu0 %v5135_v34 }
 0x9c3   : > { %4582 = vmatprep.subr.bf16.mxu1 %v5136_v14  ;;  %4604 = vmatprep.subr.bf16.mxu0 %v5137_v35 }
 0x9c6   : > { %4583 = vmatpush3.bf16.msra.mxu1 %v5138_v36  ;;  %4605 = vmatpush3.bf16.msra.mxu0 %v5139_v38 }
 0x9c7   : > { %4584 = vmatprep.subr.bf16.mxu1 %v5140_v40  ;;  %4606 = vmatprep.subr.bf16.mxu0 %v5141_v41 }
 0x9ca   : > { %4585 = vmatpush3.bf16.msra.mxu1 %v5142_v42  ;;  %4607 = vmatpush3.bf16.msra.mxu0 %v5143_v43 }
 0x9cb   : > { %4586 = vmatprep.subr.bf16.mxu1 %v5144_v44  ;;  %4608 = vmatprep.subr.bf16.mxu0 %v5145_v45 }
 0x9ce   : > { %4587 = vmatpush3.bf16.msra.mxu1 %v5146_v46  ;;  %4609 = vmatpush3.bf16.msra.mxu0 %v5147_v48 }
 0x9cf   : > { %4782 = vmatprep.subr.bf16.mxu0 %v5717_v4 }
 0xa84   : > { %v1891_v62 = vpop.f32.mrb[28].mxu1  ;;  %v1934_v63 = vpop.f32.mrb[16].mxu0 }
 0xa85   : > { %v6333_v0 = vadd.f32 %v1891_v62, %v1680_v53  ;;  %v6335_v1 = vadd.f32 %v1934_v63, %v1688_v59  ;;  %v1893_v37 = vpop.f32.mrb[29].mxu1  ;;  %v1936_v39 = vpop.f32.mrb[17].mxu0 }
 0xa86   : > { %v6337_v2 = vadd.f32 %v1893_v37, %v1684_v60  ;;  %v6339_v3 = vadd.f32 %v1936_v39, %v1692_v61  ;;  %v1895_v5 = vpop.f32.mrb[30].mxu1  ;;  %v1938_v6 = vpop.f32.mrb[18].mxu0 }
 0xa87   : > { %v1943_v7 = vmul.f32 %v6333_v0, %v6333_v0  ;;  %v1945_v47 = vmul.f32 %v6335_v1, %v6335_v1  ;;  %v6345_v57 = vadd.f32 %v1895_v5, %v1680_v53  ;;  %v6347_v8 = vadd.f32 %v1938_v6, %v1688_v59  ;;  %v1897_v9 = vpop.f32.mrb[31].mxu1  ;;  %v1940_v10 = vpop.f32.mrb[19].mxu0 }
 0xa88   : > { %v1944_v11 = vmul.f32 %v6337_v2, %v6337_v2  ;;  %v1946_v15 = vmul.f32 %v6339_v3, %v6339_v3  ;;  %v6353_v16 = vadd.f32 %v1897_v9, %v1684_v60  ;;  %v6355_v18 = vadd.f32 %v1940_v10, %v1692_v61 }
 0xa89   : > { %v1951_v17 = vmul.f32 %v1943_v7, %v6333_v0  ;;  %v1953_v19 = vmul.f32 %v1945_v47, %v6335_v1  ;;  %v1947_v20 = vmul.f32 %v6345_v57, %v6345_v57  ;;  %v1949_v21 = vmul.f32 %v6347_v8, %v6347_v8 }
 0xa8a   : > { %v1952_v22 = vmul.f32 %v1944_v11, %v6337_v2  ;;  %v1954_v23 = vmul.f32 %v1946_v15, %v6339_v3  ;;  %v1948_v24 = vmul.f32 %v6353_v16, %v6353_v16  ;;  %v1950_v50 = vmul.f32 %v6355_v18, %v6355_v18 }
 0xa8b   : > { %v1959_v25 = vmul.f32 0.044715, %v1951_v17  ;;  %v1961_v51 = vmul.f32 0.044715, %v1953_v19  ;;  %v1955_v26 = vmul.f32 %v1947_v20, %v6345_v57  ;;  %v1957_v27 = vmul.f32 %v1949_v21, %v6347_v8 }
 0xa8c   : > { %v1960_v28 = vmul.f32 0.044715, %v1952_v22  ;;  %v1962_v29 = vmul.f32 0.044715, %v1954_v23  ;;  %v1956_v31 = vmul.f32 %v1948_v24, %v6353_v16  ;;  %v1958_v32 = vmul.f32 %v1950_v50, %v6355_v18 }
 0xa8d   : > { %v1967_v33 = vadd.f32 %v1959_v25, %v6333_v0  ;;  %v1969_v34 = vadd.f32 %v1961_v51, %v6335_v1  ;;  %v1963_v14 = vmul.f32 0.044715, %v1955_v26  ;;  %v1965_v35 = vmul.f32 0.044715, %v1957_v27 }
 0xa8e   : > { %v1968_v36 = vadd.f32 %v1960_v28, %v6337_v2  ;;  %v1970_v38 = vadd.f32 %v1962_v29, %v6339_v3  ;;  %v1964_v40 = vmul.f32 0.044715, %v1956_v31  ;;  %v1966_v41 = vmul.f32 0.044715, %v1958_v32 }
 0xa8f   : > { %v1975_v42 = vmul.f32 0.7978846, %v1967_v33  ;;  %v1977_v43 = vmul.f32 0.7978846, %v1969_v34  ;;  %v1971_v44 = vadd.f32 %v1963_v14, %v6345_v57  ;;  %v1973_v45 = vadd.f32 %v1965_v35, %v6347_v8 }
 0xa90   : > { %v1976_v46 = vmul.f32 0.7978846, %v1968_v36  ;;  %v1978_v48 = vmul.f32 0.7978846, %v1970_v38  ;;  %v1972_v49 = vadd.f32 %v1964_v40, %v6353_v16  ;;  %v1974_v53 = vadd.f32 %v1966_v41, %v6355_v18 }
 0xa91   : > { %5308 = vtanh.f32 %v1975_v42  ;;  %v1979_v59 = vmul.f32 0.7978846, %v1971_v44  ;;  %v1981_v60 = vmul.f32 0.7978846, %v1973_v45 }
 0xa92   : > { %5310 = vtanh.f32 %v1977_v43  ;;  %v1980_v61 = vmul.f32 0.7978846, %v1972_v49  ;;  %v1982_v62 = vmul.f32 0.7978846, %v1974_v53 }
 0xa93   : > { %5312 = vtanh.f32 %v1976_v46 }
 0xa94   : > { %5314 = vtanh.f32 %v1978_v48 }
 0xa95   : > { %5316 = vtanh.f32 %v1979_v59 }
 0xa96   : > { %5318 = vtanh.f32 %v1981_v60 }
 0xa97   : > { %5320 = vtanh.f32 %v1980_v61 }
 0xa98   : > { %5322 = vtanh.f32 %v1982_v62 }
 0xa9b   : > { %v5309_v63 = vpop.eup %5308 }
 0xa9c   : > { %v5311_v37 = vpop.eup %5310  ;;  %v1991_v39 = vadd.f32 1.0, %v5309_v63  ;;  %v5148_v63 = vld [vmem:[#allocation10 + $0xc0] ss:$12 sps:$4 sm:$0xff]  }
 0xa9d   : > { %v5313_v5 = vpop.eup %5312  ;;  %v1993_v6 = vadd.f32 1.0, %v5311_v37  ;;  %v5150_v37 = vld [vmem:[#allocation10 + $0xc4] ss:$12 sps:$4 sm:$0xff]  }
 0xa9e   : > { %v5315_v7 = vpop.eup %5314  ;;  %v1992_v47 = vadd.f32 1.0, %v5313_v5  ;;  %v1999_v15 = vmul.f32 0.5, %v1991_v39  ;;  %v5151_v39 = vld [vmem:[#allocation10 + $0xc8] ss:$12 sps:$4 sm:$0xff]   ;;  %2586 = vmatprep.subr.bf16.mxu1 %v5150_v37 }
 0xa9f   : > { %v5317_v9 = vpop.eup %5316  ;;  %v1994_v10 = vadd.f32 1.0, %v5315_v7  ;;  %v2001_v20 = vmul.f32 0.5, %v1993_v6  ;;  %v5154_v5 = vld [vmem:[#allocation10 + $0xdc] ss:$12 sps:$4 sm:$0xff]   ;;  %v5155_v6 = vld [vmem:[#allocation10 + $0xe0] ss:$12 sps:$4 sm:$0xff]  }
 0xaa0   : > { %v5319_v11 = vpop.eup %5318  ;;  %v1995_v17 = vadd.f32 1.0, %v5317_v9  ;;  %v2000_v50 = vmul.f32 0.5, %v1992_v47  ;;  %v2007_v27 = vmul.f32 %v1999_v15, %v6333_v0  ;;  %v5152_v7 = vld [vmem:[#allocation10 + $0xd8] ss:$12 sps:$4 sm:$0xff]  }
 0xaa1   : > { %v5321_v19 = vpop.eup %5320  ;;  %v1997_v21 = vadd.f32 1.0, %v5319_v11  ;;  %v2002_v26 = vmul.f32 0.5, %v1994_v10  ;;  %v2009_v31 = vmul.f32 %v2001_v20, %v6335_v1  ;;  %v5156_v20 = vld [vmem:[#allocation10 + $0xf0] ss:$12 sps:$4 sm:$0xff]  }
 0xaa2   : > { %v5323_v22 = vpop.eup %5322  ;;  %v2003_v23 = vmul.f32 0.5, %v1995_v17  ;;  %v1996_v24 = vadd.f32 1.0, %v5321_v19  ;;  %v2008_v34 = vmul.f32 %v2000_v50, %v6337_v2  ;;  %v5158_v19 = vld [vmem:[#allocation10 + $0xf4] ss:$12 sps:$4 sm:$0xff]   ;;  %v5166_v50 = vld [vmem:[#allocation10 + $0x124] ss:$12 sps:$4 sm:$0xff]  }
 0xaa3   : > { %v2005_v25 = vmul.f32 0.5, %v1997_v21  ;;  %v1998_v51 = vadd.f32 1.0, %v5323_v22  ;;  %v2010_v36 = vmul.f32 %v2002_v26, %v6339_v3  ;;  %v4378_v3 = vld [vmem:[%s6763_s20] ss:$0 sm:$0xff]  ;;  %v5170_v26 = vld [vmem:[#allocation10 + $0x13c] ss:$12 sps:$4 sm:$0xff]  }
 0xaa4   : > { %v2011_v28 = vmul.f32 %v2003_v23, %v6345_v57  ;;  %v2004_v29 = vmul.f32 0.5, %v1996_v24  ;;  %v5159_v21 = vld [vmem:[#allocation10 + $0xf8] ss:$12 sps:$4 sm:$0xff]   ;;  %v5160_v23 = vld [vmem:[#allocation10 + $0x108] ss:$12 sps:$4 sm:$0xff]  }
 0xaa5   : > { %v2013_v32 = vmul.f32 %v2005_v25, %v6347_v8  ;;  %v2006_v33 = vmul.f32 0.5, %v1998_v51  ;;  %v5162_v22 = vld [vmem:[#allocation10 + $0x10c] ss:$12 sps:$4 sm:$0xff]   ;;  %v5163_v24 = vld [vmem:[#allocation10 + $0x110] ss:$12 sps:$4 sm:$0xff]  }
 0xaa6   : > { %v2012_v14 = vmul.f32 %v2004_v29, %v6353_v16  ;;  %v2015_v35 = vpack.c.bf16 %v2011_v28, %v2007_v27  ;;  %v5164_v25 = vld [vmem:[#allocation10 + $0x120] ss:$12 sps:$4 sm:$0xff]   ;;  %v5167_v51 = vld [vmem:[#allocation10 + $0x128] ss:$12 sps:$4 sm:$0xff]   ;;  %v5168_v27 = vld [vmem:[#allocation10 + $0x138] ss:$12 sps:$4 sm:$0xff]  }
 0xaa7   : > { %v2014_v38 = vmul.f32 %v2006_v33, %v6355_v18  ;;  %v2017_v40 = vpack.c.bf16 %v2013_v32, %v2009_v31  ;;  %v5171_v28 = vld [vmem:[#allocation10 + $0x140] ss:$12 sps:$4 sm:$0xff]   ;;  %v5172_v31 = vld [vmem:[#allocation10 + $0x150] ss:$12 sps:$4 sm:$0xff]   ;;  %v5175_v32 = vld [vmem:[#allocation10 + $0x158] ss:$12 sps:$4 sm:$0xff]  }
 0xaa8   : > { %v2016_v41 = vpack.c.bf16 %v2012_v14, %v2008_v34  ;;  %v5174_v29 = vld [vmem:[#allocation10 + $0x154] ss:$12 sps:$4 sm:$0xff]   ;;  %v5178_v33 = vld [vmem:[#allocation10 + $0x16c] ss:$12 sps:$4 sm:$0xff]   ;;  %v5179_v14 = vld [vmem:[#allocation10 + $0x170] ss:$12 sps:$4 sm:$0xff]  }
 0xaa9   : > { %v2018_v0 = vpack.c.bf16 %v2014_v38, %v2010_v36  ;;  %v5176_v34 = vld [vmem:[#allocation10 + $0x168] ss:$12 sps:$4 sm:$0xff]  }
 0xaaa   : > { %2314 = vmatprep.mubr.bf16.mxu1 %v2016_v41 }
 0xaab   : > { %2355 = vmatprep.mubr.bf16.mxu0 %v2018_v0  ;;  %2315 = vmatmul.mubr.bf16.vlgmr.msra.gmra.mrb[32].mxu1 %v2015_v35 }
 0xaac   : > { %2356 = vmatmul.mubr.bf16.vlgmr.msra.gmra.mrb[20].mxu0 %v2017_v40  ;;  %2618 = vmatprep.mubr.bf16.mxu1 %v5718_v30 }
 0xaad   : > { %4798 = vmatprep.mubr.msk.bf16.mxu0 %vm5719_vm0, %v5717_v4  ;;  %4783 = vmatpush3.bf16.msra.mxu0 %v5151_v39 }
 0xaae   : > { %2587 = vmatpush1.bf16.msra.mxu1 %v5148_v63  ;;  %4784 = vmatprep.subr.bf16.mxu0 %v5717_v4 }
 0xaaf   : > { %2588 = vmatprep.subr.bf16.mxu1 %v5154_v5 }
 0xab1   : > { %4785 = vmatpush3.bf16.msra.mxu0 %v5155_v6 }
 0xab2   : > { %2589 = vmatpush1.bf16.msra.mxu1 %v5152_v7  ;;  %4786 = vmatprep.subr.bf16.mxu0 %v5717_v4 }
 0xab3   : > { %2590 = vmatprep.subr.bf16.mxu1 %v5158_v19 }
 0xab5   : > { %4787 = vmatpush3.bf16.msra.mxu0 %v5159_v21 }
 0xab6   : > { %2591 = vmatpush1.bf16.msra.mxu1 %v5156_v20  ;;  %4788 = vmatprep.subr.bf16.mxu0 %v5717_v4  ;;  %v6439_v20 = vld [vmem:[%s580_s28] ss:$0 sm:$0xff] }
 0xab7   : > { %2592 = vmatprep.subr.bf16.mxu1 %v5162_v22 }
 0xab9   : > { %4789 = vmatpush3.bf16.msra.mxu0 %v5163_v24 }
 0xaba   : > { %2593 = vmatpush1.bf16.msra.mxu1 %v5160_v23  ;;  %4790 = vmatprep.subr.bf16.mxu0 %v5717_v4 }
 0xabb   : > { %2594 = vmatprep.subr.bf16.mxu1 %v5166_v50 }
 0xabd   : > { %4791 = vmatpush3.bf16.msra.mxu0 %v5167_v51 }
 0xabe   : > { %2595 = vmatpush1.bf16.msra.mxu1 %v5164_v25  ;;  %4792 = vmatprep.subr.bf16.mxu0 %v5717_v4 }
 0xabf   : > { %2596 = vmatprep.subr.bf16.mxu1 %v5170_v26 }
 0xac1   : > { %4793 = vmatpush3.bf16.msra.mxu0 %v5171_v28 }
 0xac2   : > { %2597 = vmatpush1.bf16.msra.mxu1 %v5168_v27  ;;  %4794 = vmatprep.subr.bf16.mxu0 %v5717_v4 }
 0xac3   : > { %2598 = vmatprep.subr.bf16.mxu1 %v5174_v29 }
 0xac5   : > { %4795 = vmatpush3.bf16.msra.mxu0 %v5175_v32 }
 0xac6   : > { %2599 = vmatpush1.bf16.msra.mxu1 %v5172_v31  ;;  %4796 = vmatprep.subr.bf16.mxu0 %v5717_v4 }
 0xac7   : > { %2600 = vmatprep.subr.bf16.mxu1 %v5178_v33 }
 0xac9   : > { %4797 = vmatpush3.bf16.msra.mxu0 %v5179_v14 }
 0xaca   : > { %2601 = vmatpush1.bf16.msra.mxu1 %v5176_v34  ;;  %4826 = vmatprep.subr.bf16.mxu0 %v5717_v4 }
 0xacb   : > { %4802 = vmatprep.subr.bf16.mxu1 %v5717_v4 }
 0xb7e   : > { %v4588_v1 = vpop.f32.mrb[32].mxu1 }
 0xb7f   : > { %v4610_v2 = vpop.f32.mrb[20].mxu0  ;;  %v4589_v57 = vpop.f32.mrb[33].mxu1 }
 0xb80   : > { %v4590_v8 = vadd.f32 %v4589_v57, %v4588_v1  ;;  %v4611_v16 = vpop.f32.mrb[21].mxu0  ;;  %v4591_v18 = vpop.f32.mrb[34].mxu1 }
 0xb81   : > { %v4612_v42 = vadd.f32 %v4611_v16, %v4610_v2  ;;  %v4613_v43 = vpop.f32.mrb[22].mxu0  ;;  %v4592_v44 = vpop.f32.mrb[35].mxu1  ;;  %v4411_v2 = vld [vmem:[%s6764_s11] ss:$0 sm:$0xff] }
 0xb82   : > { %v2317_v45 = vadd.f32 %v4590_v8, %v4378_v3  ;;  %v4593_v46 = vadd.f32 %v4592_v44, %v4591_v18  ;;  %v4614_v48 = vpop.f32.mrb[23].mxu0  ;;  %v4412_v18 = vld [vmem:[%s6765_s25] ss:$0 sm:$0xff] }
 0xb83   : > { %v4615_v49 = vadd.f32 %v4614_v48, %v4613_v43 }
 0xb84   : > { %v2358_v53 = vadd.f32 %v4612_v42, %v2317_v45  ;;  %v2320_v59 = vadd.f32 %v4593_v46, %v4378_v3  ;;  %v4413_v46 = vld [vmem:[%s6695_s5 + $0x3] sm:$0x7] }
 0xb85   : > { %v2446_v48 = vrot.slane %v4413_v46, %v6174_v55 }
 0xb86   : > { %v2361_v60 = vadd.f32 %v4615_v49, %v2320_v59  ;;  %v2364_v61 = vadd.f32 %v2358_v53, %v6317_v12  ;;  %v2454_v49 = vrot.slane %v4413_v46, %v6177_v56 }
 0xb88   : > { %2368 = vadd.xlane.f32.xlu0 %v2364_v61  ;;  %v2365_v62 = vadd.f32 %v2361_v60, %v6319_v13  ;;  %v2450_v60 = vrot.slane %v4413_v46, %v6183_v58 }
 0xb8a   : > { %2370 = vadd.xlane.f32.xlu1 %v2365_v62 }
 0xc15   : > { %v2369_v12 = vpop.xlane.xlu0 %2368 }
 0xc16   : > { %v2372_v47 = vmul.f32 0.0078125, %v2369_v12 }
 0xc17   : > { %v2371_v13 = vpop.xlane.xlu1 %2370 }
 0xc18   : > { %v2374_v9 = vsub.f32 %v2364_v61, %v2372_v47  ;;  %v2373_v10 = vmul.f32 0.0078125, %v2371_v13 }
 0xc1a   : > { %v2375_v11 = vsub.f32 %v2365_v62, %v2373_v10  ;;  %v2376_v15 = vmul.f32 %v2374_v9, %v2374_v9 }
 0xc1c   : > { %2378 = vadd.xlane.f32.xlu0 %v2376_v15  ;;  %v2377_v17 = vmul.f32 %v2375_v11, %v2375_v11 }
 0xc1e   : > { %2380 = vadd.xlane.f32.xlu1 %v2377_v17 }
 0xca9   : > { %v2379_v35 = vpop.xlane.xlu0 %2378 }
 0xcaa   : > { %v2382_v36 = vmul.f32 0.0078125, %v2379_v35 }
 0xcab   : > { %v2381_v38 = vpop.xlane.xlu1 %2380 }
 0xcac   : > { %v2384_v40 = vadd.f32 1e-05, %v2382_v36  ;;  %v2383_v41 = vmul.f32 0.0078125, %v2381_v38 }
 0xcae   : > { %5324 = vrsqrt.f32 %v2384_v40  ;;  %v2385_v0 = vadd.f32 1e-05, %v2383_v41 }
 0xcb0   : > { %5326 = vrsqrt.f32 %v2385_v0 }
 0xcb8   : > { %v5325_v1 = vpop.eup %5324 }
 0xcb9   : > { %v2388_v3 = vmul.f32 %v5325_v1, %v2374_v9 }
 0xcba   : > { %v5327_v57 = vpop.eup %5326 }
 0xcbb   : > { %v2389_v8 = vmul.f32 %v5327_v57, %v2375_v11  ;;  %v2396_v16 = vmul.f32 %v4411_v2, %v2388_v3 }
 0xcbd   : > { %v2397_v42 = vmul.f32 %v4411_v2, %v2389_v8  ;;  %v6412_v43 = vadd.f32 %v4412_v18, %v2396_v16 }
 0xcbf   : > { %v6414_v44 = vadd.f32 %v4412_v18, %v2397_v42 }
 0xcc1   : > { %v2406_v45 = vpack.c.bf16 %v6414_v44, %v6412_v43 }
 0xcc3   : > { %2619 = vmatmul.mubr.bf16.vlgmr.msra.gmra.mrb[36].mxu1 %v2406_v45  ;;  %4799 = vmatmul.mubr.bf16.vlgmr.msra.gmra.mrb[24].mxu0 %v2406_v45 }
 0xcc4   : > { %4804 = vmatprep.mubr.msk.bf16.mxu1 %vm5719_vm0, %v5717_v4  ;;  %4828 = vmatprep.mubr.msk.bf16.mxu0 %vm5719_vm0, %v5717_v4 }
 0xd96   : > { %v2620_v53 = vpop.f32.mrb[36].mxu1  ;;  %v2663_v59 = vpop.f32.mrb[24].mxu0 }
 0xd97   : > { %v2622_v61 = vpop.f32.mrb[37].mxu1  ;;  %v4800_v62 = vpop.f32.mrb[25].mxu0  ;;  %v2621_v39 = vadd.f32 %v2620_v53, %v2446_v48  ;;  %v2664_v5 = vadd.f32 %v2663_v59, %v2454_v49 }
 0xd98   : > { %v2624_v63 = vpop.f32.mrb[38].mxu1  ;;  %v2666_v37 = vpop.f32.mrb[26].mxu0  ;;  %v2623_v13 = vadd.f32 %v2622_v61, %v2450_v60 }
 0xd99   : > { %v2625_v6 = vadd.f32 %v2624_v63, %v2446_v48  ;;  %v2667_v7 = vadd.f32 %v2666_v37, %v2454_v49  ;;  %v2626_v12 = vpop.f32.mrb[39].mxu1  ;;  %v4801_v47 = vpop.f32.mrb[27].mxu0 }
 0xd9a   : > { %v2627_v9 = vadd.f32 %v2626_v12, %v2450_v60 }
 0xd9b   : > { %v2670_v10 = vpack.c.bf16 %v2625_v6, %v2621_v39  ;;  %v6428_v11 = vpack.c.bf16 %v2667_v7, %v2664_v5 }
 0xd9c   : > { %v2671_v15 = vpack.c.bf16 %v2627_v9, %v2623_v13 }
 0xd9e   : > { %v2677_v17 = vsel %vm973_vm1, %v2671_v15, 0 }
 0xd9f   : > { %4803 = vmatpush3.bf16.xpose.msra.mxu1 %v2677_v17 }
 0xda0   : > { %4808 = vmatprep.subr.bf16.mxu1 %v5717_v4 }
 0xda6   : > { %4805 = vmatmul.mubr.msk.bf16.vlgmr.msra.gmra.mrb[40].mxu1 %vm973_vm1, %v2670_v10 }
 0xda7   : > { %4809 = vmatpush3.bf16.msra.mxu1 %v6428_v11  ;;  %4810 = vmatprep.mubr.msk.bf16.mxu1 %vm5719_vm0, %v5717_v4 }
 0xda8   : > { %4814 = vmatprep.subr.bf16.mxu1 %v5717_v4 }
 0xe79   : > { %v2713_v19 = vpop.f32.mrb[40].mxu1 }
 0xe7a   : > { %v2714_v21 = vadd.f32 %v6439_v20, %v2713_v19  ;;  %v4806_v22 = vpop.f32.mrb[41].mxu1 }
 0xe7b   : > { %v2716_v23 = vpop.f32.mrb[42].mxu1 }
 0xe7c   : > { %v2717_v24 = vadd.f32 %v6439_v20, %v2716_v23  ;;  %v4807_v50 = vpop.f32.mrb[43].mxu1  ;;  %v2720_v25 = vsel %vm1021_vm2, %v2714_v21, -inf }
 0xe7d   : > { %2721 = vmax.xlane.f32.xlu0 %v2720_v25 }
 0xe7e   : > { %v2723_v51 = vsel %vm1021_vm2, %v2717_v24, -inf }
 0xe7f   : > { %2724 = vmax.xlane.f32.xlu1 %v2723_v51 }
 0xe90   : > { %2788 = vrot.lane.b32.xlu1 %v2670_v10, %s5720_s0 }
 0xe93   : > { %2791 = vrot.lane.b32.xlu0 %v2671_v15, %s5720_s0 }
 0xe94   : > { %2913 = vrot.lane.b32.xlu1 %v2671_v15, %s5721_s26 }
 0xe97   : > { %3034 = vrot.lane.b32.xlu0 %v2671_v15, %s5722_s13 }
 0xe98   : > { %2911 = vrot.lane.b32.xlu1 %v2670_v10, %s5721_s26 }
 0xe9c   : > { %3032 = vrot.lane.b32.xlu1 %v2670_v10, %s5722_s13 }
 0xf0a   : > { %v2722_v26 = vpop.xlane.xlu0 %2721 }
 0xf0b   : > { %v2726_v27 = vsub.f32 %v2714_v21, %v2722_v26 }
 0xf0c   : > { %v2725_v28 = vpop.xlane.xlu1 %2724 }
 0xf0d   : > { %v2728_v29 = vmul.f32 1.442695, %v2726_v27  ;;  %v2727_v31 = vsub.f32 %v2717_v24, %v2725_v28 }
 0xf0e   : > { %v2792_v34 = vpop.permute.xlu0 %2791 }
 0xf0f   : > { %v2730_v32 = vmul.f32 1.442695, %v2727_v31  ;;  %5328 = vpow2.f32 %v2728_v29  ;;  %v2797_v2 = vsel %vm973_vm1, %v2792_v34, 0 }
 0xf10   : > { %v2789_v33 = vpop.permute.xlu1 %2788 }
 0xf11   : > { %5330 = vpow2.f32 %v2730_v32 }
 0xf12   : > { %v3035_v38 = vpop.permute.xlu0 %3034 }
 0xf13   : > { %v3040_v1 = vsel %vm973_vm1, %v3035_v38, 0 }
 0xf14   : > { %v2914_v14 = vpop.permute.xlu1 %2913 }
 0xf15   : > { %v2919_v35 = vsel %vm973_vm1, %v2914_v14, 0 }
 0xf16   : > { %4827 = vmatpush3.bf16.xpose.msra.mxu0 %v2919_v35 }
 0xf17   : > { %4838 = vmatprep.subr.bf16.mxu0 %v5717_v4 }
 0xf18   : > { %v2912_v41 = vpop.permute.xlu1 %2911 }
 0xf19   : > { %v6453_v36 = vpop.eup %5328 }
 0xf1b   : > { %v6455_v40 = vpop.eup %5330 }
 0xf1c   : > { %v2740_v0 = vpack.c.bf16 %v6455_v40, %v6453_v36  ;;  %v3033_v3 = vpop.permute.xlu1 %3032 }
 0xf1d   : > { %4829 = vmatmul.mubr.msk.bf16.vlgmr.msra.gmra.mrb[28].mxu0 %vm973_vm1, %v2912_v41 }
 0xf1e   : > { %4811 = vmatmul.mubr.msk.bf16.vlgmr.msra.gmra.mrb[44].mxu1 %vm1021_vm2, %v2740_v0  ;;  %4839 = vmatpush3.bf16.xpose.msra.mxu0 %v3040_v1 }
 0xf1f   : > { %4815 = vmatpush3.bf16.xpose.msra.mxu1 %v2797_v2  ;;  %4840 = vmatprep.mubr.msk.bf16.mxu0 %vm5719_vm0, %v5717_v4 }
 0xf20   : > { %4816 = vmatprep.mubr.msk.bf16.mxu1 %vm5719_vm0, %v5717_v4  ;;  %4820 = vmatprep.subr.bf16.mxu1 %v5717_v4 }
 0xf21   : > { %4850 = vmatprep.subr.bf16.mxu0 %v5717_v4 }
 0xf25   : > { %4841 = vmatmul.mubr.msk.bf16.vlgmr.msra.gmra.mrb[32].mxu0 %vm973_vm1, %v3033_v3 }
 0xf26   : > { %4817 = vmatmul.mubr.msk.bf16.vlgmr.msra.gmra.mrb[48].mxu1 %vm973_vm1, %v2789_v33  ;;  %4866 = vmatprep.mubr.msk.bf16.mxu0 %vm5719_vm0, %v5717_v4 }
 0xf27   : > { %4822 = vmatprep.mubr.msk.bf16.mxu1 %vm5719_vm0, %v5717_v4 }
 0xff0   : > { %v2955_v57 = vpop.f32.mrb[28].mxu0 }
 0xff1   : > { %v2956_v8 = vadd.f32 %v6439_v20, %v2955_v57  ;;  %v6476_v16 = vpop.f32.mrb[44].mxu1  ;;  %v4830_v18 = vpop.f32.mrb[29].mxu0 }
 0xff2   : > { %v4812_v42 = vpop.f32.mrb[45].mxu1  ;;  %v2958_v45 = vpop.f32.mrb[30].mxu0 }
 0xff3   : > { %v2959_v46 = vadd.f32 %v6439_v20, %v2958_v45  ;;  %v6479_v48 = vpop.f32.mrb[46].mxu1  ;;  %v4831_v49 = vpop.f32.mrb[31].mxu0  ;;  %v2962_v53 = vsel %vm1021_vm2, %v2956_v8, -inf }
 0xff4   : > { %2963 = vmax.xlane.f32.xlu0 %v2962_v53  ;;  %v4813_v59 = vpop.f32.mrb[47].mxu1 }
 0xff5   : > { %v2965_v60 = vsel %vm1021_vm2, %v2959_v46, -inf  ;;  %v2732_v59 = vsel %vm1021_vm2, %v6453_v36, 0.0  ;;  %v5181_v36 = vld [vmem:[#allocation11 + $0x48] sm:$0xff]  }
 0xff8   : > { %2966 = vmax.xlane.f32.xlu0 %v2965_v60  ;;  %v3076_v61 = vpop.f32.mrb[32].mxu0  ;;  %v2735_v60 = vsel %vm1021_vm2, %v6455_v40, 0.0  ;;  %v5182_v40 = vld [vmem:[#allocation11 + $0x50] sm:$0xff]  }
 0xff9   : > { %v3077_v62 = vadd.f32 %v6439_v20, %v3076_v61  ;;  %v2833_v63 = vpop.f32.mrb[48].mxu1  ;;  %v4842_v37 = vpop.f32.mrb[33].mxu0 }
 0xffa   : > { %v4818_v39 = vpop.f32.mrb[49].mxu1  ;;  %v3079_v5 = vpop.f32.mrb[34].mxu0  ;;  %v2834_v6 = vadd.f32 %v6439_v20, %v2833_v63  ;;  %v5180_v37 = vld [vmem:[#allocation11 + $0x40] sm:$0xff]  }
 0xffb   : > { %v3080_v7 = vadd.f32 %v6439_v20, %v3079_v5  ;;  %v2836_v12 = vpop.f32.mrb[50].mxu1  ;;  %v4843_v47 = vpop.f32.mrb[35].mxu0  ;;  %v3083_v13 = vsel %vm1021_vm2, %v3077_v62, -inf  ;;  %4851 = vmatpush3.bf16.msra.mxu0 %v5180_v37 }
 0xffc   : > { %3084 = vmax.xlane.f32.xlu0 %v3083_v13  ;;  %v4819_v9 = vpop.f32.mrb[51].mxu1  ;;  %v2837_v10 = vadd.f32 %v6439_v20, %v2836_v12  ;;  %v2840_v17 = vsel %vm1021_vm2, %v2834_v6, -inf  ;;  %4852 = vmatprep.subr.bf16.mxu0 %v5717_v4  ;;  %v5183_v12 = vld [vmem:[#allocation11 + $0x58] sm:$0xff]   ;;  %v5184_v47 = vld [vmem:[#allocation11 + $0x60] sm:$0xff]  }
 0xffd   : > { %v3086_v15 = vsel %vm1021_vm2, %v3080_v7, -inf }
 0xffe   : > { %3087 = vmax.xlane.f32.xlu1 %v3086_v15  ;;  %v2843_v19 = vsel %vm1021_vm2, %v2837_v10, -inf }
 0xfff   : > { %4853 = vmatpush3.bf16.msra.mxu0 %v5181_v36 }
0x1000   : > { %2841 = vmax.xlane.f32.xlu0 %v2840_v17  ;;  %4854 = vmatprep.subr.bf16.mxu0 %v5717_v4 }
0x1002   : > { %2844 = vmax.xlane.f32.xlu1 %v2843_v19 }
0x1003   : > { %4855 = vmatpush3.bf16.msra.mxu0 %v5182_v40 }
0x1004   : > { %4856 = vmatprep.subr.bf16.mxu0 %v5717_v4 }
0x1007   : > { %4857 = vmatpush3.bf16.msra.mxu0 %v5183_v12 }
0x1008   : > { %4858 = vmatprep.subr.bf16.mxu0 %v5717_v4 }
0x100b   : > { %4859 = vmatpush3.bf16.msra.mxu0 %v5184_v47 }
0x100c   : > { %4860 = vmatprep.subr.bf16.mxu0 %v5717_v4 }
0x1013   : > { %2983 = vrot.lane.b32.xlu1 %v6428_v11, %s5721_s26 }
0x1016   : > { %2862 = vrot.lane.b32.xlu0 %v6428_v11, %s5720_s0 }
0x1017   : > { %3104 = vrot.lane.b32.xlu1 %v6428_v11, %s5722_s13 }
0x1081   : > { %v2964_v21 = vpop.xlane.xlu0 %2963 }
0x1082   : > { %v2968_v20 = vsub.f32 %v2956_v8, %v2964_v21 }
0x1084   : > { %v2970_v22 = vmul.f32 1.442695, %v2968_v20 }
0x1085   : > { %v2967_v23 = vpop.xlane.xlu0 %2966 }
0x1086   : > { %5332 = vpow2.f32 %v2970_v22  ;;  %v2969_v24 = vsub.f32 %v2959_v46, %v2967_v23  ;;  %v5185_v22 = vld [vmem:[#allocation11 + $0x68] sm:$0xff]  }
0x1087   : > { %4861 = vmatpush3.bf16.msra.mxu0 %v5185_v22  ;;  %v5190_v22 = vld [vmem:[#allocation13 + $0x104] ss:$16 sps:$4 sm:$0xff]  }
0x1088   : > { %v2972_v50 = vmul.f32 1.442695, %v2969_v24  ;;  %4862 = vmatprep.subr.bf16.mxu0 %v5717_v4 }
0x1089   : > { %v3085_v25 = vpop.xlane.xlu0 %3084 }
0x108a   : > { %5334 = vpow2.f32 %v2972_v50  ;;  %v3089_v51 = vsub.f32 %v3077_v62, %v3085_v25  ;;  %v5186_v25 = vld [vmem:[#allocation11 + $0x70] sm:$0xff]  }
0x108b   : > { %v3088_v26 = vpop.xlane.xlu1 %3087  ;;  %4863 = vmatpush3.bf16.msra.mxu0 %v5186_v25  ;;  %v5194_v25 = vld [vmem:[#allocation13 + $0x120] ss:$16 sps:$4 sm:$0xff]  }
0x108c   : > { %v3090_v28 = vsub.f32 %v3080_v7, %v3088_v26  ;;  %v3091_v31 = vmul.f32 1.442695, %v3089_v51  ;;  %4864 = vmatprep.subr.bf16.mxu0 %v5717_v4 }
0x108d   : > { %v2842_v27 = vpop.xlane.xlu0 %2841 }
0x108e   : > { %v2846_v29 = vsub.f32 %v2834_v6, %v2842_v27  ;;  %v3093_v38 = vmul.f32 1.442695, %v3090_v28 }
0x108f   : > { %v2845_v32 = vpop.xlane.xlu1 %2844 }
0x1090   : > { %v5333_v33 = vpop.eup %5332  ;;  %v2848_v34 = vmul.f32 1.442695, %v2846_v29  ;;  %v2847_v14 = vsub.f32 %v2837_v10, %v2845_v32 }
0x1091   : > { %v2863_v11 = vpop.permute.xlu0 %2862  ;;  %v2974_v35 = vsel %vm1021_vm2, %v5333_v33, 0.0 }
0x1092   : > { %5336 = vpow2.f32 %v2848_v34  ;;  %v2850_v41 = vmul.f32 1.442695, %v2847_v14  ;;  %2975 = vadd.xlane.f32.xlu0 %v2974_v35  ;;  %4821 = vmatpush3.bf16.msra.mxu1 %v2863_v11  ;;  %v5187_v34 = vld [vmem:[#allocation11 + $0x78] sm:$0xff]  }
0x1093   : > { %5338 = vpow2.f32 %v3091_v31  ;;  %4832 = vmatprep.subr.bf16.mxu1 %v5717_v4  ;;  %v2984_v46 = vpop.permute.xlu1 %2983  ;;  %4865 = vmatpush3.bf16.msra.mxu0 %v5187_v34  ;;  %v5205_v34 = vld [vmem:[#allocation13 + $0x14c] ss:$16 sps:$4 sm:$0xff]  }
0x1094   : > { %v5335_v0 = vpop.eup %5334  ;;  %5340 = vpow2.f32 %v2850_v41 }
0x1095   : > { %v2977_v1 = vsel %vm1021_vm2, %v5335_v0, 0.0  ;;  %5342 = vpow2.f32 %v3093_v38  ;;  %v2982_v61 = vpack.c.bf16 %v5335_v0, %v5333_v33 }
0x1096   : > { %2978 = vadd.xlane.f32.xlu0 %v2977_v1 }
0x1097   : > { %v3105_v62 = vpop.permute.xlu1 %3104 }
0x109c   : > { %v5337_v2 = vpop.eup %5336 }
0x109d   : > { %v5339_v3 = vpop.eup %5338  ;;  %v2852_v57 = vsel %vm1021_vm2, %v5337_v2, 0.0 }
0x109e   : > { %v5341_v8 = vpop.eup %5340  ;;  %2853 = vadd.xlane.f32.xlu1 %v2852_v57  ;;  %v3095_v49 = vsel %vm1021_vm2, %v5339_v3, 0.0 }
0x109f   : > { %v2855_v18 = vsel %vm1021_vm2, %v5341_v8, 0.0  ;;  %v2860_v42 = vpack.c.bf16 %v5341_v8, %v5337_v2  ;;  %v5343_v45 = vpop.eup %5342 }
0x10a0   : > { %2856 = vadd.xlane.f32.xlu0 %v2855_v18  ;;  %v3098_v53 = vsel %vm1021_vm2, %v5343_v45, 0.0  ;;  %v3103_v63 = vpack.c.bf16 %v5343_v45, %v5339_v3 }
0x10a1   : > { %4823 = vmatmul.mubr.msk.bf16.vlgmr.msra.gmra.mrb[52].mxu1 %vm1021_vm2, %v2860_v42 }
0x10a2   : > { %4833 = vmatpush3.bf16.msra.mxu1 %v2984_v46  ;;  %3096 = vadd.xlane.f32.xlu1 %v3095_v49 }
0x10a3   : > { %4834 = vmatprep.mubr.msk.bf16.mxu1 %vm5719_vm0, %v5717_v4  ;;  %4844 = vmatprep.subr.bf16.mxu1 %v5717_v4 }
0x10a4   : > { %3099 = vadd.xlane.f32.xlu0 %v3098_v53 }
0x10a6   : > { %2733 = vadd.xlane.f32.xlu1 %v2732_v59 }
0x10a8   : > { %2736 = vadd.xlane.f32.xlu0 %v2735_v60 }
0x10a9   : > { %4835 = vmatmul.mubr.msk.bf16.vlgmr.msra.gmra.mrb[56].mxu1 %vm1021_vm2, %v2982_v61 }
0x10aa   : > { %4845 = vmatpush3.bf16.msra.mxu1 %v3105_v62  ;;  %4846 = vmatprep.mubr.msk.bf16.mxu1 %vm5719_vm0, %v5717_v4 }
0x10ab   : > { %3559 = vmatprep.subr.bf16.mxu1 %v5190_v22  ;;  %v5239_v22 = vld [vmem:[#allocation14 + $0x180] sm:$0xff]  }
0x10b1   : > { %4847 = vmatmul.mubr.msk.bf16.vlgmr.msra.gmra.mrb[60].mxu1 %vm1021_vm2, %v3103_v63 }
0x10b2   : > { %3591 = vmatprep.mubr.bf16.mxu1 %v5718_v30 }
0x111f   : > { %v2976_v39 = vpop.xlane.xlu0 %2975 }
0x1123   : > { %v2979_v5 = vpop.xlane.xlu0 %2978 }
0x112b   : > { %v2854_v6 = vpop.xlane.xlu1 %2853 }
0x112c   : > { %5344 = vrcp.f32 %v2854_v6 }
0x112d   : > { %v2857_v7 = vpop.xlane.xlu0 %2856 }
0x112e   : > { %5346 = vrcp.f32 %v2857_v7 }
0x112f   : > { %5348 = vrcp.f32 %v2976_v39  ;;  %v3097_v23 = vpop.xlane.xlu1 %3096 }
0x1130   : > { %5350 = vrcp.f32 %v2979_v5 }
0x1131   : > { %v3100_v24 = vpop.xlane.xlu0 %3099  ;;  %5352 = vrcp.f32 %v3097_v23  ;;  %v5191_v23 = vld [vmem:[#allocation13 + $0x108] ss:$16 sps:$4 sm:$0xff]  }
0x1132   : > { %5354 = vrcp.f32 %v3100_v24  ;;  %v5196_v24 = vld [vmem:[#allocation13 + $0x124] ss:$16 sps:$4 sm:$0xff]  }
0x1133   : > { %v2734_v4 = vpop.xlane.xlu1 %2733 }
0x1134   : > { %5356 = vrcp.f32 %v2734_v4  ;;  %v5220_v4 = vld [vmem:[#allocation13 + $0x1a4] ss:$16 sps:$4 sm:$0xff]  }
0x1135   : > { %v2737_v8 = vpop.xlane.xlu0 %2736 }
0x1136   : > { %v5345_v9 = vpop.eup %5344  ;;  %5358 = vrcp.f32 %v2737_v8  ;;  %v5223_v8 = vld [vmem:[#allocation13 + $0x1ac] ss:$16 sps:$4 sm:$0xff]  }
0x1138   : > { %v5347_v15 = vpop.eup %5346 }
0x1139   : > { %v5349_v26 = vpop.eup %5348 }
0x113a   : > { %v5351_v28 = vpop.eup %5350 }
0x113b   : > { %v5353_v35 = vpop.eup %5352 }
0x113c   : > { %v5355_v41 = vpop.eup %5354 }
0x113e   : > { %v5357_v42 = vpop.eup %5356 }
0x113f   : > { %v2785_v61 = vmul.f32 %v5357_v42, %v6476_v16  ;;  %v4447_v16 = vld [vmem:[%s6697_s7 + $0x1] ss:$0 sm:$0xff] }
0x1140   : > { %v5359_v46 = vpop.eup %5358  ;;  %v5221_v42 = vld [vmem:[#allocation13 + $0x1a8] ss:$16 sps:$4 sm:$0xff]  }
0x1141   : > { %v2786_v62 = vmul.f32 %v5359_v46, %v6479_v48  ;;  %v5229_v46 = vld [vmem:[#allocation13 + $0x1cc] ss:$16 sps:$4 sm:$0xff]  }
0x1174   : > { %v2902_v13 = vpop.f32.mrb[52].mxu1 }
0x1175   : > { %v4824_v10 = vpop.f32.mrb[53].mxu1  ;;  %v2909_v19 = vmul.f32 %v5345_v9, %v2902_v13 }
0x1176   : > { %v2905_v17 = vpop.f32.mrb[54].mxu1 }
0x1177   : > { %v2910_v21 = vmul.f32 %v5347_v15, %v2905_v17  ;;  %v4825_v20 = vpop.f32.mrb[55].mxu1 }
0x1178   : > { %v5188_v20 = vld [vmem:[#allocation13 + $0x100] ss:$16 sps:$4 sm:$0xff]  }
0x1179   : > { %v5013_v50 = vpack.i.bf16 %v2910_v21, %v2909_v19  ;;  %3560 = vmatpush1.bf16.msra.mxu1 %v5188_v20  ;;  %v5238_v20 = vld [vmem:[#allocation14 + $0x100] sm:$0xff]  }
0x117a   : > { %3561 = vmatprep.subr.bf16.mxu1 %v5196_v24  ;;  %v5242_v24 = vld [vmem:[#allocation14 + $0x108] sm:$0xff]  }
0x117b   : > { %5014 = vrot.lane.b32.xlu1 %v5013_v50, %s5722_s13  ;;  %v5199_v50 = vld [vmem:[#allocation13 + $0x12c] ss:$16 sps:$4 sm:$0xff]   ;;  %s656_s13 = scalar_lea.vmem [#allocation16], %s4292_s4  ;;  %s5723_s4 = smov [#allocation16]  }
0x117c   : > { %v3023_v51 = vpop.f32.mrb[56].mxu1  ;;  %s4128_s12 = sshll.u32 %s656_s13, 4  ;;  %s5617_s19 = sshll.u32 %s5723_s4, 4  ;;  %s6646_s12 = int_to_ptr.vmem [resolvable:$true] %s4128_s12  ;;  %s5618_s19 = int_to_ptr.vmem [resolvable:$false] %s5617_s19 }
0x117d   : > { %v4836_v27 = vpop.f32.mrb[57].mxu1  ;;  %v3030_v31 = vmul.f32 %v5349_v26, %v3023_v51  ;;  %v5197_v51 = vld [vmem:[#allocation13 + $0x128] ss:$16 sps:$4 sm:$0xff]   ;;  %3562 = vmatpush1.bf16.msra.mxu1 %v5194_v25  ;;  %v5244_v25 = vld [vmem:[#allocation14 + $0x150] sm:$0xff]   ;;  %s5619_s6 = scalar_lea.vmem %s5618_s19, 512  ;;  %p5620_p3 = scmp.lt.s32.totalorder %s6646_s12, %s5618_s19 }
0x117e   : > { %v3026_v29 = vpop.f32.mrb[58].mxu1 }
0x117f   : > { %v3031_v32 = vmul.f32 %v5351_v28, %v3026_v29  ;;  %v4837_v33 = vpop.f32.mrb[59].mxu1 }
0x1180   : > { %v5202_v33 = vld [vmem:[#allocation13 + $0x144] ss:$16 sps:$4 sm:$0xff]  }
0x1181   : > { %v5018_v14 = vpack.i.bf16 %v3031_v32, %v3030_v31  ;;  %3563 = vmatprep.subr.bf16.mxu1 %v5202_v33  ;;  %v5254_v33 = vld [vmem:[#allocation14 + $0x120] sm:$0xff]  }
0x1183   : > { %5019 = vrot.lane.b32.xlu0 %v5018_v14, %s5721_s26  ;;  %v5200_v14 = vld [vmem:[#allocation13 + $0x140] ss:$16 sps:$4 sm:$0xff]   ;;  %s4537_s26 = sshll.u32 %s5832_s27, 8  ;;  %s5613_s27 = scalar_lea.vmem %s6646_s12, 256 }
0x1184   : > { %v3144_v11 = vpop.f32.mrb[60].mxu1  ;;  %3564 = vmatpush1.bf16.msra.mxu1 %v5200_v14  ;;  %v5256_v14 = vld [vmem:[#allocation14 + $0x168] sm:$0xff]   ;;  %s6644_s16 = scalar_lea.hbm %s6766_s14, %s4537_s26  ;;  %p5614_p10 = scmp.ne.s32.totalorder %s6646_s12, %s5613_s27 }
0x1185   : > { %v4848_v38 = vpop.f32.mrb[61].mxu1  ;;  %v3151_v1 = vmul.f32 %v5353_v35, %v3144_v11  ;;  %v5203_v11 = vld [vmem:[#allocation13 + $0x148] ss:$16 sps:$4 sm:$0xff]   ;;  %v5208_v35 = vld [vmem:[#allocation13 + $0x164] ss:$16 sps:$4 sm:$0xff]   ;;  %p5621_p6 = scmp.lt.s32.totalorder %s5619_s6, %s5613_s27 }
0x1186   : > { %v3147_v0 = vpop.f32.mrb[62].mxu1  ;;  %v5211_v38 = vld [vmem:[#allocation13 + $0x16c] ss:$16 sps:$4 sm:$0xff]   ;;  %3565 = vmatprep.subr.bf16.mxu1 %v5208_v35  ;;  %p5615_p5 = pnand %p5614_p10, %p6767_p11 }
0x1187   : > { %v3152_v2 = vmul.f32 %v5355_v41, %v3147_v0  ;;  %v4849_v3 = vpop.f32.mrb[63].mxu1  ;;  %v5206_v41 = vld [vmem:[#allocation13 + $0x160] ss:$16 sps:$4 sm:$0xff]   ;;  %v5209_v0 = vld [vmem:[#allocation13 + $0x168] ss:$16 sps:$4 sm:$0xff]   ;;  %p5622_p12 = por %p5621_p6, %p5620_p3 }
0x1188   : > { %3566 = vmatpush1.bf16.msra.mxu1 %v5206_v41  ;;  %v5212_v3 = vld [vmem:[#allocation13 + $0x180] ss:$16 sps:$4 sm:$0xff]   ;;  %v5258_v35 = vld [vmem:[#allocation14 + $0x128] sm:$0xff]   ;;  %p5616_p7 = pneg %p5615_p5 }
0x1189   : > { %v5023_v57 = vpack.i.bf16 %v3152_v2, %v3151_v1  ;;  %v5214_v1 = vld [vmem:[#allocation13 + $0x184] ss:$16 sps:$4 sm:$0xff]   ;;  %v5217_v2 = vld [vmem:[#allocation13 + $0x18c] ss:$16 sps:$4 sm:$0xff]  }
0x118a   : > { %3567 = vmatprep.subr.bf16.mxu1 %v5214_v1  ;;  %v5260_v41 = vld [vmem:[#allocation14 + $0x170] sm:$0xff]   ;;  %p5623_p8 = pnand %p5622_p12, %p5616_p7 }
0x118b   : > { %5024 = vrot.lane.b32.xlu1 %v5023_v57, %s5720_s0  ;;  %v5215_v57 = vld [vmem:[#allocation13 + $0x188] ss:$16 sps:$4 sm:$0xff]   ;;  %v5262_v1 = vld [vmem:[#allocation14 + $0x130] sm:$0xff]  }
0x118c   : > { %3568 = vmatpush1.bf16.msra.mxu1 %v5212_v3  ;;  %v5264_v3 = vld [vmem:[#allocation14 + $0x178] sm:$0xff]  }
0x118d   : > { %3569 = vmatprep.subr.bf16.mxu1 %v5220_v4  ;;  %v5266_v4 = vld [vmem:[#allocation14 + $0x138] sm:$0xff]  }
0x11ed   : > { %v5015_v18 = vpop.permute.xlu1 %5014 }
0x11ee   : > { %v5017_v49 = vunpack.i.h.bf16 %v5015_v18  ;;  %v5016_v53 = vunpack.i.l.bf16 %v5015_v18  ;;  %v5218_v18 = vld [vmem:[#allocation13 + $0x1a0] ss:$16 sps:$4 sm:$0xff]  }
0x11ef   : > { %3570 = vmatpush1.bf16.msra.mxu1 %v5218_v18  ;;  %v4460_v18 = vld [vmem:[%s6762_s10 + $0x4] sm:$0xf] }
0x11f0   : > { %v3178_v37 = vsel %vm973_vm1, %v2786_v62, %v5017_v49  ;;  %v3177_v36 = vsel %vm973_vm1, %v2785_v61, %v5016_v53  ;;  %v5224_v49 = vld [vmem:[#allocation13 + $0x1c0] ss:$16 sps:$4 sm:$0xff]   ;;  %v5227_v53 = vld [vmem:[#allocation13 + $0x1c8] ss:$16 sps:$4 sm:$0xff]  }
0x11f1   : > { %v5230_v61 = vld [vmem:[#allocation13 + $0x1e0] ss:$16 sps:$4 sm:$0xff]   ;;  %v5233_v62 = vld [vmem:[#allocation13 + $0x1e8] ss:$16 sps:$4 sm:$0xff]  }
0x11f5   : > { %v5020_v45 = vpop.permute.xlu0 %5019 }
0x11f6   : > { %v5022_v59 = vunpack.i.h.bf16 %v5020_v45  ;;  %v5021_v60 = vunpack.i.l.bf16 %v5020_v45  ;;  %v5226_v45 = vld [vmem:[#allocation13 + $0x1c4] ss:$16 sps:$4 sm:$0xff]  }
0x11f7   : > { %3571 = vmatprep.subr.bf16.mxu1 %v5226_v45  ;;  %v3390_v45 = vrot.slane %v4460_v18, %v6177_v56 }
0x11f8   : > { %v3180_v5 = vsel %vm1481_vm3, %v3178_v37, %v5022_v59  ;;  %v3179_v6 = vsel %vm1481_vm3, %v3177_v36, %v5021_v60  ;;  %v5232_v59 = vld [vmem:[#allocation13 + $0x1e4] ss:$16 sps:$4 sm:$0xff]   ;;  %v5235_v60 = vld [vmem:[#allocation13 + $0x1ec] ss:$16 sps:$4 sm:$0xff]   ;;  %3572 = vmatpush1.bf16.msra.mxu1 %v5224_v49  ;;  %v3394_v49 = vrot.slane %v4460_v18, %v1691_v52 }
0x11f9   : > { %3573 = vmatprep.subr.bf16.mxu1 %v5232_v59 }
0x11fc   : > { %3574 = vmatpush1.bf16.msra.mxu1 %v5230_v61 }
0x11fd   : > { %v5025_v63 = vpop.permute.xlu1 %5024 }
0x11fe   : > { %v5027_v40 = vunpack.i.h.bf16 %v5025_v63  ;;  %v5026_v39 = vunpack.i.l.bf16 %v5025_v63 }
0x1200   : > { %v3182_v7 = vsel %vm1484_vm4, %v3180_v5, %v5027_v40  ;;  %v3181_v12 = vsel %vm1484_vm4, %v3179_v6, %v5026_v39 }
0x1201   : > { %v3183_v47 = vpack.c.bf16 %v3182_v7, %v3181_v12  ;;  %v4458_v7 = vld [vmem:[%s6698_s8 + $0x1] ss:$0 sm:$0xff] }
0x1203   : > { %4867 = vmatmul.mubr.bf16.vlgmr.msra.gmra.mrb[36].mxu0 %v3183_v47 }
0x1204   : > { %3634 = vmatprep.mubr.bf16.mxu0 %v5718_v30  ;;  %v5193_v30 = vld [vmem:[#allocation13 + $0x10c] ss:$16 sps:$4 sm:$0xff]  }
0x1205   : > { %3602 = vmatprep.subr.bf16.mxu0 %v5193_v30  ;;  %v5241_v30 = vld [vmem:[#allocation14 + $0x1c8] sm:$0xff]  }
0x1206   : > { %3603 = vmatpush1.bf16.msra.mxu0 %v5191_v23  ;;  %v5240_v23 = vld [vmem:[#allocation14 + $0x148] sm:$0xff]  }
0x1207   : > { %3604 = vmatprep.subr.bf16.mxu0 %v5199_v50  ;;  %v5243_v50 = vld [vmem:[#allocation14 + $0x188] sm:$0xff]  }
0x120a   : > { %3605 = vmatpush1.bf16.msra.mxu0 %v5197_v51  ;;  %v5245_v51 = vld [vmem:[#allocation14 + $0x1d0] sm:$0xff]  }
0x120b   : > { %3606 = vmatprep.subr.bf16.mxu0 %v5205_v34  ;;  %v5255_v34 = vld [vmem:[#allocation14 + $0x1a0] sm:$0xff]  }
0x120e   : > { %3607 = vmatpush1.bf16.msra.mxu0 %v5203_v11  ;;  %v5257_v11 = vld [vmem:[#allocation14 + $0x1e8] sm:$0xff]  }
0x120f   : > { %3608 = vmatprep.subr.bf16.mxu0 %v5211_v38  ;;  %v5259_v38 = vld [vmem:[#allocation14 + $0x1a8] sm:$0xff]  }
0x1212   : > { %3609 = vmatpush1.bf16.msra.mxu0 %v5209_v0  ;;  %v5261_v0 = vld [vmem:[#allocation14 + $0x1f0] sm:$0xff]  }
0x1213   : > { %3610 = vmatprep.subr.bf16.mxu0 %v5217_v2  ;;  %v5263_v2 = vld [vmem:[#allocation14 + $0x1b0] sm:$0xff]  }
0x1216   : > { %3611 = vmatpush1.bf16.msra.mxu0 %v5215_v57  ;;  %v5265_v57 = vld [vmem:[#allocation14 + $0x1f8] sm:$0xff]  }
0x1217   : > { %3612 = vmatprep.subr.bf16.mxu0 %v5223_v8  ;;  %v5267_v8 = vld [vmem:[#allocation14 + $0x1b8] sm:$0xff]  }
0x121a   : > { %3613 = vmatpush1.bf16.msra.mxu0 %v5221_v42  ;;  %v3382_v42 = vrot.slane %v4460_v18, %v6174_v55 }
0x121b   : > { %3614 = vmatprep.subr.bf16.mxu0 %v5229_v46  ;;  %v3386_v46 = vrot.slane %v4460_v18, %v6183_v58 }
0x121e   : > { %3615 = vmatpush1.bf16.msra.mxu0 %v5227_v53 }
0x121f   : > { %3616 = vmatprep.subr.bf16.mxu0 %v5235_v60 }
0x1222   : > { %3617 = vmatpush1.bf16.msra.mxu0 %v5233_v62 }
0x12d6   : > { %v3291_v48 = vpop.f32.mrb[36].mxu0 }
0x12d7   : > { %v3292_v13 = vadd.f32 %v4447_v16, %v3291_v48  ;;  %v4868_v9 = vpop.f32.mrb[37].mxu0 }
0x12d8   : > { %v3294_v10 = vpop.f32.mrb[38].mxu0 }
0x12d9   : > { %v3295_v15 = vadd.f32 %v4447_v16, %v3294_v10  ;;  %v4869_v17 = vpop.f32.mrb[39].mxu0  ;;  %v3298_v19 = vadd.f32 %v3292_v13, %v6412_v43  ;;  %v4459_v13 = vld [vmem:[%s6699_s9 + $0x1] ss:$0 sm:$0xff] }
0x12db   : > { %3304 = vadd.xlane.f32.xlu1 %v3298_v19  ;;  %v3299_v21 = vadd.f32 %v3295_v15, %v6414_v44 }
0x12dd   : > { %3306 = vadd.xlane.f32.xlu0 %v3299_v21 }
0x1368   : > { %v3305_v43 = vpop.xlane.xlu1 %3304 }
0x1369   : > { %v3308_v26 = vmul.f32 0.0078125, %v3305_v43  ;;  %v5246_v43 = vld [vmem:[#allocation14 + $0x110] sm:$0xff]  }
0x136a   : > { %v3307_v44 = vpop.xlane.xlu0 %3306 }
0x136b   : > { %v6541_v27 = vsub.f32 %v3298_v19, %v3308_v26  ;;  %v3309_v28 = vmul.f32 0.0078125, %v3307_v44  ;;  %v5236_v19 = vld [vmem:[#allocation14 + $0x140] sm:$0xff]   ;;  %v5247_v26 = vld [vmem:[#allocation14 + $0x190] sm:$0xff]   ;;  %v5248_v44 = vld [vmem:[#allocation14 + $0x158] sm:$0xff]  }
0x136c   : > { %4650 = vmatprep.subr.bf16.mxu1 %v5236_v19 }
0x136d   : > { %v6543_v29 = vsub.f32 %v3299_v21, %v3309_v28  ;;  %v3312_v31 = vmul.f32 %v6541_v27, %v6541_v27  ;;  %v5237_v21 = vld [vmem:[#allocation14 + $0x1c0] sm:$0xff]   ;;  %v5250_v28 = vld [vmem:[#allocation14 + $0x118] sm:$0xff]  }
0x136e   : > { %4672 = vmatprep.subr.bf16.mxu0 %v5237_v21 }
0x136f   : > { %3314 = vadd.xlane.f32.xlu0 %v3312_v31  ;;  %v3313_v32 = vmul.f32 %v6543_v29, %v6543_v29  ;;  %v5252_v31 = vld [vmem:[#allocation14 + $0x160] sm:$0xff]  }
0x1371   : > { %3316 = vadd.xlane.f32.xlu1 %v3313_v32  ;;  %v5253_v32 = vld [vmem:[#allocation14 + $0x1e0] sm:$0xff]  }
0x13fc   : > { %v3315_v63 = vpop.xlane.xlu0 %3314 }
0x13fd   : > { %v3318_v37 = vmul.f32 0.0078125, %v3315_v63 }
0x13fe   : > { %v3317_v36 = vpop.xlane.xlu1 %3316 }
0x13ff   : > { %v3320_v40 = vadd.f32 1e-05, %v3318_v37  ;;  %v3319_v39 = vmul.f32 0.0078125, %v3317_v36 }
0x1401   : > { %5360 = vrsqrt.f32 %v3320_v40  ;;  %v3321_v5 = vadd.f32 1e-05, %v3319_v39 }
0x1403   : > { %5362 = vrsqrt.f32 %v3321_v5 }
0x140b   : > { %v5361_v6 = vpop.eup %5360 }
0x140c   : > { %v3324_v12 = vmul.f32 %v5361_v6, %v6541_v27  ;;  %v5249_v27 = vld [vmem:[#allocation14 + $0x1d8] sm:$0xff]  }
0x140d   : > { %v5363_v47 = vpop.eup %5362 }
0x140e   : > { %v3325_v16 = vmul.f32 %v5363_v47, %v6543_v29  ;;  %v3332_v48 = vmul.f32 %v4458_v7, %v3324_v12  ;;  %v5251_v29 = vld [vmem:[#allocation14 + $0x198] sm:$0xff]  }
0x1410   : > { %v3333_v9 = vmul.f32 %v4458_v7, %v3325_v16  ;;  %v6557_v10 = vadd.f32 %v4459_v13, %v3332_v48 }
0x1412   : > { %v6559_v15 = vadd.f32 %v4459_v13, %v3333_v9 }
0x1414   : > { %v3342_v17 = vpack.c.bf16 %v6559_v15, %v6557_v10 }
0x1416   : > { %3592 = vmatmul.mubr.bf16.vlgmr.msra.gmra.mrb[64].mxu1 %v3342_v17  ;;  %3635 = vmatmul.mubr.bf16.vlgmr.msra.gmra.mrb[40].mxu0 %v3342_v17 }
0x1417   : > { %4651 = vmatpush3.bf16.msra.mxu1 %v5238_v20  ;;  %4673 = vmatpush3.bf16.msra.mxu0 %v5239_v22 }
0x1418   : > { %4652 = vmatprep.subr.bf16.mxu1 %v5240_v23  ;;  %4674 = vmatprep.subr.bf16.mxu0 %v5241_v30 }
0x141b   : > { %4653 = vmatpush3.bf16.msra.mxu1 %v5242_v24  ;;  %4675 = vmatpush3.bf16.msra.mxu0 %v5243_v50 }
0x141c   : > { %4654 = vmatprep.subr.bf16.mxu1 %v5244_v25  ;;  %4676 = vmatprep.subr.bf16.mxu0 %v5245_v51 }
0x141f   : > { %4655 = vmatpush3.bf16.msra.mxu1 %v5246_v43  ;;  %4677 = vmatpush3.bf16.msra.mxu0 %v5247_v26 }
0x1420   : > { %4656 = vmatprep.subr.bf16.mxu1 %v5248_v44  ;;  %4678 = vmatprep.subr.bf16.mxu0 %v5249_v27 }
0x1423   : > { %4657 = vmatpush3.bf16.msra.mxu1 %v5250_v28  ;;  %4679 = vmatpush3.bf16.msra.mxu0 %v5251_v29 }
0x1424   : > { %4658 = vmatprep.subr.bf16.mxu1 %v5252_v31  ;;  %4680 = vmatprep.subr.bf16.mxu0 %v5253_v32 }
0x1427   : > { %4659 = vmatpush3.bf16.msra.mxu1 %v5254_v33  ;;  %4681 = vmatpush3.bf16.msra.mxu0 %v5255_v34 }
0x1428   : > { %4660 = vmatprep.subr.bf16.mxu1 %v5256_v14  ;;  %4682 = vmatprep.subr.bf16.mxu0 %v5257_v11 }
0x142b   : > { %4661 = vmatpush3.bf16.msra.mxu1 %v5258_v35  ;;  %4683 = vmatpush3.bf16.msra.mxu0 %v5259_v38 }
0x142c   : > { %4662 = vmatprep.subr.bf16.mxu1 %v5260_v41  ;;  %4684 = vmatprep.subr.bf16.mxu0 %v5261_v0 }
0x142f   : > { %4663 = vmatpush3.bf16.msra.mxu1 %v5262_v1  ;;  %4685 = vmatpush3.bf16.msra.mxu0 %v5263_v2 }
0x1430   : > { %4664 = vmatprep.subr.bf16.mxu1 %v5264_v3  ;;  %4686 = vmatprep.subr.bf16.mxu0 %v5265_v57 }
0x1433   : > { %4665 = vmatpush3.bf16.msra.mxu1 %v5266_v4  ;;  %4687 = vmatpush3.bf16.msra.mxu0 %v5267_v8 }
0x14e9   : > { %v3593_v53 = vpop.f32.mrb[64].mxu1  ;;  %v3636_v59 = vpop.f32.mrb[40].mxu0 }
0x14ea   : > { %v6571_v60 = vadd.f32 %v3593_v53, %v3382_v42  ;;  %v6573_v61 = vadd.f32 %v3636_v59, %v3390_v45  ;;  %v3595_v62 = vpop.f32.mrb[65].mxu1  ;;  %v3638_v63 = vpop.f32.mrb[41].mxu0 }
0x14eb   : > { %v6575_v37 = vadd.f32 %v3595_v62, %v3386_v46  ;;  %v6577_v36 = vadd.f32 %v3638_v63, %v3394_v49  ;;  %v3597_v55 = vpop.f32.mrb[66].mxu1  ;;  %v3640_v40 = vpop.f32.mrb[42].mxu0 }
0x14ec   : > { %v3645_v56 = vmul.f32 %v6571_v60, %v6571_v60  ;;  %v3647_v54 = vmul.f32 %v6573_v61, %v6573_v61  ;;  %v6583_v58 = vadd.f32 %v3597_v55, %v3382_v42  ;;  %v6585_v52 = vadd.f32 %v3640_v40, %v3390_v45  ;;  %v3599_v39 = vpop.f32.mrb[67].mxu1  ;;  %v3642_v5 = vpop.f32.mrb[43].mxu0 }
0x14ed   : > { %v3646_v6 = vmul.f32 %v6575_v37, %v6575_v37  ;;  %v3648_v7 = vmul.f32 %v6577_v36, %v6577_v36  ;;  %v6591_v12 = vadd.f32 %v3599_v39, %v3386_v46  ;;  %v6593_v47 = vadd.f32 %v3642_v5, %v3394_v49 }
0x14ee   : > { %v3653_v16 = vmul.f32 %v3645_v56, %v6571_v60  ;;  %v3655_v48 = vmul.f32 %v3647_v54, %v6573_v61  ;;  %v3649_v13 = vmul.f32 %v6583_v58, %v6583_v58  ;;  %v3651_v9 = vmul.f32 %v6585_v52, %v6585_v52 }
0x14ef   : > { %v3654_v17 = vmul.f32 %v3646_v6, %v6575_v37  ;;  %v3656_v19 = vmul.f32 %v3648_v7, %v6577_v36  ;;  %v3650_v21 = vmul.f32 %v6591_v12, %v6591_v12  ;;  %v3652_v20 = vmul.f32 %v6593_v47, %v6593_v47 }
0x14f0   : > { %v3661_v22 = vmul.f32 0.044715, %v3653_v16  ;;  %v3663_v23 = vmul.f32 0.044715, %v3655_v48  ;;  %v3657_v30 = vmul.f32 %v3649_v13, %v6583_v58  ;;  %v3659_v24 = vmul.f32 %v3651_v9, %v6585_v52 }
0x14f1   : > { %v3662_v50 = vmul.f32 0.044715, %v3654_v17  ;;  %v3664_v25 = vmul.f32 0.044715, %v3656_v19  ;;  %v3658_v51 = vmul.f32 %v3650_v21, %v6591_v12  ;;  %v3660_v43 = vmul.f32 %v3652_v20, %v6593_v47 }
0x14f2   : > { %v3669_v26 = vadd.f32 %v3661_v22, %v6571_v60  ;;  %v3671_v44 = vadd.f32 %v3663_v23, %v6573_v61  ;;  %v3665_v27 = vmul.f32 0.044715, %v3657_v30  ;;  %v3667_v28 = vmul.f32 0.044715, %v3659_v24 }
0x14f3   : > { %v3670_v29 = vadd.f32 %v3662_v50, %v6575_v37  ;;  %v3672_v31 = vadd.f32 %v3664_v25, %v6577_v36  ;;  %v3666_v32 = vmul.f32 0.044715, %v3658_v51  ;;  %v3668_v33 = vmul.f32 0.044715, %v3660_v43 }
0x14f4   : > { %v3677_v34 = vmul.f32 0.7978846, %v3669_v26  ;;  %v3679_v14 = vmul.f32 0.7978846, %v3671_v44  ;;  %v3673_v11 = vadd.f32 %v3665_v27, %v6583_v58  ;;  %v3675_v35 = vadd.f32 %v3667_v28, %v6585_v52 }
0x14f5   : > { %v3678_v38 = vmul.f32 0.7978846, %v3670_v29  ;;  %v3680_v41 = vmul.f32 0.7978846, %v3672_v31  ;;  %v3674_v0 = vadd.f32 %v3666_v32, %v6591_v12  ;;  %v3676_v1 = vadd.f32 %v3668_v33, %v6593_v47 }
0x14f6   : > { %5364 = vtanh.f32 %v3677_v34  ;;  %v3681_v2 = vmul.f32 0.7978846, %v3673_v11  ;;  %v3683_v3 = vmul.f32 0.7978846, %v3675_v35 }
0x14f7   : > { %5366 = vtanh.f32 %v3679_v14  ;;  %v3682_v57 = vmul.f32 0.7978846, %v3674_v0  ;;  %v3684_v4 = vmul.f32 0.7978846, %v3676_v1 }
0x14f8   : > { %5368 = vtanh.f32 %v3678_v38 }
0x14f9   : > { %5370 = vtanh.f32 %v3680_v41 }
0x14fa   : > { %5372 = vtanh.f32 %v3681_v2 }
0x14fb   : > { %5374 = vtanh.f32 %v3683_v3 }
0x14fc   : > { %5376 = vtanh.f32 %v3682_v57 }
0x14fd   : > { %5378 = vtanh.f32 %v3684_v4 }
0x1500   : > { %v5365_v8 = vpop.eup %5364 }
0x1501   : > { %v5367_v18 = vpop.eup %5366  ;;  %v3693_v42 = vadd.f32 1.0, %v5365_v8 }
0x1502   : > { %v5369_v45 = vpop.eup %5368  ;;  %v3695_v46 = vadd.f32 1.0, %v5367_v18 }
0x1503   : > { %v5371_v49 = vpop.eup %5370  ;;  %v3694_v53 = vadd.f32 1.0, %v5369_v45  ;;  %v3701_v55 = vmul.f32 0.5, %v3693_v42 }
0x1504   : > { %v5373_v59 = vpop.eup %5372  ;;  %v3696_v62 = vadd.f32 1.0, %v5371_v49  ;;  %v3703_v54 = vmul.f32 0.5, %v3695_v46 }
0x1505   : > { %v5375_v63 = vpop.eup %5374  ;;  %v3697_v40 = vadd.f32 1.0, %v5373_v59  ;;  %v3702_v16 = vmul.f32 0.5, %v3694_v53  ;;  %v3709_v17 = vmul.f32 %v3701_v55, %v6571_v60  ;;  %v4529_v53 = vld [vmem:[%s6764_s11 + $0x1] ss:$0 sm:$0xff] }
0x1506   : > { %v5377_v56 = vpop.eup %5376  ;;  %v3699_v39 = vadd.f32 1.0, %v5375_v63  ;;  %v3704_v9 = vmul.f32 0.5, %v3696_v62  ;;  %v3711_v20 = vmul.f32 %v3703_v54, %v6573_v61  ;;  %v4530_v63 = vld [vmem:[%s6765_s25 + $0x1] ss:$0 sm:$0xff] }
0x1507   : > { %v5379_v5 = vpop.eup %5378  ;;  %v3705_v6 = vmul.f32 0.5, %v3697_v40  ;;  %v3698_v7 = vadd.f32 1.0, %v5377_v56  ;;  %v3710_v30 = vmul.f32 %v3702_v16, %v6575_v37  ;;  %v4494_v37 = vld [vmem:[%s6763_s20 + $0x1] ss:$0 sm:$0xff] }
0x1508   : > { %v3707_v48 = vmul.f32 0.5, %v3699_v39  ;;  %v3700_v13 = vadd.f32 1.0, %v5379_v5  ;;  %v3712_v25 = vmul.f32 %v3704_v9, %v6577_v36 }
0x1509   : > { %v3713_v19 = vmul.f32 %v3705_v6, %v6583_v58  ;;  %v3706_v21 = vmul.f32 0.5, %v3698_v7 }
0x150a   : > { %v3715_v22 = vmul.f32 %v3707_v48, %v6585_v52  ;;  %v3708_v23 = vmul.f32 0.5, %v3700_v13 }
0x150b   : > { %v3714_v24 = vmul.f32 %v3706_v21, %v6591_v12  ;;  %v3717_v50 = vpack.c.bf16 %v3713_v19, %v3709_v17 }
0x150c   : > { %v3716_v51 = vmul.f32 %v3708_v23, %v6593_v47  ;;  %v3719_v43 = vpack.c.bf16 %v3715_v22, %v3711_v20 }
0x150d   : > { %v3718_v26 = vpack.c.bf16 %v3714_v24, %v3710_v30 }
0x150e   : > { %v3720_v60 = vpack.c.bf16 %v3716_v51, %v3712_v25 }
0x150f   : > { %4018 = vmatprep.mubr.bf16.mxu1 %v3718_v26 }
0x1510   : > { %4059 = vmatprep.mubr.bf16.mxu0 %v3720_v60  ;;  %4019 = vmatmul.mubr.bf16.vlgmr.msra.gmra.mrb[68].mxu1 %v3717_v50 }
0x1511   : > { %4060 = vmatmul.mubr.bf16.vlgmr.msra.gmra.mrb[44].mxu0 %v3719_v43 }
0x15e3   : > { %v4666_v61 = vpop.f32.mrb[68].mxu1 }
0x15e4   : > { %v4688_v58 = vpop.f32.mrb[44].mxu0  ;;  %v4667_v52 = vpop.f32.mrb[69].mxu1 }
0x15e5   : > { %v4668_v12 = vadd.f32 %v4667_v52, %v4666_v61  ;;  %v4689_v44 = vpop.f32.mrb[45].mxu0  ;;  %v4669_v27 = vpop.f32.mrb[70].mxu1 }
0x15e6   : > { %v4690_v36 = vadd.f32 %v4689_v44, %v4688_v58  ;;  %v4691_v28 = vpop.f32.mrb[46].mxu0  ;;  %v4670_v47 = vpop.f32.mrb[71].mxu1 }
0x15e7   : > { %v4021_v29 = vadd.f32 %v4668_v12, %v4494_v37  ;;  %v4671_v31 = vadd.f32 %v4670_v47, %v4669_v27  ;;  %v4692_v32 = vpop.f32.mrb[47].mxu0 }
0x15e8   : > { %v4693_v33 = vadd.f32 %v4692_v32, %v4691_v28 }
0x15e9   : > { %v4062_v34 = vadd.f32 %v4690_v36, %v4021_v29  ;;  %v4024_v14 = vadd.f32 %v4671_v31, %v4494_v37 }
0x15eb   : > { %v4065_v11 = vadd.f32 %v4693_v33, %v4024_v14  ;;  %v4068_v35 = vadd.f32 %v4062_v34, %v6557_v10 }
0x15ed   : > { %4074 = vadd.xlane.f32.xlu0 %v4068_v35  ;;  %v4069_v38 = vadd.f32 %v4065_v11, %v6559_v15 }
0x15ef   : > { %4076 = vadd.xlane.f32.xlu1 %v4069_v38 }
0x167a   : > { %v4075_v41 = vpop.xlane.xlu0 %4074 }
0x167b   : > { %v4078_v0 = vmul.f32 0.0078125, %v4075_v41 }
0x167c   : > { %v4077_v1 = vpop.xlane.xlu1 %4076 }
0x167d   : > { %v4080_v2 = vsub.f32 %v4068_v35, %v4078_v0  ;;  %v4079_v3 = vmul.f32 0.0078125, %v4077_v1 }
0x167f   : > { %v4081_v57 = vsub.f32 %v4069_v38, %v4079_v3  ;;  %v4082_v4 = vmul.f32 %v4080_v2, %v4080_v2 }
0x1681   : > { %4084 = vadd.xlane.f32.xlu0 %v4082_v4  ;;  %v4083_v8 = vmul.f32 %v4081_v57, %v4081_v57 }
0x1683   : > { %4086 = vadd.xlane.f32.xlu1 %v4083_v8 }
0x170e   : > { %v4085_v18 = vpop.xlane.xlu0 %4084 }
0x170f   : > { %v4088_v42 = vmul.f32 0.0078125, %v4085_v18 }
0x1710   : > { %v4087_v45 = vpop.xlane.xlu1 %4086 }
0x1711   : > { %v4090_v10 = vadd.f32 1e-05, %v4088_v42  ;;  %v4089_v46 = vmul.f32 0.0078125, %v4087_v45 }
0x1713   : > { %5380 = vrsqrt.f32 %v4090_v10  ;;  %v4091_v15 = vadd.f32 1e-05, %v4089_v46 }
0x1715   : > { %5382 = vrsqrt.f32 %v4091_v15 }
0x171d   : > { %v5381_v49 = vpop.eup %5380 }
0x171e   : > { %v4094_v59 = vmul.f32 %v5381_v49, %v4080_v2 }
0x171f   : > { %v5383_v62 = vpop.eup %5382 }
0x1720   : > { %v4102_v55 = vmul.f32 %v4529_v53, %v4094_v59  ;;  %v4095_v40 = vmul.f32 %v5383_v62, %v4081_v57 }
0x1722   : > { %v4110_v56 = vadd.f32 %v4530_v63, %v4102_v55  ;;  %v4103_v54 = vmul.f32 %v4529_v53, %v4095_v40 }
0x1724   : > { %v4111_v39 = vadd.f32 %v4530_v63, %v4103_v54  ;;  %4112 = vst [vmem:[%s656_s13] sm:$0xff] %v4110_v56 }
0x1726   : > { %4113 = vst [vmem:[%s656_s13 + $0x8] sm:$0xff] %v4111_v39 }
0x1727   : > { %5626 = shalt.err (!%p5623_p8)
}
0x1728   : > { %s5627_s28 = scalar_lea.hbm %s6644_s16, 256  ;;  %s5631_s13 = scalar_lea.hbm %s6766_s14, 512 }
0x1729   : > { %p5628_p9 = scmp.ne.s32.totalorder %s6644_s16, %s5627_s28  ;;  %p5632_p13 = scmp.lt.u32.totalorder %s6644_s16, %s6766_s14 }
0x172a   : > { %p5633_p0 = scmp.lt.u32.totalorder %s5631_s13, %s5627_s28  ;;  %p5635_p10 = scmp.lt.u32.totalorder %s5627_s28, %s6644_s16 }
0x172b   : > { %p5629_p4 = pnand %p5628_p9, %p6767_p11 }
0x172c   : > { %p5634_p2 = por %p5633_p0, %p5632_p13 }
0x172d   : > { %p5630_p1 = pneg %p5629_p4 }
0x172e   : > { %p5636_p5 = por %p5635_p10, %p5634_p2 }
0x1730   : > { %p5637_p7 = pnand %p5636_p5, %p5630_p1 }
0x1732   : > { %5640 = shalt.err (!%p5637_p7)
}
0x1733   : > { %s5724_s27 = smov 128   ;;  %s5725_s4 = smov 8  }
0x1734   : > { %4898 = dma.vmem_to_hbm [thread:$0]  (%p6767_p11), %s6646_s12, 256, %s6644_s16, %s4115_s18, %s5724_s27, %s5724_s27, %s5725_s4  }
0x1735 PF: > { %s4143_s19 = sand.u32 1, %s5687_s21   ;;  %p6768_p3 = scmp.ne.s32.totalorder %s6748_s17, 0 }
0x1736   : > { %p6769_p6 = scmp.ge.s32.totalorder %s5699_s24, 2  ;;  %s4144_s6 = scalar_lea.sflag [#allocation4], %s4143_s19 }
0x1738   : > { %p4927_p12 = pnand %p6769_p6, %p6768_p3 }
0x173a   : > { %5682 = dma.done.wait (!%p4927_p12), %s4144_s6, 256  }
0x173b   : > { %5684 = vsyncadd (!%p4927_p12), %s4144_s6, 4294967040  ;;  %s6770_s28 = sld [smem:[#allocation24_spill]]  ;;  %p35_p8 = scmp.ge.s32.totalorder %s5995_s29, 4  }
0x173c   : > { %s6771_s21 = smov %s5691_s22  ;;  %s6772_s22 = smov %s5695_s23 }
0x173d   : > { %s6774_s24 = smov %s5995_s29  ;;  %37 = sbr.rel (!%p35_p8) target bundleno = 23 (0x17), region = 178 }
0x1741   : > { %s6773_s23 = smov %s6770_s28 }
0x1744   :  { %4149 = vsyncpa [#allocation3], 1 }
0x1745   :  { %4151 = vsyncpa [#allocation3 + $0x1], 1 }
0x1746   :  { %4152 = vsyncpa [#allocation6], 1 }
0x1747   :  { %4154 = vsyncpa [#allocation6 + $0x1], 1 }
0x1748   :  { %4155 = vsyncpa [#allocation9], 1 }
0x1749   :  { %4156 = vsyncpa [#allocation12], 1 }
0x174a   :  { %4157 = vsyncpa [#allocation15], 1 }
0x174b   :  { %4158 = vsyncpa [#allocation4], 1 }
0x174c   :  { %4160 = vsyncpa [#allocation4 + $0x1], 1 }

</bundles_post_ra>
